<compile_context>
chip_gen: v6e
topology: v6e:2x2x1
jax: 0.10.0
libtpu: 0.0.40
codegen_flags: <defaults>
</compile_context>

<pallas_src>
import jax
import jax.numpy as jnp
from jax import lax
from jax.experimental import pallas as pl
from jax.experimental.pallas import tpu as pltpu

HIDDEN = 128        # nn.Embedding(vocab, 128) and nn.LSTM(128, 128) are hardwired
OUT_DIM = 2
WEIGHT_DTYPE = jnp.bfloat16   # MXU-native weight storage; f32 accumulation


# --------------------------- fused forward kernel ---------------------------
def _make_fused_kernel(t_ctx, t_qna):
    """Builds the fused kernel; t_ctx / t_qna are static sequence lengths."""

    def kernel(ids_c_ref, ids_q_ref, fused_c_ref, fused_q_ref, b_c_ref, b_q_ref,
               whh_c_ref, whh_q_ref, wout_ref, bout_ref,
               pred_ref, idx_ref, pre_c_ref, pre_q_ref):
        vocab = fused_c_ref.shape[0]
        H = whh_c_ref.shape[0]                       # 128

        # ---- embedding folded into the input projection (offline: embed @ W_ih).
        # One one-hot matmul per LSTM, done once, off the serial recurrence path.
        lane_c = lax.broadcasted_iota(jnp.int32, (t_ctx, vocab), 1)
        oh_c = (ids_c_ref[...] == lane_c).astype(WEIGHT_DTYPE)        # (Tc, V)
        pre_c_ref[...] = jnp.dot(
            oh_c, fused_c_ref[...], preferred_element_type=jnp.float32
        ) + b_c_ref[...]                                              # (Tc, 4H)

        lane_q = lax.broadcasted_iota(jnp.int32, (t_qna, vocab), 1)
        oh_q = (ids_q_ref[...] == lane_q).astype(WEIGHT_DTYPE)        # (Tq, V)
        pre_q_ref[...] = jnp.dot(
            oh_q, fused_q_ref[...], preferred_element_type=jnp.float32
        ) + b_q_ref[...]                                              # (Tq, 4H)

        # ---- one LSTM step; gate column order is [i, f, o, g] (sigmoid x3, tanh).
        def lstm_step(h, c, whh_ref, pre_ref, t):
            rec = jnp.dot(h.astype(WEIGHT_DTYPE), whh_ref[...],
                          preferred_element_type=jnp.float32)         # (1, 4H)
            gates = rec + pre_ref[t:t + 1, :]
            sig = jax.nn.sigmoid(gates[:, 0:3 * H])                   # [i | f | o]
            g = jnp.tanh(gates[:, 3 * H:4 * H])
            c_new = sig[:, H:2 * H] * c + sig[:, 0:H] * g
            h_new = sig[:, 2 * H:3 * H] * jnp.tanh(c_new)
            return h_new, c_new

        h_c = jnp.zeros((1, H), jnp.float32)
        c_c = jnp.zeros((1, H), jnp.float32)
        h_q = jnp.zeros((1, H), jnp.float32)
        c_q = jnp.zeros((1, H), jnp.float32)

        # ---- interleaved, length-truncated recurrences (fully unrolled; T static).
        for t in range(max(t_ctx, t_qna)):
            if t < t_ctx:
                h_c, c_c = lstm_step(h_c, c_c, whh_c_ref, pre_c_ref, t)
            if t < t_qna:
                h_q, c_q = lstm_step(h_q, c_q, whh_q_ref, pre_q_ref, t)

        # ---- head: relu(concat) @ W_out^T + b on the VPU (256x2 MXU is pathological).
        act = jnp.maximum(jnp.concatenate([h_c, h_q], axis=1), 0.0)   # (1, 2H)
        out_dim = wout_ref.shape[0]
        cols = [jnp.sum(act * wout_ref[k:k + 1, :], axis=1, keepdims=True)
                for k in range(out_dim)]
        pred = jnp.concatenate(cols, axis=1) + bout_ref[...]          # (1, out_dim)
        pred_ref[...] = pred

        # ---- fused argmax (first max index, matches torch.max tie behavior).
        if out_dim == 2:
            idx_ref[...] = (pred[:, 1:2] > pred[:, 0:1]).astype(jnp.int32)
        else:
            lane = lax.broadcasted_iota(jnp.int32, (1, out_dim), 1)
            mx = jnp.max(pred, axis=1, keepdims=True)
            idx_ref[...] = jnp.min(jnp.where(pred == mx, lane, out_dim),
                                   axis=1, keepdims=True).astype(jnp.int32)

    return kernel


# ------------------------------ parameters ----------------------------------
def init_params(key, vocab_size, hidden_dim=HIDDEN, out_dim=OUT_DIM):
    """PyTorch-equivalent parameters (transposed weights, gate order [i,f,g,o])."""
    H = 128  # LSTM hidden size hardwired in the PyTorch module
    ks = jax.random.split(key, 12)
    s_lstm = 1.0 / jnp.sqrt(jnp.float32(H))
    s_out = 1.0 / jnp.sqrt(jnp.float32(2 * H))

    def u(k, shape, s):
        return jax.random.uniform(k, shape, jnp.float32, -s, s)

    return {
        "embed": jax.random.normal(ks[0], (vocab_size, hidden_dim), jnp.float32),
        # ctxt_RNN (weights stored transposed for x @ W^T layout), combined bias b_ih + b_hh
        "ctxt_wih_t": u(ks[1], (hidden_dim, 4 * H), s_lstm),
        "ctxt_whh_t": u(ks[2], (H, 4 * H), s_lstm),
        "ctxt_b": u(ks[3], (1, 4 * H), s_lstm) + u(ks[4], (1, 4 * H), s_lstm),
        # qna_RNN
        "qna_wih_t": u(ks[5], (hidden_dim, 4 * H), s_lstm),
        "qna_whh_t": u(ks[6], (H, 4 * H), s_lstm),
        "qna_b": u(ks[7], (1, 4 * H), s_lstm) + u(ks[8], (1, 4 * H), s_lstm),
        # out = nn.Linear(256, out_dim); PyTorch layout (out_features, in_features)
        "out_w": u(ks[9], (out_dim, 2 * H), s_out),
        "out_b": u(ks[10], (out_dim,), s_out),
    }


def pack_params(p, hidden=HIDDEN, weight_dtype=WEIGHT_DTYPE):
    """Fold the embedding into W_ih, permute gate blocks [i,f,g,o] -> [i,f,o,g],
    and store the weight tables in the MXU-native dtype."""
    H = 128

    def gate_perm(w):
        return jnp.concatenate([w[..., g * H:(g + 1) * H] for g in (0, 1, 3, 2)],
                               axis=-1)

    fused_c = gate_perm(jnp.dot(p["embed"], p["ctxt_wih_t"]))   # (V, 4H), f32
    fused_q = gate_perm(jnp.dot(p["embed"], p["qna_wih_t"]))

    return {
        "wih_fused_ctx": fused_c.astype(weight_dtype),          # (V, 4H)
        "wih_fused_qna": fused_q.astype(weight_dtype),
        "whh_ctx": gate_perm(p["ctxt_whh_t"]).astype(weight_dtype),  # (H, 4H)
        "whh_qna": gate_perm(p["qna_whh_t"]).astype(weight_dtype),
        "b_ctx": gate_perm(p["ctxt_b"]),                        # (1, 4H) f32
        "b_qna": gate_perm(p["qna_b"]),
        "w_out": p["out_w"],                                    # (out_dim, 2H) f32
        "b_out": p["out_b"].reshape(1, -1),                     # (1, out_dim) f32
    }


# ------------------------------- forward ------------------------------------
def forward(packed, context_seq, qna_seq):
    H = HIDDEN
    t_ctx = int(context_seq.shape[0])
    t_qna = int(qna_seq.shape[0])
    out_dim = packed["w_out"].shape[0]

    ids_c = context_seq.astype(jnp.int32).reshape(t_ctx, 1)
    ids_q = qna_seq.astype(jnp.int32).reshape(t_qna, 1)

    pred, idx = pl.pallas_call(
        _make_fused_kernel(t_ctx, t_qna),
        out_shape=(jax.ShapeDtypeStruct((1, out_dim), jnp.float32),
                   jax.ShapeDtypeStruct((1, 1), jnp.int32)),
        scratch_shapes=[pltpu.VMEM((t_ctx, 4 * H), jnp.float32),   # ctx input gates
                        pltpu.VMEM((t_qna, 4 * H), jnp.float32)],  # qna input gates
    )(ids_c, ids_q,
      packed["wih_fused_ctx"], packed["wih_fused_qna"],
      packed["b_ctx"], packed["b_qna"],
      packed["whh_ctx"], packed["whh_qna"],
      packed["w_out"], packed["b_out"])

    prediction = pred[0]        # (out_dim,)
    # TODO(synk): PyTorch does idx.item(); we return a device scalar instead.
    return prediction, idx[0, 0]


if __name__ == "__main__":
    key = jax.random.PRNGKey(0)
    pkey, ckey, qkey = jax.random.split(key, 3)

    vocab_size = 64
    context_len = 16
    qna_len = 8

    params = init_params(pkey, vocab_size)
    packed = pack_params(params)
    context_seq = jax.random.randint(ckey, (context_len,), 0, vocab_size, dtype=jnp.int32)
    qna_seq = jax.random.randint(qkey, (qna_len,), 0, vocab_size, dtype=jnp.int32)

    fwd = jax.jit(forward)
    prediction, idx = fwd(packed, context_seq, qna_seq)
    jax.block_until_ready(prediction)
    jax.block_until_ready(idx)

    assert prediction.shape == (OUT_DIM,)
    assert bool(jnp.all(jnp.isfinite(prediction)))
    assert int(idx) in (0, 1)
    print("KERNEL_OK")
</pallas_src>

<mosaic_0001>
module attributes {stable_mosaic.version = 11 : i64} {
  func.func @kernel(%arg0: memref<16x1xi32, #tpu.memory_space<vmem>>, %arg1: memref<8x1xi32, #tpu.memory_space<vmem>>, %arg2: memref<64x512xbf16, #tpu.memory_space<vmem>>, %arg3: memref<64x512xbf16, #tpu.memory_space<vmem>>, %arg4: memref<1x512xf32, #tpu.memory_space<vmem>>, %arg5: memref<1x512xf32, #tpu.memory_space<vmem>>, %arg6: memref<128x512xbf16, #tpu.memory_space<vmem>>, %arg7: memref<128x512xbf16, #tpu.memory_space<vmem>>, %arg8: memref<2x256xf32, #tpu.memory_space<vmem>>, %arg9: memref<1x2xf32, #tpu.memory_space<vmem>>, %arg10: memref<1x2xf32, #tpu.memory_space<vmem>>, %arg11: memref<1x1xi32, #tpu.memory_space<vmem>>, %arg12: memref<16x512xf32, #tpu.memory_space<vmem>>, %arg13: memref<8x512xf32, #tpu.memory_space<vmem>>) attributes {dimension_semantics = [], scalar_prefetch = 0 : i64, scratch_operands = 2 : i64, tpu.core_type = #tpu.core_type<tc>} {
    %0 = tpu.iota {dimensions = array<i32: 1>} : vector<16x64xi32>
    %c0 = arith.constant 0 : index
    %c0_0 = arith.constant 0 : index
    %1 = vector.load %arg0[%c0, %c0_0] : memref<16x1xi32, #tpu.memory_space<vmem>>, vector<16x1xi32>
    %2 = vector.broadcast %1 : vector<16x1xi32> to vector<16x64xi32>
    %3 = arith.cmpi eq, %2, %0 : vector<16x64xi32>
    %4 = arith.extui %3 : vector<16x64xi1> to vector<16x64xi32>
    %5 = arith.sitofp %4 : vector<16x64xi32> to vector<16x64xf32>
    %6 = arith.truncf %5 : vector<16x64xf32> to vector<16x64xbf16>
    %c0_1 = arith.constant 0 : index
    %c0_2 = arith.constant 0 : index
    %7 = vector.load %arg2[%c0_1, %c0_2] : memref<64x512xbf16, #tpu.memory_space<vmem>>, vector<64x512xbf16>
    %cst = arith.constant dense<0.000000e+00> : vector<16x512xf32>
    %8 = tpu.matmul %6, %7, %cst {dimension_numbers = #tpu.dot_dimension_numbers<[1], [0], [0], [1], [0, 0, 1, 1], [], []>} : vector<16x64xbf16>, vector<64x512xbf16>, vector<16x512xf32> -> vector<16x512xf32>
    %c0_3 = arith.constant 0 : index
    %c0_4 = arith.constant 0 : index
    %9 = vector.load %arg4[%c0_3, %c0_4] : memref<1x512xf32, #tpu.memory_space<vmem>>, vector<1x512xf32>
    %10 = vector.broadcast %9 : vector<1x512xf32> to vector<16x512xf32>
    %11 = arith.addf %8, %10 : vector<16x512xf32>
    %c0_5 = arith.constant 0 : index
    %c0_6 = arith.constant 0 : index
    %12 = vector.load %arg12[%c0_5, %c0_6] : memref<16x512xf32, #tpu.memory_space<vmem>>, vector<16x512xf32>
    tpu.vector_store %arg12[%c0_5, %c0_6], %11 {strides = array<i32>} : memref<16x512xf32, #tpu.memory_space<vmem>>, vector<16x512xf32>,
    %13 = tpu.iota {dimensions = array<i32: 1>} : vector<8x64xi32>
    %c0_7 = arith.constant 0 : index
    %c0_8 = arith.constant 0 : index
    %14 = vector.load %arg1[%c0_7, %c0_8] : memref<8x1xi32, #tpu.memory_space<vmem>>, vector<8x1xi32>
    %15 = vector.broadcast %14 : vector<8x1xi32> to vector<8x64xi32>
    %16 = arith.cmpi eq, %15, %13 : vector<8x64xi32>
    %17 = arith.extui %16 : vector<8x64xi1> to vector<8x64xi32>
    %18 = arith.sitofp %17 : vector<8x64xi32> to vector<8x64xf32>
    %19 = arith.truncf %18 : vector<8x64xf32> to vector<8x64xbf16>
    %c0_9 = arith.constant 0 : index
    %c0_10 = arith.constant 0 : index
    %20 = vector.load %arg3[%c0_9, %c0_10] : memref<64x512xbf16, #tpu.memory_space<vmem>>, vector<64x512xbf16>
    %cst_11 = arith.constant dense<0.000000e+00> : vector<8x512xf32>
    %21 = tpu.matmul %19, %20, %cst_11 {dimension_numbers = #tpu.dot_dimension_numbers<[1], [0], [0], [1], [0, 0, 1, 1], [], []>} : vector<8x64xbf16>, vector<64x512xbf16>, vector<8x512xf32> -> vector<8x512xf32>
    %c0_12 = arith.constant 0 : index
    %c0_13 = arith.constant 0 : index
    %22 = vector.load %arg5[%c0_12, %c0_13] : memref<1x512xf32, #tpu.memory_space<vmem>>, vector<1x512xf32>
    %23 = vector.broadcast %22 : vector<1x512xf32> to vector<8x512xf32>
    %24 = arith.addf %21, %23 : vector<8x512xf32>
    %c0_14 = arith.constant 0 : index
    %c0_15 = arith.constant 0 : index
    %25 = vector.load %arg13[%c0_14, %c0_15] : memref<8x512xf32, #tpu.memory_space<vmem>>, vector<8x512xf32>
    tpu.vector_store %arg13[%c0_14, %c0_15], %24 {strides = array<i32>} : memref<8x512xf32, #tpu.memory_space<vmem>>, vector<8x512xf32>,
    %cst_16 = arith.constant 0.000000e+00 : f32
    %26 = vector.broadcast %cst_16 : f32 to vector<1x128xf32>
    %cst_17 = arith.constant 0.000000e+00 : f32
    %27 = vector.broadcast %cst_17 : f32 to vector<1x128xf32>
    %cst_18 = arith.constant 0.000000e+00 : f32
    %28 = vector.broadcast %cst_18 : f32 to vector<1x128xf32>
    %cst_19 = arith.constant 0.000000e+00 : f32
    %29 = vector.broadcast %cst_19 : f32 to vector<1x128xf32>
    %30 = arith.truncf %26 : vector<1x128xf32> to vector<1x128xbf16>
    %c0_20 = arith.constant 0 : index
    %c0_21 = arith.constant 0 : index
    %31 = vector.load %arg6[%c0_20, %c0_21] : memref<128x512xbf16, #tpu.memory_space<vmem>>, vector<128x512xbf16>
    %cst_22 = arith.constant dense<0.000000e+00> : vector<1x512xf32>
    %32 = tpu.matmul %30, %31, %cst_22 {dimension_numbers = #tpu.dot_dimension_numbers<[1], [0], [0], [1], [0, 0, 1, 1], [], []>} : vector<1x128xbf16>, vector<128x512xbf16>, vector<1x512xf32> -> vector<1x512xf32>
    %c0_23 = arith.constant 0 : index
    %c0_24 = arith.constant 0 : index
    %33 = vector.load %arg12[%c0_23, %c0_24] : memref<16x512xf32, #tpu.memory_space<vmem>>, vector<1x512xf32>
    %34 = arith.addf %32, %33 : vector<1x512xf32>
    %35 = vector.extract_strided_slice %34 {offsets = [0, 0], sizes = [1, 384], strides = [1, 1]} : vector<1x512xf32> to vector<1x384xf32>
    %36 = arith.negf %35 : vector<1x384xf32>
    %37 = math.exp %36 : vector<1x384xf32>
    %cst_25 = arith.constant 1.000000e+00 : f32
    %38 = vector.broadcast %cst_25 : f32 to vector<1x384xf32>
    %39 = arith.addf %38, %37 : vector<1x384xf32>
    %40 = arith.divf %38, %39 : vector<1x384xf32>
    %41 = vector.extract_strided_slice %34 {offsets = [0, 384], sizes = [1, 128], strides = [1, 1]} : vector<1x512xf32> to vector<1x128xf32>
    %42 = math.tanh %41 : vector<1x128xf32>
    %43 = vector.extract_strided_slice %40 {offsets = [0, 128], sizes = [1, 128], strides = [1, 1]} : vector<1x384xf32> to vector<1x128xf32>
    %44 = arith.mulf %43, %27 : vector<1x128xf32>
    %45 = vector.extract_strided_slice %40 {offsets = [0, 0], sizes = [1, 128], strides = [1, 1]} : vector<1x384xf32> to vector<1x128xf32>
    %46 = arith.mulf %45, %42 : vector<1x128xf32>
    %47 = arith.addf %44, %46 : vector<1x128xf32>
    %48 = vector.extract_strided_slice %40 {offsets = [0, 256], sizes = [1, 128], strides = [1, 1]} : vector<1x384xf32> to vector<1x128xf32>
    %49 = math.tanh %47 : vector<1x128xf32>
    %50 = arith.mulf %48, %49 : vector<1x128xf32>
    %51 = arith.truncf %28 : vector<1x128xf32> to vector<1x128xbf16>
    %c0_26 = arith.constant 0 : index
    %c0_27 = arith.constant 0 : index
    %52 = vector.load %arg7[%c0_26, %c0_27] : memref<128x512xbf16, #tpu.memory_space<vmem>>, vector<128x512xbf16>
    %cst_28 = arith.constant dense<0.000000e+00> : vector<1x512xf32>
    %53 = tpu.matmul %51, %52, %cst_28 {dimension_numbers = #tpu.dot_dimension_numbers<[1], [0], [0], [1], [0, 0, 1, 1], [], []>} : vector<1x128xbf16>, vector<128x512xbf16>, vector<1x512xf32> -> vector<1x512xf32>
    %c0_29 = arith.constant 0 : index
    %c0_30 = arith.constant 0 : index
    %54 = vector.load %arg13[%c0_29, %c0_30] : memref<8x512xf32, #tpu.memory_space<vmem>>, vector<1x512xf32>
    %55 = arith.addf %53, %54 : vector<1x512xf32>
    %56 = vector.extract_strided_slice %55 {offsets = [0, 0], sizes = [1, 384], strides = [1, 1]} : vector<1x512xf32> to vector<1x384xf32>
    %57 = arith.negf %56 : vector<1x384xf32>
    %58 = math.exp %57 : vector<1x384xf32>
    %cst_31 = arith.constant 1.000000e+00 : f32
    %59 = vector.broadcast %cst_31 : f32 to vector<1x384xf32>
    %60 = arith.addf %59, %58 : vector<1x384xf32>
    %61 = arith.divf %59, %60 : vector<1x384xf32>
    %62 = vector.extract_strided_slice %55 {offsets = [0, 384], sizes = [1, 128], strides = [1, 1]} : vector<1x512xf32> to vector<1x128xf32>
    %63 = math.tanh %62 : vector<1x128xf32>
    %64 = vector.extract_strided_slice %61 {offsets = [0, 128], sizes = [1, 128], strides = [1, 1]} : vector<1x384xf32> to vector<1x128xf32>
    %65 = arith.mulf %64, %29 : vector<1x128xf32>
    %66 = vector.extract_strided_slice %61 {offsets = [0, 0], sizes = [1, 128], strides = [1, 1]} : vector<1x384xf32> to vector<1x128xf32>
    %67 = arith.mulf %66, %63 : vector<1x128xf32>
    %68 = arith.addf %65, %67 : vector<1x128xf32>
    %69 = vector.extract_strided_slice %61 {offsets = [0, 256], sizes = [1, 128], strides = [1, 1]} : vector<1x384xf32> to vector<1x128xf32>
    %70 = math.tanh %68 : vector<1x128xf32>
    %71 = arith.mulf %69, %70 : vector<1x128xf32>
    %72 = arith.truncf %50 : vector<1x128xf32> to vector<1x128xbf16>
    %c0_32 = arith.constant 0 : index
    %c0_33 = arith.constant 0 : index
    %73 = vector.load %arg6[%c0_32, %c0_33] : memref<128x512xbf16, #tpu.memory_space<vmem>>, vector<128x512xbf16>
    %cst_34 = arith.constant dense<0.000000e+00> : vector<1x512xf32>
    %74 = tpu.matmul %72, %73, %cst_34 {dimension_numbers = #tpu.dot_dimension_numbers<[1], [0], [0], [1], [0, 0, 1, 1], [], []>} : vector<1x128xbf16>, vector<128x512xbf16>, vector<1x512xf32> -> vector<1x512xf32>
    %c1 = arith.constant 1 : index
    %c0_35 = arith.constant 0 : index
    %75 = vector.load %arg12[%c1, %c0_35] : memref<16x512xf32, #tpu.memory_space<vmem>>, vector<1x512xf32>
    %76 = arith.addf %74, %75 : vector<1x512xf32>
    %77 = vector.extract_strided_slice %76 {offsets = [0, 0], sizes = [1, 384], strides = [1, 1]} : vector<1x512xf32> to vector<1x384xf32>
    %78 = arith.negf %77 : vector<1x384xf32>
    %79 = math.exp %78 : vector<1x384xf32>
    %cst_36 = arith.constant 1.000000e+00 : f32
    %80 = vector.broadcast %cst_36 : f32 to vector<1x384xf32>
    %81 = arith.addf %80, %79 : vector<1x384xf32>
    %82 = arith.divf %80, %81 : vector<1x384xf32>
    %83 = vector.extract_strided_slice %76 {offsets = [0, 384], sizes = [1, 128], strides = [1, 1]} : vector<1x512xf32> to vector<1x128xf32>
    %84 = math.tanh %83 : vector<1x128xf32>
    %85 = vector.extract_strided_slice %82 {offsets = [0, 128], sizes = [1, 128], strides = [1, 1]} : vector<1x384xf32> to vector<1x128xf32>
    %86 = arith.mulf %85, %47 : vector<1x128xf32>
    %87 = vector.extract_strided_slice %82 {offsets = [0, 0], sizes = [1, 128], strides = [1, 1]} : vector<1x384xf32> to vector<1x128xf32>
    %88 = arith.mulf %87, %84 : vector<1x128xf32>
    %89 = arith.addf %86, %88 : vector<1x128xf32>
    %90 = vector.extract_strided_slice %82 {offsets = [0, 256], sizes = [1, 128], strides = [1, 1]} : vector<1x384xf32> to vector<1x128xf32>
    %91 = math.tanh %89 : vector<1x128xf32>
    %92 = arith.mulf %90, %91 : vector<1x128xf32>
    %93 = arith.truncf %71 : vector<1x128xf32> to vector<1x128xbf16>
    %c0_37 = arith.constant 0 : index
    %c0_38 = arith.constant 0 : index
    %94 = vector.load %arg7[%c0_37, %c0_38] : memref<128x512xbf16, #tpu.memory_space<vmem>>, vector<128x512xbf16>
    %cst_39 = arith.constant dense<0.000000e+00> : vector<1x512xf32>
    %95 = tpu.matmul %93, %94, %cst_39 {dimension_numbers = #tpu.dot_dimension_numbers<[1], [0], [0], [1], [0, 0, 1, 1], [], []>} : vector<1x128xbf16>, vector<128x512xbf16>, vector<1x512xf32> -> vector<1x512xf32>
    %c1_40 = arith.constant 1 : index
    %c0_41 = arith.constant 0 : index
    %96 = vector.load %arg13[%c1_40, %c0_41] : memref<8x512xf32, #tpu.memory_space<vmem>>, vector<1x512xf32>
    %97 = arith.addf %95, %96 : vector<1x512xf32>
    %98 = vector.extract_strided_slice %97 {offsets = [0, 0], sizes = [1, 384], strides = [1, 1]} : vector<1x512xf32> to vector<1x384xf32>
    %99 = arith.negf %98 : vector<1x384xf32>
    %100 = math.exp %99 : vector<1x384xf32>
    %cst_42 = arith.constant 1.000000e+00 : f32
    %101 = vector.broadcast %cst_42 : f32 to vector<1x384xf32>
    %102 = arith.addf %101, %100 : vector<1x384xf32>
    %103 = arith.divf %101, %102 : vector<1x384xf32>
    %104 = vector.extract_strided_slice %97 {offsets = [0, 384], sizes = [1, 128], strides = [1, 1]} : vector<1x512xf32> to vector<1x128xf32>
    %105 = math.tanh %104 : vector<1x128xf32>
    %106 = vector.extract_strided_slice %103 {offsets = [0, 128], sizes = [1, 128], strides = [1, 1]} : vector<1x384xf32> to vector<1x128xf32>
    %107 = arith.mulf %106, %68 : vector<1x128xf32>
    %108 = vector.extract_strided_slice %103 {offsets = [0, 0], sizes = [1, 128], strides = [1, 1]} : vector<1x384xf32> to vector<1x128xf32>
    %109 = arith.mulf %108, %105 : vector<1x128xf32>
    %110 = arith.addf %107, %109 : vector<1x128xf32>
    %111 = vector.extract_strided_slice %103 {offsets = [0, 256], sizes = [1, 128], strides = [1, 1]} : vector<1x384xf32> to vector<1x128xf32>
    %112 = math.tanh %110 : vector<1x128xf32>
    %113 = arith.mulf %111, %112 : vector<1x128xf32>
    %114 = arith.truncf %92 : vector<1x128xf32> to vector<1x128xbf16>
    %c0_43 = arith.constant 0 : index
    %c0_44 = arith.constant 0 : index
    %115 = vector.load %arg6[%c0_43, %c0_44] : memref<128x512xbf16, #tpu.memory_space<vmem>>, vector<128x512xbf16>
    %cst_45 = arith.constant dense<0.000000e+00> : vector<1x512xf32>
    %116 = tpu.matmul %114, %115, %cst_45 {dimension_numbers = #tpu.dot_dimension_numbers<[1], [0], [0], [1], [0, 0, 1, 1], [], []>} : vector<1x128xbf16>, vector<128x512xbf16>, vector<1x512xf32> -> vector<1x512xf32>
    %c2 = arith.constant 2 : index
    %c0_46 = arith.constant 0 : index
    %117 = vector.load %arg12[%c2, %c0_46] : memref<16x512xf32, #tpu.memory_space<vmem>>, vector<1x512xf32>
    %118 = arith.addf %116, %117 : vector<1x512xf32>
    %119 = vector.extract_strided_slice %118 {offsets = [0, 0], sizes = [1, 384], strides = [1, 1]} : vector<1x512xf32> to vector<1x384xf32>
    %120 = arith.negf %119 : vector<1x384xf32>
    %121 = math.exp %120 : vector<1x384xf32>
    %cst_47 = arith.constant 1.000000e+00 : f32
    %122 = vector.broadcast %cst_47 : f32 to vector<1x384xf32>
    %123 = arith.addf %122, %121 : vector<1x384xf32>
    %124 = arith.divf %122, %123 : vector<1x384xf32>
    %125 = vector.extract_strided_slice %118 {offsets = [0, 384], sizes = [1, 128], strides = [1, 1]} : vector<1x512xf32> to vector<1x128xf32>
    %126 = math.tanh %125 : vector<1x128xf32>
    %127 = vector.extract_strided_slice %124 {offsets = [0, 128], sizes = [1, 128], strides = [1, 1]} : vector<1x384xf32> to vector<1x128xf32>
    %128 = arith.mulf %127, %89 : vector<1x128xf32>
    %129 = vector.extract_strided_slice %124 {offsets = [0, 0], sizes = [1, 128], strides = [1, 1]} : vector<1x384xf32> to vector<1x128xf32>
    %130 = arith.mulf %129, %126 : vector<1x128xf32>
    %131 = arith.addf %128, %130 : vector<1x128xf32>
    %132 = vector.extract_strided_slice %124 {offsets = [0, 256], sizes = [1, 128], strides = [1, 1]} : vector<1x384xf32> to vector<1x128xf32>
    %133 = math.tanh %131 : vector<1x128xf32>
    %134 = arith.mulf %132, %133 : vector<1x128xf32>
    %135 = arith.truncf %113 : vector<1x128xf32> to vector<1x128xbf16>
    %c0_48 = arith.constant 0 : index
    %c0_49 = arith.constant 0 : index
    %136 = vector.load %arg7[%c0_48, %c0_49] : memref<128x512xbf16, #tpu.memory_space<vmem>>, vector<128x512xbf16>
    %cst_50 = arith.constant dense<0.000000e+00> : vector<1x512xf32>
    %137 = tpu.matmul %135, %136, %cst_50 {dimension_numbers = #tpu.dot_dimension_numbers<[1], [0], [0], [1], [0, 0, 1, 1], [], []>} : vector<1x128xbf16>, vector<128x512xbf16>, vector<1x512xf32> -> vector<1x512xf32>
    %c2_51 = arith.constant 2 : index
    %c0_52 = arith.constant 0 : index
    %138 = vector.load %arg13[%c2_51, %c0_52] : memref<8x512xf32, #tpu.memory_space<vmem>>, vector<1x512xf32>
    %139 = arith.addf %137, %138 : vector<1x512xf32>
    %140 = vector.extract_strided_slice %139 {offsets = [0, 0], sizes = [1, 384], strides = [1, 1]} : vector<1x512xf32> to vector<1x384xf32>
    %141 = arith.negf %140 : vector<1x384xf32>
    %142 = math.exp %141 : vector<1x384xf32>
    %cst_53 = arith.constant 1.000000e+00 : f32
    %143 = vector.broadcast %cst_53 : f32 to vector<1x384xf32>
    %144 = arith.addf %143, %142 : vector<1x384xf32>
    %145 = arith.divf %143, %144 : vector<1x384xf32>
    %146 = vector.extract_strided_slice %139 {offsets = [0, 384], sizes = [1, 128], strides = [1, 1]} : vector<1x512xf32> to vector<1x128xf32>
    %147 = math.tanh %146 : vector<1x128xf32>
    %148 = vector.extract_strided_slice %145 {offsets = [0, 128], sizes = [1, 128], strides = [1, 1]} : vector<1x384xf32> to vector<1x128xf32>
    %149 = arith.mulf %148, %110 : vector<1x128xf32>
    %150 = vector.extract_strided_slice %145 {offsets = [0, 0], sizes = [1, 128], strides = [1, 1]} : vector<1x384xf32> to vector<1x128xf32>
    %151 = arith.mulf %150, %147 : vector<1x128xf32>
    %152 = arith.addf %149, %151 : vector<1x128xf32>
    %153 = vector.extract_strided_slice %145 {offsets = [0, 256], sizes = [1, 128], strides = [1, 1]} : vector<1x384xf32> to vector<1x128xf32>
    %154 = math.tanh %152 : vector<1x128xf32>
    %155 = arith.mulf %153, %154 : vector<1x128xf32>
    %156 = arith.truncf %134 : vector<1x128xf32> to vector<1x128xbf16>
    %c0_54 = arith.constant 0 : index
    %c0_55 = arith.constant 0 : index
    %157 = vector.load %arg6[%c0_54, %c0_55] : memref<128x512xbf16, #tpu.memory_space<vmem>>, vector<128x512xbf16>
    %cst_56 = arith.constant dense<0.000000e+00> : vector<1x512xf32>
    %158 = tpu.matmul %156, %157, %cst_56 {dimension_numbers = #tpu.dot_dimension_numbers<[1], [0], [0], [1], [0, 0, 1, 1], [], []>} : vector<1x128xbf16>, vector<128x512xbf16>, vector<1x512xf32> -> vector<1x512xf32>
    %c3 = arith.constant 3 : index
    %c0_57 = arith.constant 0 : index
    %159 = vector.load %arg12[%c3, %c0_57] : memref<16x512xf32, #tpu.memory_space<vmem>>, vector<1x512xf32>
    %160 = arith.addf %158, %159 : vector<1x512xf32>
    %161 = vector.extract_strided_slice %160 {offsets = [0, 0], sizes = [1, 384], strides = [1, 1]} : vector<1x512xf32> to vector<1x384xf32>
    %162 = arith.negf %161 : vector<1x384xf32>
    %163 = math.exp %162 : vector<1x384xf32>
    %cst_58 = arith.constant 1.000000e+00 : f32
    %164 = vector.broadcast %cst_58 : f32 to vector<1x384xf32>
    %165 = arith.addf %164, %163 : vector<1x384xf32>
    %166 = arith.divf %164, %165 : vector<1x384xf32>
    %167 = vector.extract_strided_slice %160 {offsets = [0, 384], sizes = [1, 128], strides = [1, 1]} : vector<1x512xf32> to vector<1x128xf32>
    %168 = math.tanh %167 : vector<1x128xf32>
    %169 = vector.extract_strided_slice %166 {offsets = [0, 128], sizes = [1, 128], strides = [1, 1]} : vector<1x384xf32> to vector<1x128xf32>
    %170 = arith.mulf %169, %131 : vector<1x128xf32>
    %171 = vector.extract_strided_slice %166 {offsets = [0, 0], sizes = [1, 128], strides = [1, 1]} : vector<1x384xf32> to vector<1x128xf32>
    %172 = arith.mulf %171, %168 : vector<1x128xf32>
    %173 = arith.addf %170, %172 : vector<1x128xf32>
    %174 = vector.extract_strided_slice %166 {offsets = [0, 256], sizes = [1, 128], strides = [1, 1]} : vector<1x384xf32> to vector<1x128xf32>
    %175 = math.tanh %173 : vector<1x128xf32>
    %176 = arith.mulf %174, %175 : vector<1x128xf32>
    %177 = arith.truncf %155 : vector<1x128xf32> to vector<1x128xbf16>
    %c0_59 = arith.constant 0 : index
    %c0_60 = arith.constant 0 : index
    %178 = vector.load %arg7[%c0_59, %c0_60] : memref<128x512xbf16, #tpu.memory_space<vmem>>, vector<128x512xbf16>
    %cst_61 = arith.constant dense<0.000000e+00> : vector<1x512xf32>
    %179 = tpu.matmul %177, %178, %cst_61 {dimension_numbers = #tpu.dot_dimension_numbers<[1], [0], [0], [1], [0, 0, 1, 1], [], []>} : vector<1x128xbf16>, vector<128x512xbf16>, vector<1x512xf32> -> vector<1x512xf32>
    %c3_62 = arith.constant 3 : index
    %c0_63 = arith.constant 0 : index
    %180 = vector.load %arg13[%c3_62, %c0_63] : memref<8x512xf32, #tpu.memory_space<vmem>>, vector<1x512xf32>
    %181 = arith.addf %179, %180 : vector<1x512xf32>
    %182 = vector.extract_strided_slice %181 {offsets = [0, 0], sizes = [1, 384], strides = [1, 1]} : vector<1x512xf32> to vector<1x384xf32>
    %183 = arith.negf %182 : vector<1x384xf32>
    %184 = math.exp %183 : vector<1x384xf32>
    %cst_64 = arith.constant 1.000000e+00 : f32
    %185 = vector.broadcast %cst_64 : f32 to vector<1x384xf32>
    %186 = arith.addf %185, %184 : vector<1x384xf32>
    %187 = arith.divf %185, %186 : vector<1x384xf32>
    %188 = vector.extract_strided_slice %181 {offsets = [0, 384], sizes = [1, 128], strides = [1, 1]} : vector<1x512xf32> to vector<1x128xf32>
    %189 = math.tanh %188 : vector<1x128xf32>
    %190 = vector.extract_strided_slice %187 {offsets = [0, 128], sizes = [1, 128], strides = [1, 1]} : vector<1x384xf32> to vector<1x128xf32>
    %191 = arith.mulf %190, %152 : vector<1x128xf32>
    %192 = vector.extract_strided_slice %187 {offsets = [0, 0], sizes = [1, 128], strides = [1, 1]} : vector<1x384xf32> to vector<1x128xf32>
    %193 = arith.mulf %192, %189 : vector<1x128xf32>
    %194 = arith.addf %191, %193 : vector<1x128xf32>
    %195 = vector.extract_strided_slice %187 {offsets = [0, 256], sizes = [1, 128], strides = [1, 1]} : vector<1x384xf32> to vector<1x128xf32>
    %196 = math.tanh %194 : vector<1x128xf32>
    %197 = arith.mulf %195, %196 : vector<1x128xf32>
    %198 = arith.truncf %176 : vector<1x128xf32> to vector<1x128xbf16>
    %c0_65 = arith.constant 0 : index
    %c0_66 = arith.constant 0 : index
    %199 = vector.load %arg6[%c0_65, %c0_66] : memref<128x512xbf16, #tpu.memory_space<vmem>>, vector<128x512xbf16>
    %cst_67 = arith.constant dense<0.000000e+00> : vector<1x512xf32>
    %200 = tpu.matmul %198, %199, %cst_67 {dimension_numbers = #tpu.dot_dimension_numbers<[1], [0], [0], [1], [0, 0, 1, 1], [], []>} : vector<1x128xbf16>, vector<128x512xbf16>, vector<1x512xf32> -> vector<1x512xf32>
    %c4 = arith.constant 4 : index
    %c0_68 = arith.constant 0 : index
    %201 = vector.load %arg12[%c4, %c0_68] : memref<16x512xf32, #tpu.memory_space<vmem>>, vector<1x512xf32>
    %202 = arith.addf %200, %201 : vector<1x512xf32>
    %203 = vector.extract_strided_slice %202 {offsets = [0, 0], sizes = [1, 384], strides = [1, 1]} : vector<1x512xf32> to vector<1x384xf32>
    %204 = arith.negf %203 : vector<1x384xf32>
    %205 = math.exp %204 : vector<1x384xf32>
    %cst_69 = arith.constant 1.000000e+00 : f32
    %206 = vector.broadcast %cst_69 : f32 to vector<1x384xf32>
    %207 = arith.addf %206, %205 : vector<1x384xf32>
    %208 = arith.divf %206, %207 : vector<1x384xf32>
    %209 = vector.extract_strided_slice %202 {offsets = [0, 384], sizes = [1, 128], strides = [1, 1]} : vector<1x512xf32> to vector<1x128xf32>
    %210 = math.tanh %209 : vector<1x128xf32>
    %211 = vector.extract_strided_slice %208 {offsets = [0, 128], sizes = [1, 128], strides = [1, 1]} : vector<1x384xf32> to vector<1x128xf32>
    %212 = arith.mulf %211, %173 : vector<1x128xf32>
    %213 = vector.extract_strided_slice %208 {offsets = [0, 0], sizes = [1, 128], strides = [1, 1]} : vector<1x384xf32> to vector<1x128xf32>
    %214 = arith.mulf %213, %210 : vector<1x128xf32>
    %215 = arith.addf %212, %214 : vector<1x128xf32>
    %216 = vector.extract_strided_slice %208 {offsets = [0, 256], sizes = [1, 128], strides = [1, 1]} : vector<1x384xf32> to vector<1x128xf32>
    %217 = math.tanh %215 : vector<1x128xf32>
    %218 = arith.mulf %216, %217 : vector<1x128xf32>
    %219 = arith.truncf %197 : vector<1x128xf32> to vector<1x128xbf16>
    %c0_70 = arith.constant 0 : index
    %c0_71 = arith.constant 0 : index
    %220 = vector.load %arg7[%c0_70, %c0_71] : memref<128x512xbf16, #tpu.memory_space<vmem>>, vector<128x512xbf16>
    %cst_72 = arith.constant dense<0.000000e+00> : vector<1x512xf32>
    %221 = tpu.matmul %219, %220, %cst_72 {dimension_numbers = #tpu.dot_dimension_numbers<[1], [0], [0], [1], [0, 0, 1, 1], [], []>} : vector<1x128xbf16>, vector<128x512xbf16>, vector<1x512xf32> -> vector<1x512xf32>
    %c4_73 = arith.constant 4 : index
    %c0_74 = arith.constant 0 : index
    %222 = vector.load %arg13[%c4_73, %c0_74] : memref<8x512xf32, #tpu.memory_space<vmem>>, vector<1x512xf32>
    %223 = arith.addf %221, %222 : vector<1x512xf32>
    %224 = vector.extract_strided_slice %223 {offsets = [0, 0], sizes = [1, 384], strides = [1, 1]} : vector<1x512xf32> to vector<1x384xf32>
    %225 = arith.negf %224 : vector<1x384xf32>
    %226 = math.exp %225 : vector<1x384xf32>
    %cst_75 = arith.constant 1.000000e+00 : f32
    %227 = vector.broadcast %cst_75 : f32 to vector<1x384xf32>
    %228 = arith.addf %227, %226 : vector<1x384xf32>
    %229 = arith.divf %227, %228 : vector<1x384xf32>
    %230 = vector.extract_strided_slice %223 {offsets = [0, 384], sizes = [1, 128], strides = [1, 1]} : vector<1x512xf32> to vector<1x128xf32>
    %231 = math.tanh %230 : vector<1x128xf32>
    %232 = vector.extract_strided_slice %229 {offsets = [0, 128], sizes = [1, 128], strides = [1, 1]} : vector<1x384xf32> to vector<1x128xf32>
    %233 = arith.mulf %232, %194 : vector<1x128xf32>
    %234 = vector.extract_strided_slice %229 {offsets = [0, 0], sizes = [1, 128], strides = [1, 1]} : vector<1x384xf32> to vector<1x128xf32>
    %235 = arith.mulf %234, %231 : vector<1x128xf32>
    %236 = arith.addf %233, %235 : vector<1x128xf32>
    %237 = vector.extract_strided_slice %229 {offsets = [0, 256], sizes = [1, 128], strides = [1, 1]} : vector<1x384xf32> to vector<1x128xf32>
    %238 = math.tanh %236 : vector<1x128xf32>
    %239 = arith.mulf %237, %238 : vector<1x128xf32>
    %240 = arith.truncf %218 : vector<1x128xf32> to vector<1x128xbf16>
    %c0_76 = arith.constant 0 : index
    %c0_77 = arith.constant 0 : index
    %241 = vector.load %arg6[%c0_76, %c0_77] : memref<128x512xbf16, #tpu.memory_space<vmem>>, vector<128x512xbf16>
    %cst_78 = arith.constant dense<0.000000e+00> : vector<1x512xf32>
    %242 = tpu.matmul %240, %241, %cst_78 {dimension_numbers = #tpu.dot_dimension_numbers<[1], [0], [0], [1], [0, 0, 1, 1], [], []>} : vector<1x128xbf16>, vector<128x512xbf16>, vector<1x512xf32> -> vector<1x512xf32>
    %c5 = arith.constant 5 : index
    %c0_79 = arith.constant 0 : index
    %243 = vector.load %arg12[%c5, %c0_79] : memref<16x512xf32, #tpu.memory_space<vmem>>, vector<1x512xf32>
    %244 = arith.addf %242, %243 : vector<1x512xf32>
    %245 = vector.extract_strided_slice %244 {offsets = [0, 0], sizes = [1, 384], strides = [1, 1]} : vector<1x512xf32> to vector<1x384xf32>
    %246 = arith.negf %245 : vector<1x384xf32>
    %247 = math.exp %246 : vector<1x384xf32>
    %cst_80 = arith.constant 1.000000e+00 : f32
    %248 = vector.broadcast %cst_80 : f32 to vector<1x384xf32>
    %249 = arith.addf %248, %247 : vector<1x384xf32>
    %250 = arith.divf %248, %249 : vector<1x384xf32>
    %251 = vector.extract_strided_slice %244 {offsets = [0, 384], sizes = [1, 128], strides = [1, 1]} : vector<1x512xf32> to vector<1x128xf32>
    %252 = math.tanh %251 : vector<1x128xf32>
    %253 = vector.extract_strided_slice %250 {offsets = [0, 128], sizes = [1, 128], strides = [1, 1]} : vector<1x384xf32> to vector<1x128xf32>
    %254 = arith.mulf %253, %215 : vector<1x128xf32>
    %255 = vector.extract_strided_slice %250 {offsets = [0, 0], sizes = [1, 128], strides = [1, 1]} : vector<1x384xf32> to vector<1x128xf32>
    %256 = arith.mulf %255, %252 : vector<1x128xf32>
    %257 = arith.addf %254, %256 : vector<1x128xf32>
    %258 = vector.extract_strided_slice %250 {offsets = [0, 256], sizes = [1, 128], strides = [1, 1]} : vector<1x384xf32> to vector<1x128xf32>
    %259 = math.tanh %257 : vector<1x128xf32>
    %260 = arith.mulf %258, %259 : vector<1x128xf32>
    %261 = arith.truncf %239 : vector<1x128xf32> to vector<1x128xbf16>
    %c0_81 = arith.constant 0 : index
    %c0_82 = arith.constant 0 : index
    %262 = vector.load %arg7[%c0_81, %c0_82] : memref<128x512xbf16, #tpu.memory_space<vmem>>, vector<128x512xbf16>
    %cst_83 = arith.constant dense<0.000000e+00> : vector<1x512xf32>
    %263 = tpu.matmul %261, %262, %cst_83 {dimension_numbers = #tpu.dot_dimension_numbers<[1], [0], [0], [1], [0, 0, 1, 1], [], []>} : vector<1x128xbf16>, vector<128x512xbf16>, vector<1x512xf32> -> vector<1x512xf32>
    %c5_84 = arith.constant 5 : index
    %c0_85 = arith.constant 0 : index
    %264 = vector.load %arg13[%c5_84, %c0_85] : memref<8x512xf32, #tpu.memory_space<vmem>>, vector<1x512xf32>
    %265 = arith.addf %263, %264 : vector<1x512xf32>
    %266 = vector.extract_strided_slice %265 {offsets = [0, 0], sizes = [1, 384], strides = [1, 1]} : vector<1x512xf32> to vector<1x384xf32>
    %267 = arith.negf %266 : vector<1x384xf32>
    %268 = math.exp %267 : vector<1x384xf32>
    %cst_86 = arith.constant 1.000000e+00 : f32
    %269 = vector.broadcast %cst_86 : f32 to vector<1x384xf32>
    %270 = arith.addf %269, %268 : vector<1x384xf32>
    %271 = arith.divf %269, %270 : vector<1x384xf32>
    %272 = vector.extract_strided_slice %265 {offsets = [0, 384], sizes = [1, 128], strides = [1, 1]} : vector<1x512xf32> to vector<1x128xf32>
    %273 = math.tanh %272 : vector<1x128xf32>
    %274 = vector.extract_strided_slice %271 {offsets = [0, 128], sizes = [1, 128], strides = [1, 1]} : vector<1x384xf32> to vector<1x128xf32>
    %275 = arith.mulf %274, %236 : vector<1x128xf32>
    %276 = vector.extract_strided_slice %271 {offsets = [0, 0], sizes = [1, 128], strides = [1, 1]} : vector<1x384xf32> to vector<1x128xf32>
    %277 = arith.mulf %276, %273 : vector<1x128xf32>
    %278 = arith.addf %275, %277 : vector<1x128xf32>
    %279 = vector.extract_strided_slice %271 {offsets = [0, 256], sizes = [1, 128], strides = [1, 1]} : vector<1x384xf32> to vector<1x128xf32>
    %280 = math.tanh %278 : vector<1x128xf32>
    %281 = arith.mulf %279, %280 : vector<1x128xf32>
    %282 = arith.truncf %260 : vector<1x128xf32> to vector<1x128xbf16>
    %c0_87 = arith.constant 0 : index
    %c0_88 = arith.constant 0 : index
    %283 = vector.load %arg6[%c0_87, %c0_88] : memref<128x512xbf16, #tpu.memory_space<vmem>>, vector<128x512xbf16>
    %cst_89 = arith.constant dense<0.000000e+00> : vector<1x512xf32>
    %284 = tpu.matmul %282, %283, %cst_89 {dimension_numbers = #tpu.dot_dimension_numbers<[1], [0], [0], [1], [0, 0, 1, 1], [], []>} : vector<1x128xbf16>, vector<128x512xbf16>, vector<1x512xf32> -> vector<1x512xf32>
    %c6 = arith.constant 6 : index
    %c0_90 = arith.constant 0 : index
    %285 = vector.load %arg12[%c6, %c0_90] : memref<16x512xf32, #tpu.memory_space<vmem>>, vector<1x512xf32>
    %286 = arith.addf %284, %285 : vector<1x512xf32>
    %287 = vector.extract_strided_slice %286 {offsets = [0, 0], sizes = [1, 384], strides = [1, 1]} : vector<1x512xf32> to vector<1x384xf32>
    %288 = arith.negf %287 : vector<1x384xf32>
    %289 = math.exp %288 : vector<1x384xf32>
    %cst_91 = arith.constant 1.000000e+00 : f32
    %290 = vector.broadcast %cst_91 : f32 to vector<1x384xf32>
    %291 = arith.addf %290, %289 : vector<1x384xf32>
    %292 = arith.divf %290, %291 : vector<1x384xf32>
    %293 = vector.extract_strided_slice %286 {offsets = [0, 384], sizes = [1, 128], strides = [1, 1]} : vector<1x512xf32> to vector<1x128xf32>
    %294 = math.tanh %293 : vector<1x128xf32>
    %295 = vector.extract_strided_slice %292 {offsets = [0, 128], sizes = [1, 128], strides = [1, 1]} : vector<1x384xf32> to vector<1x128xf32>
    %296 = arith.mulf %295, %257 : vector<1x128xf32>
    %297 = vector.extract_strided_slice %292 {offsets = [0, 0], sizes = [1, 128], strides = [1, 1]} : vector<1x384xf32> to vector<1x128xf32>
    %298 = arith.mulf %297, %294 : vector<1x128xf32>
    %299 = arith.addf %296, %298 : vector<1x128xf32>
    %300 = vector.extract_strided_slice %292 {offsets = [0, 256], sizes = [1, 128], strides = [1, 1]} : vector<1x384xf32> to vector<1x128xf32>
    %301 = math.tanh %299 : vector<1x128xf32>
    %302 = arith.mulf %300, %301 : vector<1x128xf32>
    %303 = arith.truncf %281 : vector<1x128xf32> to vector<1x128xbf16>
    %c0_92 = arith.constant 0 : index
    %c0_93 = arith.constant 0 : index
    %304 = vector.load %arg7[%c0_92, %c0_93] : memref<128x512xbf16, #tpu.memory_space<vmem>>, vector<128x512xbf16>
    %cst_94 = arith.constant dense<0.000000e+00> : vector<1x512xf32>
    %305 = tpu.matmul %303, %304, %cst_94 {dimension_numbers = #tpu.dot_dimension_numbers<[1], [0], [0], [1], [0, 0, 1, 1], [], []>} : vector<1x128xbf16>, vector<128x512xbf16>, vector<1x512xf32> -> vector<1x512xf32>
    %c6_95 = arith.constant 6 : index
    %c0_96 = arith.constant 0 : index
    %306 = vector.load %arg13[%c6_95, %c0_96] : memref<8x512xf32, #tpu.memory_space<vmem>>, vector<1x512xf32>
    %307 = arith.addf %305, %306 : vector<1x512xf32>
    %308 = vector.extract_strided_slice %307 {offsets = [0, 0], sizes = [1, 384], strides = [1, 1]} : vector<1x512xf32> to vector<1x384xf32>
    %309 = arith.negf %308 : vector<1x384xf32>
    %310 = math.exp %309 : vector<1x384xf32>
    %cst_97 = arith.constant 1.000000e+00 : f32
    %311 = vector.broadcast %cst_97 : f32 to vector<1x384xf32>
    %312 = arith.addf %311, %310 : vector<1x384xf32>
    %313 = arith.divf %311, %312 : vector<1x384xf32>
    %314 = vector.extract_strided_slice %307 {offsets = [0, 384], sizes = [1, 128], strides = [1, 1]} : vector<1x512xf32> to vector<1x128xf32>
    %315 = math.tanh %314 : vector<1x128xf32>
    %316 = vector.extract_strided_slice %313 {offsets = [0, 128], sizes = [1, 128], strides = [1, 1]} : vector<1x384xf32> to vector<1x128xf32>
    %317 = arith.mulf %316, %278 : vector<1x128xf32>
    %318 = vector.extract_strided_slice %313 {offsets = [0, 0], sizes = [1, 128], strides = [1, 1]} : vector<1x384xf32> to vector<1x128xf32>
    %319 = arith.mulf %318, %315 : vector<1x128xf32>
    %320 = arith.addf %317, %319 : vector<1x128xf32>
    %321 = vector.extract_strided_slice %313 {offsets = [0, 256], sizes = [1, 128], strides = [1, 1]} : vector<1x384xf32> to vector<1x128xf32>
    %322 = math.tanh %320 : vector<1x128xf32>
    %323 = arith.mulf %321, %322 : vector<1x128xf32>
    %324 = arith.truncf %302 : vector<1x128xf32> to vector<1x128xbf16>
    %c0_98 = arith.constant 0 : index
    %c0_99 = arith.constant 0 : index
    %325 = vector.load %arg6[%c0_98, %c0_99] : memref<128x512xbf16, #tpu.memory_space<vmem>>, vector<128x512xbf16>
    %cst_100 = arith.constant dense<0.000000e+00> : vector<1x512xf32>
    %326 = tpu.matmul %324, %325, %cst_100 {dimension_numbers = #tpu.dot_dimension_numbers<[1], [0], [0], [1], [0, 0, 1, 1], [], []>} : vector<1x128xbf16>, vector<128x512xbf16>, vector<1x512xf32> -> vector<1x512xf32>
    %c7 = arith.constant 7 : index
    %c0_101 = arith.constant 0 : index
    %327 = vector.load %arg12[%c7, %c0_101] : memref<16x512xf32, #tpu.memory_space<vmem>>, vector<1x512xf32>
    %328 = arith.addf %326, %327 : vector<1x512xf32>
    %329 = vector.extract_strided_slice %328 {offsets = [0, 0], sizes = [1, 384], strides = [1, 1]} : vector<1x512xf32> to vector<1x384xf32>
    %330 = arith.negf %329 : vector<1x384xf32>
    %331 = math.exp %330 : vector<1x384xf32>
    %cst_102 = arith.constant 1.000000e+00 : f32
    %332 = vector.broadcast %cst_102 : f32 to vector<1x384xf32>
    %333 = arith.addf %332, %331 : vector<1x384xf32>
    %334 = arith.divf %332, %333 : vector<1x384xf32>
    %335 = vector.extract_strided_slice %328 {offsets = [0, 384], sizes = [1, 128], strides = [1, 1]} : vector<1x512xf32> to vector<1x128xf32>
    %336 = math.tanh %335 : vector<1x128xf32>
    %337 = vector.extract_strided_slice %334 {offsets = [0, 128], sizes = [1, 128], strides = [1, 1]} : vector<1x384xf32> to vector<1x128xf32>
    %338 = arith.mulf %337, %299 : vector<1x128xf32>
    %339 = vector.extract_strided_slice %334 {offsets = [0, 0], sizes = [1, 128], strides = [1, 1]} : vector<1x384xf32> to vector<1x128xf32>
    %340 = arith.mulf %339, %336 : vector<1x128xf32>
    %341 = arith.addf %338, %340 : vector<1x128xf32>
    %342 = vector.extract_strided_slice %334 {offsets = [0, 256], sizes = [1, 128], strides = [1, 1]} : vector<1x384xf32> to vector<1x128xf32>
    %343 = math.tanh %341 : vector<1x128xf32>
    %344 = arith.mulf %342, %343 : vector<1x128xf32>
    %345 = arith.truncf %323 : vector<1x128xf32> to vector<1x128xbf16>
    %c0_103 = arith.constant 0 : index
    %c0_104 = arith.constant 0 : index
    %346 = vector.load %arg7[%c0_103, %c0_104] : memref<128x512xbf16, #tpu.memory_space<vmem>>, vector<128x512xbf16>
    %cst_105 = arith.constant dense<0.000000e+00> : vector<1x512xf32>
    %347 = tpu.matmul %345, %346, %cst_105 {dimension_numbers = #tpu.dot_dimension_numbers<[1], [0], [0], [1], [0, 0, 1, 1], [], []>} : vector<1x128xbf16>, vector<128x512xbf16>, vector<1x512xf32> -> vector<1x512xf32>
    %c7_106 = arith.constant 7 : index
    %c0_107 = arith.constant 0 : index
    %348 = vector.load %arg13[%c7_106, %c0_107] : memref<8x512xf32, #tpu.memory_space<vmem>>, vector<1x512xf32>
    %349 = arith.addf %347, %348 : vector<1x512xf32>
    %350 = vector.extract_strided_slice %349 {offsets = [0, 0], sizes = [1, 384], strides = [1, 1]} : vector<1x512xf32> to vector<1x384xf32>
    %351 = arith.negf %350 : vector<1x384xf32>
    %352 = math.exp %351 : vector<1x384xf32>
    %cst_108 = arith.constant 1.000000e+00 : f32
    %353 = vector.broadcast %cst_108 : f32 to vector<1x384xf32>
    %354 = arith.addf %353, %352 : vector<1x384xf32>
    %355 = arith.divf %353, %354 : vector<1x384xf32>
    %356 = vector.extract_strided_slice %349 {offsets = [0, 384], sizes = [1, 128], strides = [1, 1]} : vector<1x512xf32> to vector<1x128xf32>
    %357 = math.tanh %356 : vector<1x128xf32>
    %358 = vector.extract_strided_slice %355 {offsets = [0, 128], sizes = [1, 128], strides = [1, 1]} : vector<1x384xf32> to vector<1x128xf32>
    %359 = arith.mulf %358, %320 : vector<1x128xf32>
    %360 = vector.extract_strided_slice %355 {offsets = [0, 0], sizes = [1, 128], strides = [1, 1]} : vector<1x384xf32> to vector<1x128xf32>
    %361 = arith.mulf %360, %357 : vector<1x128xf32>
    %362 = arith.addf %359, %361 : vector<1x128xf32>
    %363 = vector.extract_strided_slice %355 {offsets = [0, 256], sizes = [1, 128], strides = [1, 1]} : vector<1x384xf32> to vector<1x128xf32>
    %364 = math.tanh %362 : vector<1x128xf32>
    %365 = arith.mulf %363, %364 : vector<1x128xf32>
    %366 = arith.truncf %344 : vector<1x128xf32> to vector<1x128xbf16>
    %c0_109 = arith.constant 0 : index
    %c0_110 = arith.constant 0 : index
    %367 = vector.load %arg6[%c0_109, %c0_110] : memref<128x512xbf16, #tpu.memory_space<vmem>>, vector<128x512xbf16>
    %cst_111 = arith.constant dense<0.000000e+00> : vector<1x512xf32>
    %368 = tpu.matmul %366, %367, %cst_111 {dimension_numbers = #tpu.dot_dimension_numbers<[1], [0], [0], [1], [0, 0, 1, 1], [], []>} : vector<1x128xbf16>, vector<128x512xbf16>, vector<1x512xf32> -> vector<1x512xf32>
    %c8 = arith.constant 8 : index
    %c0_112 = arith.constant 0 : index
    %369 = vector.load %arg12[%c8, %c0_112] : memref<16x512xf32, #tpu.memory_space<vmem>>, vector<1x512xf32>
    %370 = arith.addf %368, %369 : vector<1x512xf32>
    %371 = vector.extract_strided_slice %370 {offsets = [0, 0], sizes = [1, 384], strides = [1, 1]} : vector<1x512xf32> to vector<1x384xf32>
    %372 = arith.negf %371 : vector<1x384xf32>
    %373 = math.exp %372 : vector<1x384xf32>
    %cst_113 = arith.constant 1.000000e+00 : f32
    %374 = vector.broadcast %cst_113 : f32 to vector<1x384xf32>
    %375 = arith.addf %374, %373 : vector<1x384xf32>
    %376 = arith.divf %374, %375 : vector<1x384xf32>
    %377 = vector.extract_strided_slice %370 {offsets = [0, 384], sizes = [1, 128], strides = [1, 1]} : vector<1x512xf32> to vector<1x128xf32>
    %378 = math.tanh %377 : vector<1x128xf32>
    %379 = vector.extract_strided_slice %376 {offsets = [0, 128], sizes = [1, 128], strides = [1, 1]} : vector<1x384xf32> to vector<1x128xf32>
    %380 = arith.mulf %379, %341 : vector<1x128xf32>
    %381 = vector.extract_strided_slice %376 {offsets = [0, 0], sizes = [1, 128], strides = [1, 1]} : vector<1x384xf32> to vector<1x128xf32>
    %382 = arith.mulf %381, %378 : vector<1x128xf32>
    %383 = arith.addf %380, %382 : vector<1x128xf32>
    %384 = vector.extract_strided_slice %376 {offsets = [0, 256], sizes = [1, 128], strides = [1, 1]} : vector<1x384xf32> to vector<1x128xf32>
    %385 = math.tanh %383 : vector<1x128xf32>
    %386 = arith.mulf %384, %385 : vector<1x128xf32>
    %387 = arith.truncf %386 : vector<1x128xf32> to vector<1x128xbf16>
    %c0_114 = arith.constant 0 : index
    %c0_115 = arith.constant 0 : index
    %388 = vector.load %arg6[%c0_114, %c0_115] : memref<128x512xbf16, #tpu.memory_space<vmem>>, vector<128x512xbf16>
    %cst_116 = arith.constant dense<0.000000e+00> : vector<1x512xf32>
    %389 = tpu.matmul %387, %388, %cst_116 {dimension_numbers = #tpu.dot_dimension_numbers<[1], [0], [0], [1], [0, 0, 1, 1], [], []>} : vector<1x128xbf16>, vector<128x512xbf16>, vector<1x512xf32> -> vector<1x512xf32>
    %c9 = arith.constant 9 : index
    %c0_117 = arith.constant 0 : index
    %390 = vector.load %arg12[%c9, %c0_117] : memref<16x512xf32, #tpu.memory_space<vmem>>, vector<1x512xf32>
    %391 = arith.addf %389, %390 : vector<1x512xf32>
    %392 = vector.extract_strided_slice %391 {offsets = [0, 0], sizes = [1, 384], strides = [1, 1]} : vector<1x512xf32> to vector<1x384xf32>
    %393 = arith.negf %392 : vector<1x384xf32>
    %394 = math.exp %393 : vector<1x384xf32>
    %cst_118 = arith.constant 1.000000e+00 : f32
    %395 = vector.broadcast %cst_118 : f32 to vector<1x384xf32>
    %396 = arith.addf %395, %394 : vector<1x384xf32>
    %397 = arith.divf %395, %396 : vector<1x384xf32>
    %398 = vector.extract_strided_slice %391 {offsets = [0, 384], sizes = [1, 128], strides = [1, 1]} : vector<1x512xf32> to vector<1x128xf32>
    %399 = math.tanh %398 : vector<1x128xf32>
    %400 = vector.extract_strided_slice %397 {offsets = [0, 128], sizes = [1, 128], strides = [1, 1]} : vector<1x384xf32> to vector<1x128xf32>
    %401 = arith.mulf %400, %383 : vector<1x128xf32>
    %402 = vector.extract_strided_slice %397 {offsets = [0, 0], sizes = [1, 128], strides = [1, 1]} : vector<1x384xf32> to vector<1x128xf32>
    %403 = arith.mulf %402, %399 : vector<1x128xf32>
    %404 = arith.addf %401, %403 : vector<1x128xf32>
    %405 = vector.extract_strided_slice %397 {offsets = [0, 256], sizes = [1, 128], strides = [1, 1]} : vector<1x384xf32> to vector<1x128xf32>
    %406 = math.tanh %404 : vector<1x128xf32>
    %407 = arith.mulf %405, %406 : vector<1x128xf32>
    %408 = arith.truncf %407 : vector<1x128xf32> to vector<1x128xbf16>
    %c0_119 = arith.constant 0 : index
    %c0_120 = arith.constant 0 : index
    %409 = vector.load %arg6[%c0_119, %c0_120] : memref<128x512xbf16, #tpu.memory_space<vmem>>, vector<128x512xbf16>
    %cst_121 = arith.constant dense<0.000000e+00> : vector<1x512xf32>
    %410 = tpu.matmul %408, %409, %cst_121 {dimension_numbers = #tpu.dot_dimension_numbers<[1], [0], [0], [1], [0, 0, 1, 1], [], []>} : vector<1x128xbf16>, vector<128x512xbf16>, vector<1x512xf32> -> vector<1x512xf32>
    %c10 = arith.constant 10 : index
    %c0_122 = arith.constant 0 : index
    %411 = vector.load %arg12[%c10, %c0_122] : memref<16x512xf32, #tpu.memory_space<vmem>>, vector<1x512xf32>
    %412 = arith.addf %410, %411 : vector<1x512xf32>
    %413 = vector.extract_strided_slice %412 {offsets = [0, 0], sizes = [1, 384], strides = [1, 1]} : vector<1x512xf32> to vector<1x384xf32>
    %414 = arith.negf %413 : vector<1x384xf32>
    %415 = math.exp %414 : vector<1x384xf32>
    %cst_123 = arith.constant 1.000000e+00 : f32
    %416 = vector.broadcast %cst_123 : f32 to vector<1x384xf32>
    %417 = arith.addf %416, %415 : vector<1x384xf32>
    %418 = arith.divf %416, %417 : vector<1x384xf32>
    %419 = vector.extract_strided_slice %412 {offsets = [0, 384], sizes = [1, 128], strides = [1, 1]} : vector<1x512xf32> to vector<1x128xf32>
    %420 = math.tanh %419 : vector<1x128xf32>
    %421 = vector.extract_strided_slice %418 {offsets = [0, 128], sizes = [1, 128], strides = [1, 1]} : vector<1x384xf32> to vector<1x128xf32>
    %422 = arith.mulf %421, %404 : vector<1x128xf32>
    %423 = vector.extract_strided_slice %418 {offsets = [0, 0], sizes = [1, 128], strides = [1, 1]} : vector<1x384xf32> to vector<1x128xf32>
    %424 = arith.mulf %423, %420 : vector<1x128xf32>
    %425 = arith.addf %422, %424 : vector<1x128xf32>
    %426 = vector.extract_strided_slice %418 {offsets = [0, 256], sizes = [1, 128], strides = [1, 1]} : vector<1x384xf32> to vector<1x128xf32>
    %427 = math.tanh %425 : vector<1x128xf32>
    %428 = arith.mulf %426, %427 : vector<1x128xf32>
    %429 = arith.truncf %428 : vector<1x128xf32> to vector<1x128xbf16>
    %c0_124 = arith.constant 0 : index
    %c0_125 = arith.constant 0 : index
    %430 = vector.load %arg6[%c0_124, %c0_125] : memref<128x512xbf16, #tpu.memory_space<vmem>>, vector<128x512xbf16>
    %cst_126 = arith.constant dense<0.000000e+00> : vector<1x512xf32>
    %431 = tpu.matmul %429, %430, %cst_126 {dimension_numbers = #tpu.dot_dimension_numbers<[1], [0], [0], [1], [0, 0, 1, 1], [], []>} : vector<1x128xbf16>, vector<128x512xbf16>, vector<1x512xf32> -> vector<1x512xf32>
    %c11 = arith.constant 11 : index
    %c0_127 = arith.constant 0 : index
    %432 = vector.load %arg12[%c11, %c0_127] : memref<16x512xf32, #tpu.memory_space<vmem>>, vector<1x512xf32>
    %433 = arith.addf %431, %432 : vector<1x512xf32>
    %434 = vector.extract_strided_slice %433 {offsets = [0, 0], sizes = [1, 384], strides = [1, 1]} : vector<1x512xf32> to vector<1x384xf32>
    %435 = arith.negf %434 : vector<1x384xf32>
    %436 = math.exp %435 : vector<1x384xf32>
    %cst_128 = arith.constant 1.000000e+00 : f32
    %437 = vector.broadcast %cst_128 : f32 to vector<1x384xf32>
    %438 = arith.addf %437, %436 : vector<1x384xf32>
    %439 = arith.divf %437, %438 : vector<1x384xf32>
    %440 = vector.extract_strided_slice %433 {offsets = [0, 384], sizes = [1, 128], strides = [1, 1]} : vector<1x512xf32> to vector<1x128xf32>
    %441 = math.tanh %440 : vector<1x128xf32>
    %442 = vector.extract_strided_slice %439 {offsets = [0, 128], sizes = [1, 128], strides = [1, 1]} : vector<1x384xf32> to vector<1x128xf32>
    %443 = arith.mulf %442, %425 : vector<1x128xf32>
    %444 = vector.extract_strided_slice %439 {offsets = [0, 0], sizes = [1, 128], strides = [1, 1]} : vector<1x384xf32> to vector<1x128xf32>
    %445 = arith.mulf %444, %441 : vector<1x128xf32>
    %446 = arith.addf %443, %445 : vector<1x128xf32>
    %447 = vector.extract_strided_slice %439 {offsets = [0, 256], sizes = [1, 128], strides = [1, 1]} : vector<1x384xf32> to vector<1x128xf32>
    %448 = math.tanh %446 : vector<1x128xf32>
    %449 = arith.mulf %447, %448 : vector<1x128xf32>
    %450 = arith.truncf %449 : vector<1x128xf32> to vector<1x128xbf16>
    %c0_129 = arith.constant 0 : index
    %c0_130 = arith.constant 0 : index
    %451 = vector.load %arg6[%c0_129, %c0_130] : memref<128x512xbf16, #tpu.memory_space<vmem>>, vector<128x512xbf16>
    %cst_131 = arith.constant dense<0.000000e+00> : vector<1x512xf32>
    %452 = tpu.matmul %450, %451, %cst_131 {dimension_numbers = #tpu.dot_dimension_numbers<[1], [0], [0], [1], [0, 0, 1, 1], [], []>} : vector<1x128xbf16>, vector<128x512xbf16>, vector<1x512xf32> -> vector<1x512xf32>
    %c12 = arith.constant 12 : index
    %c0_132 = arith.constant 0 : index
    %453 = vector.load %arg12[%c12, %c0_132] : memref<16x512xf32, #tpu.memory_space<vmem>>, vector<1x512xf32>
    %454 = arith.addf %452, %453 : vector<1x512xf32>
    %455 = vector.extract_strided_slice %454 {offsets = [0, 0], sizes = [1, 384], strides = [1, 1]} : vector<1x512xf32> to vector<1x384xf32>
    %456 = arith.negf %455 : vector<1x384xf32>
    %457 = math.exp %456 : vector<1x384xf32>
    %cst_133 = arith.constant 1.000000e+00 : f32
    %458 = vector.broadcast %cst_133 : f32 to vector<1x384xf32>
    %459 = arith.addf %458, %457 : vector<1x384xf32>
    %460 = arith.divf %458, %459 : vector<1x384xf32>
    %461 = vector.extract_strided_slice %454 {offsets = [0, 384], sizes = [1, 128], strides = [1, 1]} : vector<1x512xf32> to vector<1x128xf32>
    %462 = math.tanh %461 : vector<1x128xf32>
    %463 = vector.extract_strided_slice %460 {offsets = [0, 128], sizes = [1, 128], strides = [1, 1]} : vector<1x384xf32> to vector<1x128xf32>
    %464 = arith.mulf %463, %446 : vector<1x128xf32>
    %465 = vector.extract_strided_slice %460 {offsets = [0, 0], sizes = [1, 128], strides = [1, 1]} : vector<1x384xf32> to vector<1x128xf32>
    %466 = arith.mulf %465, %462 : vector<1x128xf32>
    %467 = arith.addf %464, %466 : vector<1x128xf32>
    %468 = vector.extract_strided_slice %460 {offsets = [0, 256], sizes = [1, 128], strides = [1, 1]} : vector<1x384xf32> to vector<1x128xf32>
    %469 = math.tanh %467 : vector<1x128xf32>
    %470 = arith.mulf %468, %469 : vector<1x128xf32>
    %471 = arith.truncf %470 : vector<1x128xf32> to vector<1x128xbf16>
    %c0_134 = arith.constant 0 : index
    %c0_135 = arith.constant 0 : index
    %472 = vector.load %arg6[%c0_134, %c0_135] : memref<128x512xbf16, #tpu.memory_space<vmem>>, vector<128x512xbf16>
    %cst_136 = arith.constant dense<0.000000e+00> : vector<1x512xf32>
    %473 = tpu.matmul %471, %472, %cst_136 {dimension_numbers = #tpu.dot_dimension_numbers<[1], [0], [0], [1], [0, 0, 1, 1], [], []>} : vector<1x128xbf16>, vector<128x512xbf16>, vector<1x512xf32> -> vector<1x512xf32>
    %c13 = arith.constant 13 : index
    %c0_137 = arith.constant 0 : index
    %474 = vector.load %arg12[%c13, %c0_137] : memref<16x512xf32, #tpu.memory_space<vmem>>, vector<1x512xf32>
    %475 = arith.addf %473, %474 : vector<1x512xf32>
    %476 = vector.extract_strided_slice %475 {offsets = [0, 0], sizes = [1, 384], strides = [1, 1]} : vector<1x512xf32> to vector<1x384xf32>
    %477 = arith.negf %476 : vector<1x384xf32>
    %478 = math.exp %477 : vector<1x384xf32>
    %cst_138 = arith.constant 1.000000e+00 : f32
    %479 = vector.broadcast %cst_138 : f32 to vector<1x384xf32>
    %480 = arith.addf %479, %478 : vector<1x384xf32>
    %481 = arith.divf %479, %480 : vector<1x384xf32>
    %482 = vector.extract_strided_slice %475 {offsets = [0, 384], sizes = [1, 128], strides = [1, 1]} : vector<1x512xf32> to vector<1x128xf32>
    %483 = math.tanh %482 : vector<1x128xf32>
    %484 = vector.extract_strided_slice %481 {offsets = [0, 128], sizes = [1, 128], strides = [1, 1]} : vector<1x384xf32> to vector<1x128xf32>
    %485 = arith.mulf %484, %467 : vector<1x128xf32>
    %486 = vector.extract_strided_slice %481 {offsets = [0, 0], sizes = [1, 128], strides = [1, 1]} : vector<1x384xf32> to vector<1x128xf32>
    %487 = arith.mulf %486, %483 : vector<1x128xf32>
    %488 = arith.addf %485, %487 : vector<1x128xf32>
    %489 = vector.extract_strided_slice %481 {offsets = [0, 256], sizes = [1, 128], strides = [1, 1]} : vector<1x384xf32> to vector<1x128xf32>
    %490 = math.tanh %488 : vector<1x128xf32>
    %491 = arith.mulf %489, %490 : vector<1x128xf32>
    %492 = arith.truncf %491 : vector<1x128xf32> to vector<1x128xbf16>
    %c0_139 = arith.constant 0 : index
    %c0_140 = arith.constant 0 : index
    %493 = vector.load %arg6[%c0_139, %c0_140] : memref<128x512xbf16, #tpu.memory_space<vmem>>, vector<128x512xbf16>
    %cst_141 = arith.constant dense<0.000000e+00> : vector<1x512xf32>
    %494 = tpu.matmul %492, %493, %cst_141 {dimension_numbers = #tpu.dot_dimension_numbers<[1], [0], [0], [1], [0, 0, 1, 1], [], []>} : vector<1x128xbf16>, vector<128x512xbf16>, vector<1x512xf32> -> vector<1x512xf32>
    %c14 = arith.constant 14 : index
    %c0_142 = arith.constant 0 : index
    %495 = vector.load %arg12[%c14, %c0_142] : memref<16x512xf32, #tpu.memory_space<vmem>>, vector<1x512xf32>
    %496 = arith.addf %494, %495 : vector<1x512xf32>
    %497 = vector.extract_strided_slice %496 {offsets = [0, 0], sizes = [1, 384], strides = [1, 1]} : vector<1x512xf32> to vector<1x384xf32>
    %498 = arith.negf %497 : vector<1x384xf32>
    %499 = math.exp %498 : vector<1x384xf32>
    %cst_143 = arith.constant 1.000000e+00 : f32
    %500 = vector.broadcast %cst_143 : f32 to vector<1x384xf32>
    %501 = arith.addf %500, %499 : vector<1x384xf32>
    %502 = arith.divf %500, %501 : vector<1x384xf32>
    %503 = vector.extract_strided_slice %496 {offsets = [0, 384], sizes = [1, 128], strides = [1, 1]} : vector<1x512xf32> to vector<1x128xf32>
    %504 = math.tanh %503 : vector<1x128xf32>
    %505 = vector.extract_strided_slice %502 {offsets = [0, 128], sizes = [1, 128], strides = [1, 1]} : vector<1x384xf32> to vector<1x128xf32>
    %506 = arith.mulf %505, %488 : vector<1x128xf32>
    %507 = vector.extract_strided_slice %502 {offsets = [0, 0], sizes = [1, 128], strides = [1, 1]} : vector<1x384xf32> to vector<1x128xf32>
    %508 = arith.mulf %507, %504 : vector<1x128xf32>
    %509 = arith.addf %506, %508 : vector<1x128xf32>
    %510 = vector.extract_strided_slice %502 {offsets = [0, 256], sizes = [1, 128], strides = [1, 1]} : vector<1x384xf32> to vector<1x128xf32>
    %511 = math.tanh %509 : vector<1x128xf32>
    %512 = arith.mulf %510, %511 : vector<1x128xf32>
    %513 = arith.truncf %512 : vector<1x128xf32> to vector<1x128xbf16>
    %c0_144 = arith.constant 0 : index
    %c0_145 = arith.constant 0 : index
    %514 = vector.load %arg6[%c0_144, %c0_145] : memref<128x512xbf16, #tpu.memory_space<vmem>>, vector<128x512xbf16>
    %cst_146 = arith.constant dense<0.000000e+00> : vector<1x512xf32>
    %515 = tpu.matmul %513, %514, %cst_146 {dimension_numbers = #tpu.dot_dimension_numbers<[1], [0], [0], [1], [0, 0, 1, 1], [], []>} : vector<1x128xbf16>, vector<128x512xbf16>, vector<1x512xf32> -> vector<1x512xf32>
    %c15 = arith.constant 15 : index
    %c0_147 = arith.constant 0 : index
    %516 = vector.load %arg12[%c15, %c0_147] : memref<16x512xf32, #tpu.memory_space<vmem>>, vector<1x512xf32>
    %517 = arith.addf %515, %516 : vector<1x512xf32>
    %518 = vector.extract_strided_slice %517 {offsets = [0, 0], sizes = [1, 384], strides = [1, 1]} : vector<1x512xf32> to vector<1x384xf32>
    %519 = arith.negf %518 : vector<1x384xf32>
    %520 = math.exp %519 : vector<1x384xf32>
    %cst_148 = arith.constant 1.000000e+00 : f32
    %521 = vector.broadcast %cst_148 : f32 to vector<1x384xf32>
    %522 = arith.addf %521, %520 : vector<1x384xf32>
    %523 = arith.divf %521, %522 : vector<1x384xf32>
    %524 = vector.extract_strided_slice %517 {offsets = [0, 384], sizes = [1, 128], strides = [1, 1]} : vector<1x512xf32> to vector<1x128xf32>
    %525 = math.tanh %524 : vector<1x128xf32>
    %526 = vector.extract_strided_slice %523 {offsets = [0, 128], sizes = [1, 128], strides = [1, 1]} : vector<1x384xf32> to vector<1x128xf32>
    %527 = arith.mulf %526, %509 : vector<1x128xf32>
    %528 = vector.extract_strided_slice %523 {offsets = [0, 0], sizes = [1, 128], strides = [1, 1]} : vector<1x384xf32> to vector<1x128xf32>
    %529 = arith.mulf %528, %525 : vector<1x128xf32>
    %530 = arith.addf %527, %529 : vector<1x128xf32>
    %531 = vector.extract_strided_slice %523 {offsets = [0, 256], sizes = [1, 128], strides = [1, 1]} : vector<1x384xf32> to vector<1x128xf32>
    %532 = math.tanh %530 : vector<1x128xf32>
    %533 = arith.mulf %531, %532 : vector<1x128xf32>
    %534 = tpu.concatenate %533, %365 in 1 : vector<1x128xf32>, vector<1x128xf32> -> vector<1x256xf32>
    %cst_149 = arith.constant 0.000000e+00 : f32
    %535 = vector.broadcast %cst_149 : f32 to vector<1x256xf32>
    %536 = arith.maximumf %534, %535 : vector<1x256xf32>
    %c0_150 = arith.constant 0 : index
    %c0_151 = arith.constant 0 : index
    %537 = vector.load %arg8[%c0_150, %c0_151] : memref<2x256xf32, #tpu.memory_space<vmem>>, vector<1x256xf32>
    %538 = arith.mulf %536, %537 : vector<1x256xf32>
    %cst_152 = arith.constant dense<0.000000e+00> : vector<1xf32>
    %539 = vector.multi_reduction <add>, %538, %cst_152 [1] : vector<1x256xf32> to vector<1xf32>
    %540 = vector.shape_cast %539 : vector<1xf32> to vector<1x1xf32>
    %c1_153 = arith.constant 1 : index
    %c0_154 = arith.constant 0 : index
    %541 = vector.load %arg8[%c1_153, %c0_154] : memref<2x256xf32, #tpu.memory_space<vmem>>, vector<1x256xf32>
    %542 = arith.mulf %536, %541 : vector<1x256xf32>
    %cst_155 = arith.constant dense<0.000000e+00> : vector<1xf32>
    %543 = vector.multi_reduction <add>, %542, %cst_155 [1] : vector<1x256xf32> to vector<1xf32>
    %544 = vector.shape_cast %543 : vector<1xf32> to vector<1x1xf32>
    %545 = tpu.concatenate %540, %544 in 1 : vector<1x1xf32>, vector<1x1xf32> -> vector<1x2xf32>
    %c0_156 = arith.constant 0 : index
    %c0_157 = arith.constant 0 : index
    %546 = vector.load %arg9[%c0_156, %c0_157] : memref<1x2xf32, #tpu.memory_space<vmem>>, vector<1x2xf32>
    %547 = arith.addf %545, %546 : vector<1x2xf32>
    %c0_158 = arith.constant 0 : index
    %c0_159 = arith.constant 0 : index
    %548 = vector.load %arg10[%c0_158, %c0_159] : memref<1x2xf32, #tpu.memory_space<vmem>>, vector<1x2xf32>
    tpu.vector_store %arg10[%c0_158, %c0_159], %547 {strides = array<i32>} : memref<1x2xf32, #tpu.memory_space<vmem>>, vector<1x2xf32>,
    %549 = vector.extract_strided_slice %547 {offsets = [0, 1], sizes = [1, 1], strides = [1, 1]} : vector<1x2xf32> to vector<1x1xf32>
    %550 = vector.extract_strided_slice %547 {offsets = [0, 0], sizes = [1, 1], strides = [1, 1]} : vector<1x2xf32> to vector<1x1xf32>
    %551 = arith.cmpf ogt, %549, %550 : vector<1x1xf32>
    %552 = arith.extui %551 : vector<1x1xi1> to vector<1x1xi32>
    %c0_160 = arith.constant 0 : index
    %c0_161 = arith.constant 0 : index
    %553 = vector.load %arg11[%c0_160, %c0_161] : memref<1x1xi32, #tpu.memory_space<vmem>>, vector<1x1xi32>
    tpu.vector_store %arg11[%c0_160, %c0_161], %552 {strides = array<i32>} : memref<1x1xi32, #tpu.memory_space<vmem>>, vector<1x1xi32>,
    return
  }
}

</mosaic_0001>

<bundles_post_ra>
// kernel: forward.1
= control target key start
LH: loop header
LB: loop body
LE: loop exit
PB: predicated region body
PF: predicated region fallthrough
CT: control target
= control target key end

     0   :  { %17 = vsyncpa [#allocation5], 0  ;;  %s6654_s0 = inlined_call_operand.vmem [shape: s32[16,1], index: 0, kind: input, shape index: {}]   ;;  %s6655_s1 = inlined_call_operand.vmem [shape: s32[8,1], index: 1, kind: input, shape index: {}]   ;;  %s6656_s2 = inlined_call_operand.hbm [shape: bf16[64,512], index: 2, kind: input, shape index: {}]   ;;  %s6657_s3 = inlined_call_operand.hbm [shape: bf16[64,512], index: 3, kind: input, shape index: {}]   ;;  %s6658_s4 = inlined_call_operand.vmem [shape: f32[1,512], index: 4, kind: input, shape index: {}]   ;;  %s6659_s5 = inlined_call_operand.vmem [shape: f32[1,512], index: 5, kind: input, shape index: {}]   ;;  %s6660_s6 = inlined_call_operand.hbm [shape: bf16[128,512], index: 6, kind: input, shape index: {}]   ;;  %s6661_s7 = inlined_call_operand.hbm [shape: bf16[128,512], index: 7, kind: input, shape index: {}]   ;;  %s6662_s8 = inlined_call_operand.vmem [shape: f32[2,256], index: 8, kind: input, shape index: {}]   ;;  %s6663_s9 = inlined_call_operand.vmem [shape: f32[1,2], index: 9, kind: input, shape index: {}]   ;;  %s6664_s10 = inlined_call_operand.hbm [shape: f32[1,2], index: 10, kind: output, shape index: {0}]   ;;  %s6665_s11 = inlined_call_operand.hbm [shape: s32[1,1], index: 11, kind: output, shape index: {1}]  }
   0x1   :  { %18 = vsyncpa [#allocation8], 0 }
   0x2   :  { %19 = vsyncpa [#allocation11], 0 }
   0x3   :  { %20 = vsyncpa [#allocation6], 0 }
   0x4   :  { %21 = vsyncpa [#allocation14], 0  ;;  %s5138_s17 = smov [#allocation7]   ;;  %s5139_s19 = smov [#allocation4]  }
   0x5   :  { %s43_s18 = sshll.u32 %s5138_s17, 4  ;;  %s31_s20 = sshll.u32 %s5139_s19, 4  ;;  %s44_s18 = int_to_ptr.vmem [resolvable:$true] %s43_s18  ;;  %s32_s20 = int_to_ptr.vmem [resolvable:$true] %s31_s20 }
   0x6   :  { %s5016_s21 = scalar_lea.vmem %s44_s18, 2048  ;;  %p5021_p1 = scmp.lt.s32.totalorder %s44_s18, %s44_s18 }
   0x7   :  { %p5017_p0 = scmp.ne.s32.totalorder %s44_s18, %s5016_s21  ;;  %p5022_p2 = scmp.lt.s32.totalorder %s5016_s21, %s5016_s21 }
   0x9   :  { %p5023_p3 = por %p5022_p2, %p5021_p1 }
   0xb   :  { %p5024_p4 = pnand %p5023_p3, %p5017_p0 }
   0xd   :  { %5027 = shalt.err (!%p5024_p4)
}
   0xe   :  { %s5140_s22 = smov 256   ;;  %s5141_s23 = smov 16  }
   0xf   :  { %49 = dma.hbm_to_vmem [thread:$0]  %s6657_s3, 2048, %s44_s18, [#allocation8], %s5140_s22, %s5140_s22, %s5141_s23  }
  0x10   :  { %s5036_s26 = scalar_lea.vmem %s32_s20, 2048  ;;  %p5041_p6 = scmp.lt.s32.totalorder %s32_s20, %s32_s20 }
  0x11   :  { %p5037_p5 = scmp.ne.s32.totalorder %s32_s20, %s5036_s26  ;;  %p5042_p7 = scmp.lt.s32.totalorder %s5036_s26, %s5036_s26 }
  0x13   :  { %p5043_p8 = por %p5042_p7, %p5041_p6 }
  0x15   :  { %p5044_p9 = pnand %p5043_p8, %p5037_p5 }
  0x17   :  { %5047 = shalt.err (!%p5044_p9)
}
  0x18   :  { %37 = dma.hbm_to_vmem [thread:$0]  %s6656_s2, 2048, %s32_s20, [#allocation5], %s5140_s22, %s5140_s22, %s5141_s23  }
  0x19   :  { %s5142_s29 = smov [#allocation9]   ;;  %s5143_s12 = smov [#allocation10]  }
  0x1a   :  { %s59_s30 = sshll.u32 %s5142_s29, 4  ;;  %s71_s13 = sshll.u32 %s5143_s12, 4  ;;  %s60_s30 = int_to_ptr.vmem [resolvable:$true] %s59_s30  ;;  %s72_s13 = int_to_ptr.vmem [resolvable:$true] %s71_s13 }
  0x1b   :  { %s5056_s3 = scalar_lea.vmem %s60_s30, 4096  ;;  %p5061_p11 = scmp.lt.s32.totalorder %s60_s30, %s60_s30 }
  0x1c   :  { %p5057_p10 = scmp.ne.s32.totalorder %s60_s30, %s5056_s3  ;;  %p5062_p12 = scmp.lt.s32.totalorder %s5056_s3, %s5056_s3 }
  0x1e   :  { %p5063_p13 = por %p5062_p12, %p5061_p11 }
  0x20   :  { %p5064_p0 = pnand %p5063_p13, %p5057_p10 }
  0x22   :  { %5067 = shalt.err (!%p5064_p0)
}
  0x23   :  { %65 = dma.hbm_to_vmem [thread:$0]  %s6660_s6, 4096, %s60_s30, [#allocation8], %s5140_s22, %s5140_s22, %s5141_s23  }
  0x24   :  { %s5076_s2 = scalar_lea.vmem %s72_s13, 4096  ;;  %p5081_p2 = scmp.lt.s32.totalorder %s72_s13, %s72_s13 }
  0x25   :  { %p5077_p1 = scmp.ne.s32.totalorder %s72_s13, %s5076_s2  ;;  %p5082_p3 = scmp.lt.s32.totalorder %s5076_s2, %s5076_s2 }
  0x27   :  { %p5083_p4 = por %p5082_p3, %p5081_p2 }
  0x29   :  { %p5084_p5 = pnand %p5083_p4, %p5077_p1 }
  0x2b   :  { %5087 = shalt.err (!%p5084_p5)
}
  0x2c   :  { %77 = dma.hbm_to_vmem [thread:$0]  %s6661_s7, 4096, %s72_s13, [#allocation11], %s5140_s22, %s5140_s22, %s5141_s23  }
  0x2d   :  { %5128 = dma.done.wait [#allocation5], 2048  }
  0x2e   :  { %5129 = vsyncadd [#allocation5], 4294965248 }
  0x2f   :  { %5130 = dma.done.wait [#allocation8], 6144  }
  0x30   :  { %5131 = vsyncadd [#allocation8], 4294961152 }
  0x31   :  { %5132 = dma.done.wait [#allocation11], 4096  }
  0x32   :  { %5133 = vsyncadd [#allocation11], 4294963200  ;;  %v6667_v0 = vmov 0   ;;  %v97_v1 = vld [vmem:[%s6654_s0] sm:$0xff]  ;;  %v98_v2 = vld [vmem:[%s6654_s0 + $0x8] sm:$0xff]  ;;  %v6666_v22 = vlaneseq  ;;  %vm230_vm2 = vcmask 523264  }
  0x33   :  { %4320 = vset.pattern.permute.xlu0 %v6667_v0  ;;  %4321 = vset.pattern.permute.xlu1 %v6667_v0  ;;  %v328_v3 = vld [vmem:[%s6655_s1] sm:$0xff]  ;;  %v4324_v5 = vld [vmem:[#allocation4 + $0x6c] ss:$16 sps:$4 sm:$0xff]   ;;  %v4327_v7 = vld [vmem:[#allocation4 + $0x68] ss:$16 sps:$4 sm:$0xff]   ;;  %v5145_v26 = vmov 0.0  }
  0x34   :  { %266 = vmatprep.mubr.bf16.mxu0 %v6667_v0  ;;  %309 = vmatprep.mubr.bf16.mxu1 %v6667_v0  ;;  %v4322_v4 = vld [vmem:[#allocation4 + $0x64] ss:$16 sps:$4 sm:$0xff]   ;;  %v4326_v6 = vld [vmem:[#allocation4 + $0x60] ss:$16 sps:$4 sm:$0xff]   ;;  %v4330_v9 = vld [vmem:[#allocation4 + $0x4c] ss:$16 sps:$4 sm:$0xff]  }
  0x35   :  { %100 = vperm.xlu0 %4320, %v97_v1   ;;  %330 = vperm.xlu1 %4321, %v328_v3   ;;  %v4328_v8 = vld [vmem:[#allocation4 + $0x44] ss:$16 sps:$4 sm:$0xff]   ;;  %v4332_v10 = vld [vmem:[#allocation4 + $0x40] ss:$16 sps:$4 sm:$0xff]   ;;  %v4333_v11 = vld [vmem:[#allocation4 + $0x48] ss:$16 sps:$4 sm:$0xff]  }
  0x36   :  { %242 = vmatprep.subr.bf16.mxu0 %v4322_v4  ;;  %285 = vmatprep.subr.bf16.mxu1 %v4324_v5  ;;  %v4334_v12 = vld [vmem:[#allocation4 + $0x24] ss:$16 sps:$4 sm:$0xff]   ;;  %v4336_v13 = vld [vmem:[#allocation4 + $0x2c] ss:$16 sps:$4 sm:$0xff]   ;;  %v4338_v14 = vld [vmem:[#allocation4 + $0x20] ss:$16 sps:$4 sm:$0xff]  }
  0x37   :  { %243 = vmatpush1.bf16.msra.mxu0 %v4326_v6  ;;  %286 = vmatpush1.bf16.msra.mxu1 %v4327_v7  ;;  %v4339_v15 = vld [vmem:[#allocation4 + $0x28] ss:$16 sps:$4 sm:$0xff]   ;;  %v4340_v16 = vld [vmem:[#allocation4 + $0x4] ss:$16 sps:$4 sm:$0xff]   ;;  %v4342_v17 = vld [vmem:[#allocation4 + $0xc] ss:$16 sps:$4 sm:$0xff]  }
  0x38   :  { %244 = vmatprep.subr.bf16.mxu0 %v4328_v8  ;;  %287 = vmatprep.subr.bf16.mxu1 %v4330_v9  ;;  %v4344_v18 = vld [vmem:[#allocation4] ss:$16 sps:$4 sm:$0xff]   ;;  %v4345_v19 = vld [vmem:[#allocation4 + $0x8] ss:$16 sps:$4 sm:$0xff]   ;;  %v4348_v20 = vld [vmem:[#allocation7 + $0x64] ss:$16 sps:$4 sm:$0xff]  }
  0x39   :  { %103 = vperm.xlu0 %4320, %v98_v2   ;;  %v4351_v21 = vld [vmem:[#allocation7 + $0x6c] ss:$16 sps:$4 sm:$0xff]   ;;  %v96_v23 = vand.u32 127, %v6666_v22  ;;  %v4346_v29 = vld [vmem:[#allocation7 + $0x60] ss:$16 sps:$4 sm:$0xff]   ;;  %vm4059_vm4 = vcmask 1040384  }
  0x3a   :  { %v4349_v30 = vld [vmem:[#allocation7 + $0x68] ss:$16 sps:$4 sm:$0xff]   ;;  %v4354_v32 = vld [vmem:[#allocation7 + $0x44] ss:$16 sps:$4 sm:$0xff]   ;;  %v4357_v33 = vld [vmem:[#allocation7 + $0x4c] ss:$16 sps:$4 sm:$0xff]  }
  0x3b   :  { %245 = vmatpush1.bf16.msra.mxu0 %v4332_v10  ;;  %288 = vmatpush1.bf16.msra.mxu1 %v4333_v11  ;;  %v4352_v34 = vld [vmem:[#allocation7 + $0x40] ss:$16 sps:$4 sm:$0xff]   ;;  %v4355_v35 = vld [vmem:[#allocation7 + $0x48] ss:$16 sps:$4 sm:$0xff]   ;;  %v4360_v36 = vld [vmem:[#allocation7 + $0x24] ss:$16 sps:$4 sm:$0xff]  }
  0x3c   :  { %246 = vmatprep.subr.bf16.mxu0 %v4334_v12  ;;  %289 = vmatprep.subr.bf16.mxu1 %v4336_v13  ;;  %v4363_v37 = vld [vmem:[#allocation7 + $0x2c] ss:$16 sps:$4 sm:$0xff]   ;;  %v4358_v39 = vld [vmem:[#allocation7 + $0x20] ss:$16 sps:$4 sm:$0xff]   ;;  %v4361_v40 = vld [vmem:[#allocation7 + $0x28] ss:$16 sps:$4 sm:$0xff]  }
  0x3d   :  { %v4366_v41 = vld [vmem:[#allocation7 + $0x4] ss:$16 sps:$4 sm:$0xff]   ;;  %v4369_v42 = vld [vmem:[#allocation7 + $0xc] ss:$16 sps:$4 sm:$0xff]   ;;  %v4364_v44 = vld [vmem:[#allocation7] ss:$16 sps:$4 sm:$0xff]  }
  0x3e   :  { %v4367_v45 = vld [vmem:[#allocation7 + $0x8] ss:$16 sps:$4 sm:$0xff]   ;;  %v5252_v46 = vld [vmem:[#allocation9 + $0xe4] ss:$16 sps:$4 sm:$0xff]   ;;  %v5254_v47 = vld [vmem:[#allocation9 + $0xec] ss:$16 sps:$4 sm:$0xff]  }
  0x3f   :  { %247 = vmatpush1.bf16.msra.mxu0 %v4338_v14  ;;  %290 = vmatpush1.bf16.msra.mxu1 %v4339_v15  ;;  %v5256_v49 = vld [vmem:[#allocation9 + $0xe0] ss:$16 sps:$4 sm:$0xff]   ;;  %v5258_v50 = vld [vmem:[#allocation9 + $0xe8] ss:$16 sps:$4 sm:$0xff]   ;;  %v5262_v51 = vld [vmem:[#allocation9 + $0xc4] ss:$16 sps:$4 sm:$0xff]  }
  0x40   :  { %248 = vmatprep.subr.bf16.mxu0 %v4340_v16  ;;  %291 = vmatprep.subr.bf16.mxu1 %v4342_v17  ;;  %v5264_v52 = vld [vmem:[#allocation9 + $0xcc] ss:$16 sps:$4 sm:$0xff]   ;;  %v5270_v53 = vld [vmem:[#allocation9 + $0xc0] ss:$16 sps:$4 sm:$0xff]   ;;  %v5272_v54 = vld [vmem:[#allocation9 + $0xc8] ss:$16 sps:$4 sm:$0xff]  }
  0x41   :  { %v5276_v55 = vld [vmem:[#allocation9 + $0xa4] ss:$16 sps:$4 sm:$0xff]   ;;  %v5278_v56 = vld [vmem:[#allocation9 + $0xac] ss:$16 sps:$4 sm:$0xff]   ;;  %v5284_v57 = vld [vmem:[#allocation9 + $0xa0] ss:$16 sps:$4 sm:$0xff]  }
  0x42   :  { %6785 = vst [vmem:[#allocation20_spill] sm:$0xff] %v5276_v55  ;;  %6786 = vst [vmem:[#allocation21_spill] sm:$0xff] %v5278_v56  ;;  %v5286_v58 = vld [vmem:[#allocation9 + $0xa8] ss:$16 sps:$4 sm:$0xff]   ;;  %v5290_v59 = vld [vmem:[#allocation9 + $0x84] ss:$16 sps:$4 sm:$0xff]  }
  0x43   :  { %249 = vmatpush1.bf16.msra.mxu0 %v4344_v18  ;;  %292 = vmatpush1.bf16.msra.mxu1 %v4345_v19  ;;  %6787 = vst [vmem:[#allocation22_spill] sm:$0xff] %v5284_v57  ;;  %6788 = vst [vmem:[#allocation23_spill] sm:$0xff] %v5286_v58  ;;  %v5292_v60 = vld [vmem:[#allocation9 + $0x8c] ss:$16 sps:$4 sm:$0xff]   ;;  %v5296_v61 = vld [vmem:[#allocation9 + $0x80] ss:$16 sps:$4 sm:$0xff]  }
  0x44   :  { %465 = vmatprep.subr.bf16.mxu0 %v4348_v20  ;;  %506 = vmatprep.subr.bf16.mxu1 %v4351_v21  ;;  %6789 = vst [vmem:[#allocation24_spill] sm:$0xff] %v5290_v59  ;;  %6790 = vst [vmem:[#allocation25_spill] sm:$0xff] %v5292_v60  ;;  %v5298_v62 = vld [vmem:[#allocation9 + $0x88] ss:$16 sps:$4 sm:$0xff]   ;;  %v5302_v63 = vld [vmem:[#allocation9 + $0x64] ss:$16 sps:$4 sm:$0xff]  }
  0x45   :  { %6791 = vst [vmem:[#allocation26_spill] sm:$0xff] %v5296_v61  ;;  %6792 = vst [vmem:[#allocation27_spill] sm:$0xff] %v5298_v62  ;;  %v5304_v1 = vld [vmem:[#allocation9 + $0x6c] ss:$16 sps:$4 sm:$0xff]   ;;  %v5308_v2 = vld [vmem:[#allocation9 + $0x60] ss:$16 sps:$4 sm:$0xff]  }
  0x46   :  { %6793 = vst [vmem:[#allocation28_spill] sm:$0xff] %v5302_v63  ;;  %6794 = vst [vmem:[#allocation29_spill] sm:$0xff] %v5304_v1  ;;  %v5310_v3 = vld [vmem:[#allocation9 + $0x68] ss:$16 sps:$4 sm:$0xff]   ;;  %v5314_v4 = vld [vmem:[#allocation9 + $0x44] ss:$16 sps:$4 sm:$0xff]  }
  0x47   :  { %6795 = vst [vmem:[#allocation30_spill] sm:$0xff] %v5308_v2  ;;  %6796 = vst [vmem:[#allocation31_spill] sm:$0xff] %v5310_v3  ;;  %v5316_v5 = vld [vmem:[#allocation9 + $0x4c] ss:$16 sps:$4 sm:$0xff]   ;;  %v5320_v6 = vld [vmem:[#allocation9 + $0x40] ss:$16 sps:$4 sm:$0xff]  }
  0x48   :  { %6797 = vst [vmem:[#allocation32_spill] sm:$0xff] %v5314_v4  ;;  %6798 = vst [vmem:[#allocation33_spill] sm:$0xff] %v5316_v5  ;;  %v5322_v7 = vld [vmem:[#allocation9 + $0x48] ss:$16 sps:$4 sm:$0xff]   ;;  %v5326_v8 = vld [vmem:[#allocation9 + $0x24] ss:$16 sps:$4 sm:$0xff]  }
  0x49   :  { %6799 = vst [vmem:[#allocation34_spill] sm:$0xff] %v5320_v6  ;;  %6800 = vst [vmem:[#allocation35_spill] sm:$0xff] %v5322_v7  ;;  %v5328_v9 = vld [vmem:[#allocation9 + $0x2c] ss:$16 sps:$4 sm:$0xff]   ;;  %v5332_v10 = vld [vmem:[#allocation9 + $0x20] ss:$16 sps:$4 sm:$0xff]  }
  0x4a   :  { %6801 = vst [vmem:[#allocation36_spill] sm:$0xff] %v5326_v8  ;;  %6802 = vst [vmem:[#allocation37_spill] sm:$0xff] %v5328_v9  ;;  %v5334_v11 = vld [vmem:[#allocation9 + $0x28] ss:$16 sps:$4 sm:$0xff]   ;;  %v5338_v12 = vld [vmem:[#allocation9 + $0x4] ss:$16 sps:$4 sm:$0xff]  }
  0x4b   :  { %6803 = vst [vmem:[#allocation38_spill] sm:$0xff] %v5332_v10  ;;  %6804 = vst [vmem:[#allocation39_spill] sm:$0xff] %v5334_v11  ;;  %v5340_v13 = vld [vmem:[#allocation9 + $0xc] ss:$16 sps:$4 sm:$0xff]   ;;  %v5344_v14 = vld [vmem:[#allocation9] ss:$16 sps:$4 sm:$0xff]  }
  0x4c   :  { %6805 = vst [vmem:[#allocation40_spill] sm:$0xff] %v5338_v12  ;;  %6806 = vst [vmem:[#allocation41_spill] sm:$0xff] %v5340_v13  ;;  %v5346_v15 = vld [vmem:[#allocation9 + $0x8] ss:$16 sps:$4 sm:$0xff]   ;;  %v5350_v16 = vld [vmem:[#allocation10 + $0xe4] ss:$16 sps:$4 sm:$0xff]  }
  0x4d   :  { %6807 = vst [vmem:[#allocation42_spill] sm:$0xff] %v5344_v14  ;;  %6808 = vst [vmem:[#allocation43_spill] sm:$0xff] %v5346_v15  ;;  %v5352_v17 = vld [vmem:[#allocation10 + $0xec] ss:$16 sps:$4 sm:$0xff]   ;;  %v5356_v18 = vld [vmem:[#allocation10 + $0xe0] ss:$16 sps:$4 sm:$0xff]  }
  0x4e   :  { %6809 = vst [vmem:[#allocation44_spill] sm:$0xff] %v5350_v16  ;;  %6810 = vst [vmem:[#allocation45_spill] sm:$0xff] %v5352_v17  ;;  %v5358_v19 = vld [vmem:[#allocation10 + $0xe8] ss:$16 sps:$4 sm:$0xff]   ;;  %v5362_v20 = vld [vmem:[#allocation10 + $0xc4] ss:$16 sps:$4 sm:$0xff]  }
  0x4f   :  { %v5364_v21 = vld [vmem:[#allocation10 + $0xcc] ss:$16 sps:$4 sm:$0xff]   ;;  %v5444_v22 = vld [vmem:[#allocation10] ss:$16 sps:$4 sm:$0xff]   ;;  %vm4085_vm5 = vcmask 7168   ;;  %vm4089_vm6 = vcmask 8192  }
  0x50   :  { %s5146_s27 = smov 1   ;;  %s5147_s28 = smov [#allocation12]  }
  0x51   :  { %s4107_s29 = sshll.u32 %s5147_s28, 4  ;;  %s4108_s29 = int_to_ptr.vmem [resolvable:$true] %s4107_s29 }
  0x52   :  { %s5088_s30 = scalar_lea.vmem %s4108_s29, 16  ;;  %s5092_s12 = scalar_lea.vmem %s4108_s29, 32 }
  0x53   :  { %p5089_p6 = scmp.ne.s32.totalorder %s4108_s29, %s5088_s30  ;;  %p5093_p7 = scmp.lt.s32.totalorder %s4108_s29, %s4108_s29 }
  0x54   :  { %p5094_p8 = scmp.lt.s32.totalorder %s5092_s12, %s5088_s30 }
  0x56   :  { %p5095_p9 = por %p5094_p8, %p5093_p7 }
  0x58   :  { %p5096_p10 = pnand %p5095_p9, %p5089_p6 }
  0xb0   :  { %v101_v24 = vpop.permute.xlu0 %100  ;;  %v331_v38 = vpop.permute.xlu1 %330 }
  0xb1   :  { %vm105_vm0 = vcmp.eq.s32.totalorder %v101_v24, %v96_v23  ;;  %vm332_vm3 = vcmp.eq.s32.totalorder %v331_v38, %v96_v23  ;;  %v5372_v24 = vld [vmem:[#allocation10 + $0xc8] ss:$16 sps:$4 sm:$0xff]   ;;  %v5416_v38 = vld [vmem:[#allocation10 + $0x4c] ss:$16 sps:$4 sm:$0xff]  }
  0xb2   :  { %v4132_v27 = vsel %vm105_vm0, 1.0, %v5145_v26  ;;  %v4152_v43 = vsel %vm332_vm3, 1.0, %v5145_v26 }
  0xb3   :  { %v335_v48 = vpack.c.bf16 %v4152_v43, %v4152_v43  ;;  %v5432_v43 = vld [vmem:[#allocation10 + $0x20] ss:$16 sps:$4 sm:$0xff]  }
  0xb4   :  { %v104_v25 = vpop.permute.xlu0 %103 }
  0xb5   :  { %vm106_vm1 = vcmp.eq.s32.totalorder %v104_v25, %v96_v23  ;;  %v5370_v23 = vld [vmem:[#allocation10 + $0xc0] ss:$16 sps:$4 sm:$0xff]   ;;  %v5376_v25 = vld [vmem:[#allocation10 + $0xa4] ss:$16 sps:$4 sm:$0xff]  }
  0xb6   :  { %v4133_v28 = vsel %vm106_vm1, 1.0, %v5145_v26  ;;  %v5378_v26 = vld [vmem:[#allocation10 + $0xac] ss:$16 sps:$4 sm:$0xff]  }
  0xb7   :  { %v111_v31 = vpack.c.bf16 %v4133_v28, %v4132_v27  ;;  %v5384_v27 = vld [vmem:[#allocation10 + $0xa0] ss:$16 sps:$4 sm:$0xff]   ;;  %v5386_v28 = vld [vmem:[#allocation10 + $0xa8] ss:$16 sps:$4 sm:$0xff]  }
  0xb9   :  { %4150 = vmatmul.mubr.msk.bf16.vlgmr.msra.gmra.mxu0 %vm230_vm2, %v111_v31  ;;  %4151 = vmatmul.mubr.msk.bf16.vlgmr.msra.gmra.mxu1 %vm230_vm2, %v111_v31  ;;  %v5396_v31 = vld [vmem:[#allocation10 + $0x80] ss:$16 sps:$4 sm:$0xff]  }
  0xba   :  { %466 = vmatpush1.bf16.msra.mxu0 %v4346_v29  ;;  %507 = vmatpush1.bf16.msra.mxu1 %v4349_v30  ;;  %v5390_v29 = vld [vmem:[#allocation10 + $0x84] ss:$16 sps:$4 sm:$0xff]   ;;  %v5392_v30 = vld [vmem:[#allocation10 + $0x8c] ss:$16 sps:$4 sm:$0xff]  }
  0xbb   :  { %467 = vmatprep.subr.bf16.mxu0 %v4354_v32  ;;  %508 = vmatprep.subr.bf16.mxu1 %v4357_v33  ;;  %v5398_v32 = vld [vmem:[#allocation10 + $0x88] ss:$16 sps:$4 sm:$0xff]   ;;  %v5402_v33 = vld [vmem:[#allocation10 + $0x64] ss:$16 sps:$4 sm:$0xff]  }
  0xbc   :  { %489 = vmatprep.mubr.bf16.mxu0 %v6667_v0  ;;  %530 = vmatprep.mubr.bf16.mxu1 %v6667_v0 }
  0xbe   :  { %468 = vmatpush1.bf16.msra.mxu0 %v4352_v34  ;;  %509 = vmatpush1.bf16.msra.mxu1 %v4355_v35  ;;  %v5404_v34 = vld [vmem:[#allocation10 + $0x6c] ss:$16 sps:$4 sm:$0xff]   ;;  %v5408_v35 = vld [vmem:[#allocation10 + $0x60] ss:$16 sps:$4 sm:$0xff]  }
  0xbf   :  { %469 = vmatprep.subr.bf16.mxu0 %v4360_v36  ;;  %510 = vmatprep.subr.bf16.mxu1 %v4363_v37  ;;  %v5410_v36 = vld [vmem:[#allocation10 + $0x68] ss:$16 sps:$4 sm:$0xff]   ;;  %v5414_v37 = vld [vmem:[#allocation10 + $0x44] ss:$16 sps:$4 sm:$0xff]  }
  0xc2   :  { %470 = vmatpush1.bf16.msra.mxu0 %v4358_v39  ;;  %511 = vmatpush1.bf16.msra.mxu1 %v4361_v40  ;;  %v5420_v39 = vld [vmem:[#allocation10 + $0x40] ss:$16 sps:$4 sm:$0xff]   ;;  %v5422_v40 = vld [vmem:[#allocation10 + $0x48] ss:$16 sps:$4 sm:$0xff]  }
  0xc3   :  { %471 = vmatprep.subr.bf16.mxu0 %v4366_v41  ;;  %512 = vmatprep.subr.bf16.mxu1 %v4369_v42  ;;  %v5426_v41 = vld [vmem:[#allocation10 + $0x24] ss:$16 sps:$4 sm:$0xff]   ;;  %v5428_v42 = vld [vmem:[#allocation10 + $0x2c] ss:$16 sps:$4 sm:$0xff]  }
  0xc4   :  { %6811 = vst [vmem:[#allocation46_spill] sm:$0xff] %v5428_v42 }
  0xc6   :  { %472 = vmatpush1.bf16.msra.mxu0 %v4364_v44  ;;  %513 = vmatpush1.bf16.msra.mxu1 %v4367_v45  ;;  %v5434_v44 = vld [vmem:[#allocation10 + $0x28] ss:$16 sps:$4 sm:$0xff]   ;;  %v5438_v45 = vld [vmem:[#allocation10 + $0x4] ss:$16 sps:$4 sm:$0xff]  }
  0xc7   :  { %757 = vmatprep.subr.bf16.mxu0 %v5252_v46  ;;  %798 = vmatprep.subr.bf16.mxu1 %v5254_v47 }
  0xc9   :  { %4169 = vmatmul.mubr.msk.bf16.vlgmr.msra.gmra.mxu0 %vm230_vm2, %v335_v48  ;;  %4170 = vmatmul.mubr.msk.bf16.vlgmr.msra.gmra.mxu1 %vm230_vm2, %v335_v48  ;;  %v5440_v48 = vld [vmem:[#allocation10 + $0xc] ss:$16 sps:$4 sm:$0xff]  }
  0xca   :  { %758 = vmatpush1.bf16.msra.mxu0 %v5256_v49  ;;  %799 = vmatpush1.bf16.msra.mxu1 %v5258_v50 }
  0xcb   :  { %759 = vmatprep.subr.bf16.mxu0 %v5262_v51  ;;  %800 = vmatprep.subr.bf16.mxu1 %v5264_v52 }
  0xcc   :  { %789 = vmatprep.mubr.bf16.mxu0 %v6667_v0  ;;  %830 = vmatprep.mubr.bf16.mxu1 %v6667_v0 }
  0xce   :  { %760 = vmatpush1.bf16.msra.mxu0 %v5270_v53  ;;  %801 = vmatpush1.bf16.msra.mxu1 %v5272_v54 }
  0xcf   :  { %761 = vmatprep.subr.bf16.mxu0 %v5276_v55  ;;  %802 = vmatprep.subr.bf16.mxu1 %v5278_v56 }
  0xd2   :  { %762 = vmatpush1.bf16.msra.mxu0 %v5284_v57  ;;  %803 = vmatpush1.bf16.msra.mxu1 %v5286_v58 }
  0xd3   :  { %763 = vmatprep.subr.bf16.mxu0 %v5290_v59  ;;  %804 = vmatprep.subr.bf16.mxu1 %v5292_v60 }
  0xd6   :  { %764 = vmatpush1.bf16.msra.mxu0 %v5296_v61  ;;  %805 = vmatpush1.bf16.msra.mxu1 %v5298_v62 }
  0xd7   :  { %765 = vmatprep.subr.bf16.mxu0 %v5302_v63  ;;  %806 = vmatprep.subr.bf16.mxu1 %v5304_v1 }
  0xda   :  { %766 = vmatpush1.bf16.msra.mxu0 %v5308_v2  ;;  %807 = vmatpush1.bf16.msra.mxu1 %v5310_v3 }
  0xdb   :  { %767 = vmatprep.subr.bf16.mxu0 %v5314_v4  ;;  %808 = vmatprep.subr.bf16.mxu1 %v5316_v5 }
  0xde   :  { %768 = vmatpush1.bf16.msra.mxu0 %v5320_v6  ;;  %809 = vmatpush1.bf16.msra.mxu1 %v5322_v7 }
  0xdf   :  { %769 = vmatprep.subr.bf16.mxu0 %v5326_v8  ;;  %810 = vmatprep.subr.bf16.mxu1 %v5328_v9 }
  0xe2   :  { %770 = vmatpush1.bf16.msra.mxu0 %v5332_v10  ;;  %811 = vmatpush1.bf16.msra.mxu1 %v5334_v11 }
  0xe3   :  { %771 = vmatprep.subr.bf16.mxu0 %v5338_v12  ;;  %812 = vmatprep.subr.bf16.mxu1 %v5340_v13 }
  0xe6   :  { %772 = vmatpush1.bf16.msra.mxu0 %v5344_v14  ;;  %813 = vmatpush1.bf16.msra.mxu1 %v5346_v15 }
  0xe7   :  { %1077 = vmatprep.subr.bf16.mxu0 %v5350_v16  ;;  %1118 = vmatprep.subr.bf16.mxu1 %v5352_v17 }
  0xe9   :  { %790 = vmatmul.mubr.bf16.vlgmr.msra.gmra.mxu0 %v6667_v0  ;;  %831 = vmatmul.mubr.bf16.vlgmr.msra.gmra.mxu1 %v6667_v0 }
  0xea   :  { %1078 = vmatpush1.bf16.msra.mxu0 %v5356_v18  ;;  %1119 = vmatpush1.bf16.msra.mxu1 %v5358_v19 }
  0xeb   :  { %1079 = vmatprep.subr.bf16.mxu0 %v5362_v20  ;;  %1120 = vmatprep.subr.bf16.mxu1 %v5364_v21 }
  0xec   :  { %1109 = vmatprep.mubr.bf16.mxu0 %v6667_v0  ;;  %1150 = vmatprep.mubr.bf16.mxu1 %v6667_v0  ;;  %v5446_v0 = vld [vmem:[#allocation10 + $0x8] ss:$16 sps:$4 sm:$0xff]  }
  0xee   :  { %1080 = vmatpush1.bf16.msra.mxu0 %v5370_v23  ;;  %1121 = vmatpush1.bf16.msra.mxu1 %v5372_v24 }
  0xef   :  { %1081 = vmatprep.subr.bf16.mxu0 %v5376_v25  ;;  %1122 = vmatprep.subr.bf16.mxu1 %v5378_v26 }
  0xf2   :  { %1082 = vmatpush1.bf16.msra.mxu0 %v5384_v27  ;;  %1123 = vmatpush1.bf16.msra.mxu1 %v5386_v28 }
  0xf3   :  { %1083 = vmatprep.subr.bf16.mxu0 %v5390_v29  ;;  %1124 = vmatprep.subr.bf16.mxu1 %v5392_v30 }
  0xf6   :  { %1084 = vmatpush1.bf16.msra.mxu0 %v5396_v31  ;;  %1125 = vmatpush1.bf16.msra.mxu1 %v5398_v32 }
  0xf7   :  { %1085 = vmatprep.subr.bf16.mxu0 %v5402_v33  ;;  %1126 = vmatprep.subr.bf16.mxu1 %v5404_v34 }
  0xfa   :  { %1086 = vmatpush1.bf16.msra.mxu0 %v5408_v35  ;;  %1127 = vmatpush1.bf16.msra.mxu1 %v5410_v36 }
  0xfb   :  { %1087 = vmatprep.subr.bf16.mxu0 %v5414_v37  ;;  %1128 = vmatprep.subr.bf16.mxu1 %v5416_v38 }
  0xfe   :  { %1088 = vmatpush1.bf16.msra.mxu0 %v5420_v39  ;;  %1129 = vmatpush1.bf16.msra.mxu1 %v5422_v40 }
  0xff   :  { %1089 = vmatprep.subr.bf16.mxu0 %v5426_v41  ;;  %1130 = vmatprep.subr.bf16.mxu1 %v5428_v42  ;;  %v6812_v42 = vmov 0  }
 0x102   :  { %1090 = vmatpush1.bf16.msra.mxu0 %v5432_v43  ;;  %1131 = vmatpush1.bf16.msra.mxu1 %v5434_v44 }
 0x103   :  { %1091 = vmatprep.subr.bf16.mxu0 %v5438_v45  ;;  %1132 = vmatprep.subr.bf16.mxu1 %v5440_v48 }
 0x106   :  { %1092 = vmatpush1.bf16.msra.mxu0 %v5444_v22  ;;  %1133 = vmatpush1.bf16.msra.mxu1 %v5446_v0 }
 0x107   :  { %1207 = vmatprep.subr.bf16.mxu0 %v5252_v46  ;;  %1248 = vmatprep.subr.bf16.mxu1 %v5254_v47 }
 0x109   :  { %1110 = vmatmul.mubr.bf16.vlgmr.msra.gmra.mxu0 %v6812_v42  ;;  %1151 = vmatmul.mubr.bf16.vlgmr.msra.gmra.mxu1 %v6812_v42 }
 0x10a   :  { %1208 = vmatpush1.bf16.msra.mxu0 %v5256_v49  ;;  %1249 = vmatpush1.bf16.msra.mxu1 %v5258_v50 }
 0x10b   :  { %1209 = vmatprep.subr.bf16.mxu0 %v5262_v51  ;;  %1250 = vmatprep.subr.bf16.mxu1 %v5264_v52 }
 0x10c   :  { %1239 = vmatprep.mubr.bf16.mxu0 %v6812_v42  ;;  %1280 = vmatprep.mubr.bf16.mxu1 %v6812_v42 }
 0x10e   :  { %1210 = vmatpush1.bf16.msra.mxu0 %v5270_v53  ;;  %1251 = vmatpush1.bf16.msra.mxu1 %v5272_v54 }
 0x10f   :  { %1211 = vmatprep.subr.bf16.mxu0 %v5276_v55  ;;  %1252 = vmatprep.subr.bf16.mxu1 %v5278_v56 }
 0x112   :  { %1212 = vmatpush1.bf16.msra.mxu0 %v5284_v57  ;;  %1253 = vmatpush1.bf16.msra.mxu1 %v5286_v58 }
 0x113   :  { %1213 = vmatprep.subr.bf16.mxu0 %v5290_v59  ;;  %1254 = vmatprep.subr.bf16.mxu1 %v5292_v60 }
 0x116   :  { %1214 = vmatpush1.bf16.msra.mxu0 %v5296_v61  ;;  %1255 = vmatpush1.bf16.msra.mxu1 %v5298_v62 }
 0x117   :  { %1215 = vmatprep.subr.bf16.mxu0 %v5302_v63  ;;  %1256 = vmatprep.subr.bf16.mxu1 %v5304_v1 }
 0x11a   :  { %1216 = vmatpush1.bf16.msra.mxu0 %v5308_v2  ;;  %1257 = vmatpush1.bf16.msra.mxu1 %v5310_v3 }
 0x11b   :  { %1217 = vmatprep.subr.bf16.mxu0 %v5314_v4  ;;  %1258 = vmatprep.subr.bf16.mxu1 %v5316_v5 }
 0x11e   :  { %1218 = vmatpush1.bf16.msra.mxu0 %v5320_v6  ;;  %1259 = vmatpush1.bf16.msra.mxu1 %v5322_v7  ;;  %v6813_v7 = vlaneseq }
 0x11f   :  { %1219 = vmatprep.subr.bf16.mxu0 %v5326_v8  ;;  %1260 = vmatprep.subr.bf16.mxu1 %v5328_v9 }
 0x120   :  { %v131_v8 = vshrl.u32 %v6813_v7, 7 }
 0x122   :  { %1220 = vmatpush1.bf16.msra.mxu0 %v5332_v10  ;;  %1261 = vmatpush1.bf16.msra.mxu1 %v5334_v11  ;;  %v5491_v6 = vsub.s32 0, %v131_v8  ;;  %v5493_v9 = vsub.s32 2, %v131_v8  ;;  %v5498_v11 = vsub.s32 1, %v131_v8 }
 0x123   :  { %1221 = vmatprep.subr.bf16.mxu0 %v5338_v12  ;;  %1262 = vmatprep.subr.bf16.mxu1 %v5340_v13  ;;  %v128_v12 = vld [vmem:[%s6658_s4] sm:$0xf]  ;;  %v5500_v13 = vsub.s32 3, %v131_v8 }
 0x124   :  { %6814 = vst [vmem:[#allocation47_spill] sm:$0xff] %v5491_v6 }
 0x125   :  { %v145_v7 = vrot.slane %v128_v12, %v5500_v13 }
 0x126   :  { %1222 = vmatpush1.bf16.msra.mxu0 %v5344_v14  ;;  %1263 = vmatpush1.bf16.msra.mxu1 %v5346_v15  ;;  %v133_v15 = vrot.slane %v128_v12, %v5491_v6 }
 0x127   :  { %1337 = vmatprep.subr.bf16.mxu0 %v5350_v16  ;;  %1378 = vmatprep.subr.bf16.mxu1 %v5352_v17  ;;  %v141_v16 = vrot.slane %v128_v12, %v5493_v9  ;;  %v137_v17 = vrot.slane %v128_v12, %v5498_v11 }
 0x179   :  { %v268_v14 = vpop.f32.mrf.mxu0  ;;  %v311_v10 = vpop.f32.mrf.mxu1 }
 0x17a   :  { %v269_v5 = vadd.f32 %v268_v14, %v133_v15  ;;  %v312_v4 = vadd.f32 %v311_v10, %v141_v16 }
 0x17b   :  { %v270_v3 = vpop.f32.mrf.mxu0  ;;  %v313_v2 = vpop.f32.mrf.mxu1 }
 0x17c   :  { %320 = vst [vmem:[#allocation2] sm:$0xff] %v269_v5  ;;  %322 = vst [vmem:[#allocation2 + $0x10] sm:$0xff] %v312_v4  ;;  %v271_v1 = vadd.f32 %v270_v3, %v137_v17  ;;  %v314_v63 = vadd.f32 %v313_v2, %v145_v7  ;;  %v352_v4 = vld [vmem:[%s6659_s5] sm:$0xf] }
 0x17d   :  { %v272_v8 = vpop.f32.mrf.mxu0  ;;  %v315_v62 = vpop.f32.mrf.mxu1  ;;  %v357_v2 = vrot.slane %v352_v4, %v5491_v6  ;;  %v365_v3 = vrot.slane %v352_v4, %v5493_v9 }
 0x17e   :  { %321 = vst [vmem:[#allocation2 + $0x8] sm:$0xff] %v271_v1  ;;  %323 = vst [vmem:[#allocation2 + $0x18] sm:$0xff] %v314_v63  ;;  %v273_v61 = vadd.f32 %v272_v8, %v133_v15  ;;  %v316_v60 = vadd.f32 %v315_v62, %v141_v16  ;;  %v361_v63 = vrot.slane %v352_v4, %v5498_v11 }
 0x17f   :  { %v274_v59 = vpop.f32.mrf.mxu0  ;;  %v317_v58 = vpop.f32.mrf.mxu1  ;;  %v369_v62 = vrot.slane %v352_v4, %v5500_v13 }
 0x180   :  { %324 = vst [vmem:[#allocation2 + $0x20] sm:$0xff] %v273_v61  ;;  %326 = vst [vmem:[#allocation2 + $0x30] sm:$0xff] %v316_v60  ;;  %v275_v12 = vadd.f32 %v274_v59, %v137_v17  ;;  %v318_v57 = vadd.f32 %v317_v58, %v145_v7 }
 0x182   :  { %325 = vst [vmem:[#allocation2 + $0x28] sm:$0xff] %v275_v12  ;;  %327 = vst [vmem:[#allocation2 + $0x38] sm:$0xff] %v318_v57 }
 0x185   :  { %v575_v7 = vld [vmem:[#allocation2] ss:$8 sm:$0xf] }
 0x186   :  { %v740_v8 = vrot.slane %v575_v7, %v5491_v6 }
 0x189   :  { %v491_v1 = vpop.f32.mrf.mxu0  ;;  %v532_v5 = vpop.f32.mrf.mxu1 }
 0x18a   :  { %v492_v61 = vadd.f32 %v491_v1, %v357_v2  ;;  %v533_v60 = vadd.f32 %v532_v5, %v365_v3  ;;  %v744_v2 = vrot.slane %v575_v7, %v5498_v11 }
 0x18b   :  { %v493_v59 = vpop.f32.mrf.mxu0  ;;  %v534_v58 = vpop.f32.mrf.mxu1 }
 0x18c   :  { %539 = vst [vmem:[#allocation3] sm:$0xff] %v492_v61  ;;  %541 = vst [vmem:[#allocation3 + $0x10] sm:$0xff] %v533_v60  ;;  %v494_v57 = vadd.f32 %v493_v59, %v361_v63  ;;  %v535_v10 = vadd.f32 %v534_v58, %v369_v62 }
 0x18d   :  { %v495_v14 = vpop.f32.mrf.mxu0  ;;  %v536_v15 = vpop.f32.mrf.mxu1 }
 0x18e   :  { %540 = vst [vmem:[#allocation3 + $0x8] sm:$0xff] %v494_v57  ;;  %542 = vst [vmem:[#allocation3 + $0x18] sm:$0xff] %v535_v10  ;;  %v748_v57 = vrot.slane %v575_v7, %v5493_v9  ;;  %v752_v15 = vrot.slane %v575_v7, %v5500_v13 }
 0x18f   :  { %v496_v16 = vpop.f32.mrf.mxu0  ;;  %v537_v17 = vpop.f32.mrf.mxu1 }
 0x1a9   :  { %v791_v12 = vpop.f32.mrf.mxu0  ;;  %v832_v4 = vpop.f32.mrf.mxu1 }
 0x1aa   :  { %v792_v56 = vadd.f32 %v791_v12, %v740_v8  ;;  %v833_v10 = vadd.f32 %v832_v4, %v748_v57 }
 0x1ab   :  { %v793_v3 = vpop.f32.mrf.mxu0  ;;  %v834_v1 = vpop.f32.mrf.mxu1 }
 0x1ac   :  { %v4203_v5 = vmul.f32 -1.442695, %v792_v56  ;;  %v794_v61 = vadd.f32 %v793_v3, %v744_v2  ;;  %v4205_v14 = vmul.f32 -1.442695, %v833_v10  ;;  %v835_v17 = vadd.f32 %v834_v1, %v752_v15 }
 0x1ad   :  { %v795_v63 = vpop.f32.mrf.mxu0  ;;  %v836_v62 = vpop.f32.mrf.mxu1  ;;  %v895_v2 = vld [vmem:[#allocation3] ss:$8 sm:$0xf] }
 0x1ae   :  { %4466 = vpow2.f32 %v4203_v5  ;;  %v4204_v60 = vmul.f32 -1.442695, %v794_v61  ;;  %v1060_v3 = vrot.slane %v895_v2, %v5491_v6  ;;  %v1064_v4 = vrot.slane %v895_v2, %v5498_v11 }
 0x1af   :  { %v796_v59 = vpop.f32.mrf.mxu0  ;;  %v837_v58 = vpop.f32.mrf.mxu1 }
 0x1b0   :  { %4468 = vpow2.f32 %v4204_v60 }
 0x1b1   :  { %4470 = vpow2.f32 %v4205_v14 }
 0x1bb   :  { %v4467_v16 = vpop.eup %4466 }
 0x1bc   :  { %v848_v8 = vadd.f32 1.0, %v4467_v16 }
 0x1bd   :  { %v4469_v12 = vpop.eup %4468 }
 0x1be   :  { %4472 = vrcp.f32 %v848_v8  ;;  %v849_v56 = vadd.f32 1.0, %v4469_v12  ;;  %v4471_v63 = vpop.eup %4470 }
 0x1bf   :  { %4474 = vtanh.f32 %v835_v17  ;;  %v850_v14 = vadd.f32 1.0, %v4471_v63  ;;  %v1072_v63 = vrot.slane %v895_v2, %v5500_v13 }
 0x1c0   :  { %4476 = vrcp.f32 %v849_v56 }
 0x1c9   :  { %v1111_v5 = vpop.f32.mrf.mxu0  ;;  %v1152_v61 = vpop.f32.mrf.mxu1 }
 0x1ca   :  { %v1112_v62 = vadd.f32 %v1111_v5, %v1060_v3  ;;  %v1068_v3 = vrot.slane %v895_v2, %v5493_v9 }
 0x1cb   :  { %v4473_v60 = vpop.eup %4472  ;;  %v1113_v7 = vpop.f32.mrf.mxu0 }
 0x1cc   :  { %v1154_v59 = vpop.f32.mrf.mxu1  ;;  %v4475_v1 = vpop.eup %4474  ;;  %v4238_v58 = vmul.f32 -1.442695, %v1112_v62  ;;  %v1114_v57 = vadd.f32 %v1113_v7, %v1064_v4  ;;  %v1153_v5 = vadd.f32 %v1152_v61, %v1068_v3 }
 0x1cd   :  { %v4477_v10 = vpop.eup %4476  ;;  %v1115_v15 = vpop.f32.mrf.mxu0  ;;  %v859_v8 = vmul.f32 %v4475_v1, %v4473_v60  ;;  %v1155_v7 = vadd.f32 %v1154_v59, %v1072_v63 }
 0x1ce   :  { %v1156_v16 = vpop.f32.mrf.mxu1  ;;  %v858_v17 = vmul.f32 0.0, %v4477_v10  ;;  %4478 = vpow2.f32 %v4238_v58  ;;  %v4239_v12 = vmul.f32 -1.442695, %v1114_v57  ;;  %v4240_v62 = vmul.f32 -1.442695, %v1153_v5 }
 0x1cf   :  { %v1116_v56 = vpop.f32.mrf.mxu0 }
 0x1d0   :  { %v1157_v6 = vpop.f32.mrf.mxu1  ;;  %v5519_v55 = vadd.f32 %v859_v8, %v858_v17  ;;  %4480 = vpow2.f32 %v4239_v12  ;;  %v6815_v56 = vld [vmem:[#allocation46_spill] sm:$0xff] }
 0x1d1   :  { %4482 = vrcp.f32 %v850_v14 }
 0x1d2   :  { %4484 = vtanh.f32 %v5519_v55 }
 0x1d3   :  { %4486 = vpow2.f32 %v4240_v62 }
 0x1db   :  { %v4479_v4 = vpop.eup %4478 }
 0x1dc   :  { %v1168_v10 = vadd.f32 1.0, %v4479_v4  ;;  %v6818_v4 = vld [vmem:[#allocation22_spill] sm:$0xff] }
 0x1dd   :  { %v4481_v60 = vpop.eup %4480 }
 0x1de   :  { %v4483_v1 = vpop.eup %4482  ;;  %4488 = vrcp.f32 %v1168_v10  ;;  %v1169_v6 = vadd.f32 1.0, %v4481_v60  ;;  %v6822_v10 = vld [vmem:[#allocation26_spill] sm:$0xff]  ;;  %v6823_v60 = vld [vmem:[#allocation27_spill] sm:$0xff] }
 0x1df   :  { %v4485_v58 = vpop.eup %4484  ;;  %4490 = vtanh.f32 %v1155_v7  ;;  %v6821_v7 = vld [vmem:[#allocation25_spill] sm:$0xff] }
 0x1e0   :  { %4492 = vrcp.f32 %v1169_v6  ;;  %v862_v57 = vmul.f32 %v4485_v58, %v4483_v1  ;;  %v4487_v2 = vpop.eup %4486  ;;  %v6824_v1 = vld [vmem:[#allocation28_spill] sm:$0xff]  ;;  %v6825_v6 = vld [vmem:[#allocation29_spill] sm:$0xff]  ;;  %v6826_v58 = vld [vmem:[#allocation30_spill] sm:$0xff] }
 0x1e1   :  { %v1170_v16 = vadd.f32 1.0, %v4487_v2  ;;  %v6829_v2 = vld [vmem:[#allocation33_spill] sm:$0xff] }
 0x1e2   :  { %v1183_v14 = vpack.c.bf16 %v862_v57, %v862_v57  ;;  %v6827_v57 = vld [vmem:[#allocation31_spill] sm:$0xff] }
 0x1e3   :  { %4494 = vrcp.f32 %v1170_v16  ;;  %v6833_v16 = vld [vmem:[#allocation37_spill] sm:$0xff] }
 0x1e4   :  { %1240 = vmatmul.mubr.bf16.vlgmr.msra.gmra.mxu0 %v1183_v14  ;;  %1281 = vmatmul.mubr.bf16.vlgmr.msra.gmra.mxu1 %v1183_v14  ;;  %v6828_v14 = vld [vmem:[#allocation32_spill] sm:$0xff] }
 0x1e5   :  { %1338 = vmatpush1.bf16.msra.mxu0 %v5356_v18  ;;  %1379 = vmatpush1.bf16.msra.mxu1 %v5358_v19 }
 0x1e6   :  { %1339 = vmatprep.subr.bf16.mxu0 %v5362_v20  ;;  %1380 = vmatprep.subr.bf16.mxu1 %v5364_v21 }
 0x1e7   :  { %1369 = vmatprep.mubr.bf16.mxu0 %v6812_v42  ;;  %1410 = vmatprep.mubr.bf16.mxu1 %v6812_v42 }
 0x1e9   :  { %1340 = vmatpush1.bf16.msra.mxu0 %v5370_v23  ;;  %1381 = vmatpush1.bf16.msra.mxu1 %v5372_v24 }
 0x1ea   :  { %1341 = vmatprep.subr.bf16.mxu0 %v5376_v25  ;;  %1382 = vmatprep.subr.bf16.mxu1 %v5378_v26 }
 0x1eb   :  { %v4489_v61 = vpop.eup %4488 }
 0x1ec   :  { %v4491_v59 = vpop.eup %4490 }
 0x1ed   :  { %v4493_v15 = vpop.eup %4492  ;;  %1342 = vmatpush1.bf16.msra.mxu0 %v5384_v27  ;;  %1383 = vmatpush1.bf16.msra.mxu1 %v5386_v28  ;;  %v1179_v8 = vmul.f32 %v4491_v59, %v4489_v61  ;;  %v6830_v61 = vld [vmem:[#allocation34_spill] sm:$0xff]  ;;  %v6831_v59 = vld [vmem:[#allocation35_spill] sm:$0xff] }
 0x1ee   :  { %v1178_v17 = vmul.f32 0.0, %v4493_v15  ;;  %1343 = vmatprep.subr.bf16.mxu0 %v5390_v29  ;;  %1384 = vmatprep.subr.bf16.mxu1 %v5392_v30  ;;  %v6832_v15 = vld [vmem:[#allocation36_spill] sm:$0xff] }
 0x1f0   :  { %v5538_v12 = vadd.f32 %v1179_v8, %v1178_v17  ;;  %v4495_v3 = vpop.eup %4494  ;;  %v6834_v17 = vld [vmem:[#allocation38_spill] sm:$0xff]  ;;  %v6835_v8 = vld [vmem:[#allocation39_spill] sm:$0xff] }
 0x1f1   :  { %1344 = vmatpush1.bf16.msra.mxu0 %v5396_v31  ;;  %1385 = vmatpush1.bf16.msra.mxu1 %v5398_v32 }
 0x1f2   :  { %4496 = vtanh.f32 %v5538_v12  ;;  %1345 = vmatprep.subr.bf16.mxu0 %v5402_v33  ;;  %1386 = vmatprep.subr.bf16.mxu1 %v5404_v34 }
 0x1f5   :  { %1346 = vmatpush1.bf16.msra.mxu0 %v5408_v35  ;;  %1387 = vmatpush1.bf16.msra.mxu1 %v5410_v36 }
 0x1f6   :  { %1347 = vmatprep.subr.bf16.mxu0 %v5414_v37  ;;  %1388 = vmatprep.subr.bf16.mxu1 %v5416_v38 }
 0x1f9   :  { %1348 = vmatpush1.bf16.msra.mxu0 %v5420_v39  ;;  %1389 = vmatpush1.bf16.msra.mxu1 %v5422_v40 }
 0x1fa   :  { %1349 = vmatprep.subr.bf16.mxu0 %v5426_v41  ;;  %1390 = vmatprep.subr.bf16.mxu1 %v6815_v56 }
 0x1fd   :  { %1350 = vmatpush1.bf16.msra.mxu0 %v5432_v43  ;;  %1391 = vmatpush1.bf16.msra.mxu1 %v5434_v44 }
 0x1fe   :  { %1351 = vmatprep.subr.bf16.mxu0 %v5438_v45  ;;  %1392 = vmatprep.subr.bf16.mxu1 %v5440_v48 }
 0x1ff   :  { %v4497_v5 = vpop.eup %4496 }
 0x200   :  { %v1182_v62 = vmul.f32 %v4497_v5, %v4495_v3  ;;  %v6836_v3 = vld [vmem:[#allocation40_spill] sm:$0xff]  ;;  %v6837_v5 = vld [vmem:[#allocation41_spill] sm:$0xff] }
 0x201   :  { %1352 = vmatpush1.bf16.msra.mxu0 %v5444_v22  ;;  %1393 = vmatpush1.bf16.msra.mxu1 %v5446_v0 }
 0x202   :  { %v1313_v63 = vpack.c.bf16 %v1182_v62, %v1182_v62  ;;  %1467 = vmatprep.subr.bf16.mxu0 %v5252_v46  ;;  %1508 = vmatprep.subr.bf16.mxu1 %v5254_v47  ;;  %v6816_v46 = vld [vmem:[#allocation20_spill] sm:$0xff]  ;;  %v6817_v47 = vld [vmem:[#allocation21_spill] sm:$0xff]  ;;  %v6838_v62 = vld [vmem:[#allocation42_spill] sm:$0xff] }
 0x204   :  { %1370 = vmatmul.mubr.bf16.vlgmr.msra.gmra.mxu0 %v1313_v63  ;;  %1411 = vmatmul.mubr.bf16.vlgmr.msra.gmra.mxu1 %v1313_v63  ;;  %v6839_v63 = vld [vmem:[#allocation43_spill] sm:$0xff] }
 0x205   :  { %1468 = vmatpush1.bf16.msra.mxu0 %v5256_v49  ;;  %1509 = vmatpush1.bf16.msra.mxu1 %v5258_v50  ;;  %v6819_v49 = vld [vmem:[#allocation23_spill] sm:$0xff]  ;;  %v6820_v50 = vld [vmem:[#allocation24_spill] sm:$0xff] }
 0x206   :  { %1469 = vmatprep.subr.bf16.mxu0 %v5262_v51  ;;  %1510 = vmatprep.subr.bf16.mxu1 %v5264_v52 }
 0x207   :  { %1499 = vmatprep.mubr.bf16.mxu0 %v6812_v42  ;;  %1540 = vmatprep.mubr.bf16.mxu1 %v6812_v42 }
 0x209   :  { %1470 = vmatpush1.bf16.msra.mxu0 %v5270_v53  ;;  %1511 = vmatpush1.bf16.msra.mxu1 %v5272_v54 }
 0x20a   :  { %1471 = vmatprep.subr.bf16.mxu0 %v6816_v46  ;;  %1512 = vmatprep.subr.bf16.mxu1 %v6817_v47 }
 0x20d   :  { %1472 = vmatpush1.bf16.msra.mxu0 %v6818_v4  ;;  %1513 = vmatpush1.bf16.msra.mxu1 %v6819_v49 }
 0x20e   :  { %1473 = vmatprep.subr.bf16.mxu0 %v6820_v50  ;;  %1514 = vmatprep.subr.bf16.mxu1 %v6821_v7 }
 0x211   :  { %1474 = vmatpush1.bf16.msra.mxu0 %v6822_v10  ;;  %1515 = vmatpush1.bf16.msra.mxu1 %v6823_v60 }
 0x212   :  { %1475 = vmatprep.subr.bf16.mxu0 %v6824_v1  ;;  %1516 = vmatprep.subr.bf16.mxu1 %v6825_v6 }
 0x215   :  { %1476 = vmatpush1.bf16.msra.mxu0 %v6826_v58  ;;  %1517 = vmatpush1.bf16.msra.mxu1 %v6827_v57 }
 0x216   :  { %1477 = vmatprep.subr.bf16.mxu0 %v6828_v14  ;;  %1518 = vmatprep.subr.bf16.mxu1 %v6829_v2  ;;  %v6840_v2 = vld [vmem:[#allocation44_spill] sm:$0xff] }
 0x219   :  { %1478 = vmatpush1.bf16.msra.mxu0 %v6830_v61  ;;  %1519 = vmatpush1.bf16.msra.mxu1 %v6831_v59  ;;  %v6841_v61 = vld [vmem:[#allocation45_spill] sm:$0xff] }
 0x21a   :  { %1479 = vmatprep.subr.bf16.mxu0 %v6832_v15  ;;  %1520 = vmatprep.subr.bf16.mxu1 %v6833_v16  ;;  %v1185_v59 = vld [vmem:[#allocation2 + $0x1] ss:$8 sm:$0xf] }
 0x21b   :  { %v6842_v15 = vld [vmem:[#allocation47_spill] sm:$0xff]  ;;  %v1202_v50 = vrot.slane %v1185_v59, %v5500_v13 }
 0x21c   :  { %v1190_v14 = vrot.slane %v1185_v59, %v6842_v15 }
 0x21d   :  { %1480 = vmatpush1.bf16.msra.mxu0 %v6834_v17  ;;  %1521 = vmatpush1.bf16.msra.mxu1 %v6835_v8  ;;  %v1194_v8 = vrot.slane %v1185_v59, %v5498_v11 }
 0x21e   :  { %1481 = vmatprep.subr.bf16.mxu0 %v6836_v3  ;;  %1522 = vmatprep.subr.bf16.mxu1 %v6837_v5 }
 0x221   :  { %1482 = vmatpush1.bf16.msra.mxu0 %v6838_v62  ;;  %1523 = vmatpush1.bf16.msra.mxu1 %v6839_v63 }
 0x222   :  { %1597 = vmatprep.subr.bf16.mxu0 %v6840_v2  ;;  %1638 = vmatprep.subr.bf16.mxu1 %v6841_v61  ;;  %v1198_v61 = vrot.slane %v1185_v59, %v5493_v9 }
 0x2a4   :  { %v1241_v16 = vpop.f32.mrf.mxu0  ;;  %v1282_v57 = vpop.f32.mrf.mxu1 }
 0x2a5   :  { %v1242_v17 = vadd.f32 %v1241_v16, %v1190_v14  ;;  %v1283_v10 = vadd.f32 %v1282_v57, %v1198_v61 }
 0x2a6   :  { %v1243_v58 = vpop.f32.mrf.mxu0  ;;  %v1284_v3 = vpop.f32.mrf.mxu1 }
 0x2a7   :  { %v4241_v6 = vmul.f32 -1.442695, %v1242_v17  ;;  %v1244_v5 = vadd.f32 %v1243_v58, %v1194_v8  ;;  %v4243_v7 = vmul.f32 -1.442695, %v1283_v10  ;;  %v1285_v16 = vadd.f32 %v1284_v3, %v1202_v50 }
 0x2a8   :  { %v1245_v1 = vpop.f32.mrf.mxu0  ;;  %v1286_v62 = vpop.f32.mrf.mxu1 }
 0x2a9   :  { %4498 = vpow2.f32 %v4241_v6  ;;  %v4242_v63 = vmul.f32 -1.442695, %v1244_v5  ;;  %v1315_v1 = vld [vmem:[#allocation3 + $0x1] ss:$8 sm:$0xf] }
 0x2aa   :  { %v1246_v60 = vpop.f32.mrf.mxu0  ;;  %v1287_v2 = vpop.f32.mrf.mxu1  ;;  %v1324_v10 = vrot.slane %v1315_v1, %v5498_v11 }
 0x2ab   :  { %4500 = vpow2.f32 %v4242_v63  ;;  %v1320_v60 = vrot.slane %v1315_v1, %v6842_v15 }
 0x2ac   :  { %4502 = vpow2.f32 %v4243_v7 }
 0x2b6   :  { %v4499_v14 = vpop.eup %4498 }
 0x2b7   :  { %v1298_v49 = vadd.f32 1.0, %v4499_v14 }
 0x2b8   :  { %v4501_v4 = vpop.eup %4500 }
 0x2b9   :  { %4504 = vrcp.f32 %v1298_v49  ;;  %v1299_v58 = vadd.f32 1.0, %v4501_v4  ;;  %v4503_v17 = vpop.eup %4502 }
 0x2ba   :  { %4506 = vtanh.f32 %v1285_v16  ;;  %v1300_v49 = vadd.f32 1.0, %v4503_v17  ;;  %v1332_v17 = vrot.slane %v1315_v1, %v5500_v13 }
 0x2bb   :  { %4508 = vrcp.f32 %v1299_v58 }
 0x2c4   :  { %v1371_v6 = vpop.f32.mrf.mxu0  ;;  %v1412_v2 = vpop.f32.mrf.mxu1 }
 0x2c5   :  { %v1372_v8 = vadd.f32 %v1371_v6, %v1320_v60  ;;  %v1328_v6 = vrot.slane %v1315_v1, %v5493_v9 }
 0x2c6   :  { %v4505_v57 = vpop.eup %4504  ;;  %v1373_v61 = vpop.f32.mrf.mxu0 }
 0x2c7   :  { %v1414_v59 = vpop.f32.mrf.mxu1  ;;  %v4507_v50 = vpop.eup %4506  ;;  %v4244_v3 = vmul.f32 -1.442695, %v1372_v8  ;;  %v1374_v5 = vadd.f32 %v1373_v61, %v1324_v10  ;;  %v1413_v8 = vadd.f32 %v1412_v2, %v1328_v6 }
 0x2c8   :  { %v4509_v7 = vpop.eup %4508  ;;  %v1375_v4 = vpop.f32.mrf.mxu0  ;;  %v1309_v14 = vmul.f32 %v4507_v50, %v4505_v57 }
 0x2c9   :  { %v1416_v62 = vpop.f32.mrf.mxu1  ;;  %v1308_v63 = vmul.f32 %v4509_v7, %v5519_v55  ;;  %4510 = vpow2.f32 %v4244_v3  ;;  %v4245_v16 = vmul.f32 -1.442695, %v1374_v5  ;;  %v4246_v10 = vmul.f32 -1.442695, %v1413_v8 }
 0x2ca   :  { %v1376_v58 = vpop.f32.mrf.mxu0  ;;  %v1415_v4 = vadd.f32 %v1414_v59, %v1332_v17  ;;  %v6867_v62 = vld [vmem:[#allocation47_spill] sm:$0xff] }
 0x2cb   :  { %v1417_v15 = vpop.f32.mrf.mxu1  ;;  %v5602_v60 = vadd.f32 %v1309_v14, %v1308_v63  ;;  %4512 = vpow2.f32 %v4245_v16 }
 0x2cc   :  { %4514 = vrcp.f32 %v1300_v49  ;;  %v1445_v49 = vld [vmem:[#allocation2 + $0x2] ss:$8 sm:$0xf] }
 0x2cd   :  { %4516 = vtanh.f32 %v5602_v60  ;;  %v1450_v63 = vrot.slane %v1445_v49, %v6867_v62  ;;  %v1454_v6 = vrot.slane %v1445_v49, %v5498_v11 }
 0x2ce   :  { %4518 = vpow2.f32 %v4246_v10 }
 0x2d6   :  { %v4511_v61 = vpop.eup %4510 }
 0x2d7   :  { %v1428_v55 = vadd.f32 1.0, %v4511_v61 }
 0x2d8   :  { %v4513_v57 = vpop.eup %4512 }
 0x2d9   :  { %v4515_v50 = vpop.eup %4514  ;;  %4520 = vrcp.f32 %v1428_v55  ;;  %v1429_v15 = vadd.f32 1.0, %v4513_v57 }
 0x2da   :  { %v4517_v3 = vpop.eup %4516  ;;  %4522 = vtanh.f32 %v1415_v4 }
 0x2db   :  { %4524 = vrcp.f32 %v1429_v15  ;;  %v1312_v5 = vmul.f32 %v4517_v3, %v4515_v50  ;;  %v4519_v1 = vpop.eup %4518  ;;  %v1458_v3 = vrot.slane %v1445_v49, %v5493_v9 }
 0x2dc   :  { %v1430_v59 = vadd.f32 1.0, %v4519_v1  ;;  %v1462_v1 = vrot.slane %v1445_v49, %v5500_v13 }
 0x2dd   :  { %v1443_v7 = vpack.c.bf16 %v1312_v5, %v1312_v5 }
 0x2de   :  { %4526 = vrcp.f32 %v1430_v59 }
 0x2df   :  { %1500 = vmatmul.mubr.bf16.vlgmr.msra.gmra.mxu0 %v1443_v7  ;;  %1541 = vmatmul.mubr.bf16.vlgmr.msra.gmra.mxu1 %v1443_v7 }
 0x2e0   :  { %1598 = vmatpush1.bf16.msra.mxu0 %v5356_v18  ;;  %1639 = vmatpush1.bf16.msra.mxu1 %v5358_v19 }
 0x2e1   :  { %1599 = vmatprep.subr.bf16.mxu0 %v5362_v20  ;;  %1640 = vmatprep.subr.bf16.mxu1 %v5364_v21 }
 0x2e2   :  { %1629 = vmatprep.mubr.bf16.mxu0 %v6812_v42  ;;  %1670 = vmatprep.mubr.bf16.mxu1 %v6812_v42 }
 0x2e4   :  { %1600 = vmatpush1.bf16.msra.mxu0 %v5370_v23  ;;  %1641 = vmatpush1.bf16.msra.mxu1 %v5372_v24 }
 0x2e5   :  { %1601 = vmatprep.subr.bf16.mxu0 %v5376_v25  ;;  %1642 = vmatprep.subr.bf16.mxu1 %v5378_v26 }
 0x2e6   :  { %v4521_v18 = vpop.eup %4520 }
 0x2e7   :  { %v4523_v2 = vpop.eup %4522 }
 0x2e8   :  { %v4525_v19 = vpop.eup %4524  ;;  %1602 = vmatpush1.bf16.msra.mxu0 %v5384_v27  ;;  %1643 = vmatpush1.bf16.msra.mxu1 %v5386_v28  ;;  %v1439_v21 = vmul.f32 %v4523_v2, %v4521_v18  ;;  %v5643_v28 = vld [vmem:[#allocation9 + $0xe4] ss:$16 sps:$4 sm:$0xff]  }
 0x2e9   :  { %v1438_v20 = vmul.f32 %v4525_v19, %v5538_v12  ;;  %1603 = vmatprep.subr.bf16.mxu0 %v5390_v29  ;;  %1644 = vmatprep.subr.bf16.mxu1 %v5392_v30  ;;  %v5646_v29 = vld [vmem:[#allocation9 + $0xec] ss:$16 sps:$4 sm:$0xff]   ;;  %v5649_v30 = vld [vmem:[#allocation9 + $0xe0] ss:$16 sps:$4 sm:$0xff]   ;;  %v6863_v12 = vld [vmem:[#allocation42_spill] sm:$0xff] }
 0x2eb   :  { %v5622_v23 = vadd.f32 %v1439_v21, %v1438_v20  ;;  %v4527_v24 = vpop.eup %4526  ;;  %v1575_v21 = vld [vmem:[#allocation3 + $0x2] ss:$8 sm:$0xf] }
 0x2ec   :  { %1604 = vmatpush1.bf16.msra.mxu0 %v5396_v31  ;;  %1645 = vmatpush1.bf16.msra.mxu1 %v5398_v32  ;;  %v5652_v31 = vld [vmem:[#allocation9 + $0xe8] ss:$16 sps:$4 sm:$0xff]  }
 0x2ed   :  { %4528 = vtanh.f32 %v5622_v23  ;;  %1605 = vmatprep.subr.bf16.mxu0 %v5402_v33  ;;  %1646 = vmatprep.subr.bf16.mxu1 %v5404_v34  ;;  %v6845_v32 = vld [vmem:[#allocation24_spill] sm:$0xff]  ;;  %v6848_v33 = vld [vmem:[#allocation27_spill] sm:$0xff] }
 0x2ee   :  { %v6849_v34 = vld [vmem:[#allocation28_spill] sm:$0xff] }
 0x2f0   :  { %1606 = vmatpush1.bf16.msra.mxu0 %v5408_v35  ;;  %1647 = vmatpush1.bf16.msra.mxu1 %v5410_v36  ;;  %v6852_v35 = vld [vmem:[#allocation31_spill] sm:$0xff]  ;;  %v6853_v36 = vld [vmem:[#allocation32_spill] sm:$0xff] }
 0x2f1   :  { %1607 = vmatprep.subr.bf16.mxu0 %v5414_v37  ;;  %1648 = vmatprep.subr.bf16.mxu1 %v5416_v38  ;;  %v6854_v37 = vld [vmem:[#allocation33_spill] sm:$0xff]  ;;  %v6855_v38 = vld [vmem:[#allocation34_spill] sm:$0xff] }
 0x2f4   :  { %1608 = vmatpush1.bf16.msra.mxu0 %v5420_v39  ;;  %1649 = vmatpush1.bf16.msra.mxu1 %v5422_v40  ;;  %v6856_v39 = vld [vmem:[#allocation35_spill] sm:$0xff]  ;;  %v6857_v40 = vld [vmem:[#allocation36_spill] sm:$0xff] }
 0x2f5   :  { %1609 = vmatprep.subr.bf16.mxu0 %v5426_v41  ;;  %1650 = vmatprep.subr.bf16.mxu1 %v6815_v56  ;;  %v6858_v41 = vld [vmem:[#allocation37_spill] sm:$0xff]  ;;  %v6864_v56 = vld [vmem:[#allocation43_spill] sm:$0xff] }
 0x2f8   :  { %1610 = vmatpush1.bf16.msra.mxu0 %v5432_v43  ;;  %1651 = vmatpush1.bf16.msra.mxu1 %v5434_v44  ;;  %v6859_v43 = vld [vmem:[#allocation38_spill] sm:$0xff]  ;;  %v6860_v44 = vld [vmem:[#allocation39_spill] sm:$0xff] }
 0x2f9   :  { %1611 = vmatprep.subr.bf16.mxu0 %v5438_v45  ;;  %1652 = vmatprep.subr.bf16.mxu1 %v5440_v48  ;;  %v6861_v45 = vld [vmem:[#allocation40_spill] sm:$0xff]  ;;  %v6862_v48 = vld [vmem:[#allocation41_spill] sm:$0xff] }
 0x2fa   :  { %v4529_v25 = vpop.eup %4528 }
 0x2fb   :  { %v1442_v26 = vmul.f32 %v4529_v25, %v4527_v24  ;;  %v1580_v24 = vrot.slane %v1575_v21, %v6867_v62 }
 0x2fc   :  { %1612 = vmatpush1.bf16.msra.mxu0 %v5444_v22  ;;  %1653 = vmatpush1.bf16.msra.mxu1 %v5446_v0  ;;  %v6843_v0 = vld [vmem:[#allocation22_spill] sm:$0xff]  ;;  %v6844_v22 = vld [vmem:[#allocation23_spill] sm:$0xff] }
 0x2fd   :  { %v1573_v27 = vpack.c.bf16 %v1442_v26, %v1442_v26  ;;  %1727 = vmatprep.subr.bf16.mxu0 %v5643_v28  ;;  %1768 = vmatprep.subr.bf16.mxu1 %v5646_v29 }
 0x2ff   :  { %1630 = vmatmul.mubr.bf16.vlgmr.msra.gmra.mxu0 %v1573_v27  ;;  %1671 = vmatmul.mubr.bf16.vlgmr.msra.gmra.mxu1 %v1573_v27 }
 0x300   :  { %1728 = vmatpush1.bf16.msra.mxu0 %v5649_v30  ;;  %1769 = vmatpush1.bf16.msra.mxu1 %v5652_v31 }
 0x301   :  { %1729 = vmatprep.subr.bf16.mxu0 %v5262_v51  ;;  %1770 = vmatprep.subr.bf16.mxu1 %v5264_v52  ;;  %v6846_v51 = vld [vmem:[#allocation25_spill] sm:$0xff]  ;;  %v6847_v52 = vld [vmem:[#allocation26_spill] sm:$0xff] }
 0x302   :  { %1759 = vmatprep.mubr.bf16.mxu0 %v6812_v42  ;;  %1800 = vmatprep.mubr.bf16.mxu1 %v6812_v42 }
 0x304   :  { %1730 = vmatpush1.bf16.msra.mxu0 %v5270_v53  ;;  %1771 = vmatpush1.bf16.msra.mxu1 %v5272_v54  ;;  %v6850_v53 = vld [vmem:[#allocation29_spill] sm:$0xff]  ;;  %v6851_v54 = vld [vmem:[#allocation30_spill] sm:$0xff] }
 0x305   :  { %1731 = vmatprep.subr.bf16.mxu0 %v6816_v46  ;;  %1772 = vmatprep.subr.bf16.mxu1 %v6817_v47  ;;  %v6865_v46 = vld [vmem:[#allocation44_spill] sm:$0xff]  ;;  %v6866_v47 = vld [vmem:[#allocation45_spill] sm:$0xff] }
 0x308   :  { %1732 = vmatpush1.bf16.msra.mxu0 %v6843_v0  ;;  %1773 = vmatpush1.bf16.msra.mxu1 %v6844_v22  ;;  %v1584_v22 = vrot.slane %v1575_v21, %v5498_v11 }
 0x309   :  { %1733 = vmatprep.subr.bf16.mxu0 %v6845_v32  ;;  %1774 = vmatprep.subr.bf16.mxu1 %v6846_v51 }
 0x30c   :  { %1734 = vmatpush1.bf16.msra.mxu0 %v6847_v52  ;;  %1775 = vmatpush1.bf16.msra.mxu1 %v6848_v33 }
 0x30d   :  { %1735 = vmatprep.subr.bf16.mxu0 %v6849_v34  ;;  %1776 = vmatprep.subr.bf16.mxu1 %v6850_v53 }
 0x310   :  { %1736 = vmatpush1.bf16.msra.mxu0 %v6851_v54  ;;  %1777 = vmatpush1.bf16.msra.mxu1 %v6852_v35 }
 0x311   :  { %1737 = vmatprep.subr.bf16.mxu0 %v6853_v36  ;;  %1778 = vmatprep.subr.bf16.mxu1 %v6854_v37 }
 0x314   :  { %1738 = vmatpush1.bf16.msra.mxu0 %v6855_v38  ;;  %1779 = vmatpush1.bf16.msra.mxu1 %v6856_v39 }
 0x315   :  { %1739 = vmatprep.subr.bf16.mxu0 %v6857_v40  ;;  %1780 = vmatprep.subr.bf16.mxu1 %v6858_v41 }
 0x318   :  { %1740 = vmatpush1.bf16.msra.mxu0 %v6859_v43  ;;  %1781 = vmatpush1.bf16.msra.mxu1 %v6860_v44 }
 0x319   :  { %1741 = vmatprep.subr.bf16.mxu0 %v6861_v45  ;;  %1782 = vmatprep.subr.bf16.mxu1 %v6862_v48  ;;  %v1588_v45 = vrot.slane %v1575_v21, %v5493_v9 }
 0x31c   :  { %1742 = vmatpush1.bf16.msra.mxu0 %v6863_v12  ;;  %1783 = vmatpush1.bf16.msra.mxu1 %v6864_v56  ;;  %v1592_v56 = vrot.slane %v1575_v21, %v5500_v13  ;;  %v5735_v21 = vld [vmem:[#allocation10 + $0x8c] ss:$16 sps:$4 sm:$0xff]  }
 0x31d   :  { %1857 = vmatprep.subr.bf16.mxu0 %v6865_v46  ;;  %1898 = vmatprep.subr.bf16.mxu1 %v6866_v47 }
 0x39f   :  { %v1501_v14 = vpop.f32.mrf.mxu0  ;;  %v1542_v16 = vpop.f32.mrf.mxu1 }
 0x3a0   :  { %v1502_v58 = vadd.f32 %v1501_v14, %v1450_v63  ;;  %v1543_v5 = vadd.f32 %v1542_v16, %v1458_v3 }
 0x3a1   :  { %v1503_v8 = vpop.f32.mrf.mxu0  ;;  %v1544_v10 = vpop.f32.mrf.mxu1 }
 0x3a2   :  { %v4247_v17 = vmul.f32 -1.442695, %v1502_v58  ;;  %v1504_v61 = vadd.f32 %v1503_v8, %v1454_v6  ;;  %v4249_v7 = vmul.f32 -1.442695, %v1543_v5  ;;  %v1545_v2 = vadd.f32 %v1544_v10, %v1462_v1  ;;  %v5699_v8 = vld [vmem:[#allocation10 + $0xe0] ss:$16 sps:$4 sm:$0xff]  }
 0x3a3   :  { %v1505_v4 = vpop.f32.mrf.mxu0  ;;  %v1546_v55 = vpop.f32.mrf.mxu1  ;;  %v5702_v10 = vld [vmem:[#allocation10 + $0xe8] ss:$16 sps:$4 sm:$0xff]  }
 0x3a4   :  { %4530 = vpow2.f32 %v4247_v17  ;;  %v4248_v57 = vmul.f32 -1.442695, %v1504_v61  ;;  %v5705_v17 = vld [vmem:[#allocation10 + $0xc4] ss:$16 sps:$4 sm:$0xff]   ;;  %v5708_v61 = vld [vmem:[#allocation10 + $0xcc] ss:$16 sps:$4 sm:$0xff]  }
 0x3a5   :  { %v1506_v50 = vpop.f32.mrf.mxu0  ;;  %v1547_v15 = vpop.f32.mrf.mxu1  ;;  %v5713_v4 = vld [vmem:[#allocation10 + $0xc0] ss:$16 sps:$4 sm:$0xff]   ;;  %v5716_v55 = vld [vmem:[#allocation10 + $0xc8] ss:$16 sps:$4 sm:$0xff]  }
 0x3a6   :  { %4532 = vpow2.f32 %v4248_v57  ;;  %v5719_v50 = vld [vmem:[#allocation10 + $0xa4] ss:$16 sps:$4 sm:$0xff]   ;;  %v5722_v15 = vld [vmem:[#allocation10 + $0xac] ss:$16 sps:$4 sm:$0xff]  }
 0x3a7   :  { %4534 = vpow2.f32 %v4249_v7 }
 0x3b1   :  { %v4531_v18 = vpop.eup %4530 }
 0x3b2   :  { %v1558_v19 = vadd.f32 1.0, %v4531_v18  ;;  %v5725_v18 = vld [vmem:[#allocation10 + $0xa0] ss:$16 sps:$4 sm:$0xff]  }
 0x3b3   :  { %v4533_v59 = vpop.eup %4532 }
 0x3b4   :  { %4536 = vrcp.f32 %v1558_v19  ;;  %v1559_v20 = vadd.f32 1.0, %v4533_v59  ;;  %v4535_v27 = vpop.eup %4534 }
 0x3b5   :  { %4538 = vtanh.f32 %v1545_v2  ;;  %v1560_v35 = vadd.f32 1.0, %v4535_v27  ;;  %v5728_v2 = vld [vmem:[#allocation10 + $0xa8] ss:$16 sps:$4 sm:$0xff]   ;;  %v5750_v27 = vld [vmem:[#allocation10 + $0x6c] ss:$16 sps:$4 sm:$0xff]  }
 0x3b6   :  { %4540 = vrcp.f32 %v1559_v20  ;;  %v5732_v20 = vld [vmem:[#allocation10 + $0x84] ss:$16 sps:$4 sm:$0xff]  }
 0x3bf   :  { %v1631_v25 = vpop.f32.mrf.mxu0  ;;  %v1672_v26 = vpop.f32.mrf.mxu1 }
 0x3c0   :  { %v1632_v0 = vadd.f32 %v1631_v25, %v1580_v24  ;;  %v1673_v48 = vadd.f32 %v1672_v26, %v1588_v45  ;;  %v5740_v25 = vld [vmem:[#allocation10 + $0x80] ss:$16 sps:$4 sm:$0xff]   ;;  %v5743_v26 = vld [vmem:[#allocation10 + $0x88] ss:$16 sps:$4 sm:$0xff]  }
 0x3c1   :  { %v4537_v32 = vpop.eup %4536  ;;  %v1633_v51 = vpop.f32.mrf.mxu0 }
 0x3c2   :  { %v1674_v52 = vpop.f32.mrf.mxu1  ;;  %v4539_v33 = vpop.eup %4538  ;;  %v4250_v34 = vmul.f32 -1.442695, %v1632_v0  ;;  %v1634_v53 = vadd.f32 %v1633_v51, %v1584_v22  ;;  %v4252_v12 = vmul.f32 -1.442695, %v1673_v48  ;;  %v5753_v0 = vld [vmem:[#allocation10 + $0x60] ss:$16 sps:$4 sm:$0xff]  }
 0x3c3   :  { %v4541_v54 = vpop.eup %4540  ;;  %v1635_v36 = vpop.f32.mrf.mxu0  ;;  %v1569_v39 = vmul.f32 %v4539_v33, %v4537_v32  ;;  %v1675_v47 = vadd.f32 %v1674_v52, %v1592_v56  ;;  %v5756_v22 = vld [vmem:[#allocation10 + $0x68] ss:$16 sps:$4 sm:$0xff]   ;;  %v5759_v32 = vld [vmem:[#allocation10 + $0x44] ss:$16 sps:$4 sm:$0xff]   ;;  %v5762_v51 = vld [vmem:[#allocation10 + $0x4c] ss:$16 sps:$4 sm:$0xff]  }
 0x3c4   :  { %v1676_v37 = vpop.f32.mrf.mxu1  ;;  %v1568_v38 = vmul.f32 %v4541_v54, %v5602_v60  ;;  %4542 = vpow2.f32 %v4250_v34  ;;  %v4251_v40 = vmul.f32 -1.442695, %v1634_v53  ;;  %v5765_v52 = vld [vmem:[#allocation10 + $0x40] ss:$16 sps:$4 sm:$0xff]   ;;  %v5768_v33 = vld [vmem:[#allocation10 + $0x48] ss:$16 sps:$4 sm:$0xff]  }
 0x3c5   :  { %v1636_v41 = vpop.f32.mrf.mxu0  ;;  %v5771_v34 = vld [vmem:[#allocation10 + $0x24] ss:$16 sps:$4 sm:$0xff]   ;;  %v5774_v53 = vld [vmem:[#allocation10 + $0x2c] ss:$16 sps:$4 sm:$0xff]   ;;  %v5777_v54 = vld [vmem:[#allocation10 + $0x20] ss:$16 sps:$4 sm:$0xff]  }
 0x3c6   :  { %v1677_v43 = vpop.f32.mrf.mxu1  ;;  %v5694_v44 = vadd.f32 %v1569_v39, %v1568_v38  ;;  %4544 = vpow2.f32 %v4251_v40  ;;  %v5783_v37 = vld [vmem:[#allocation10 + $0x4] ss:$16 sps:$4 sm:$0xff]   ;;  %v5786_v38 = vld [vmem:[#allocation10 + $0xc] ss:$16 sps:$4 sm:$0xff]   ;;  %v5789_v41 = vld [vmem:[#allocation10] ss:$16 sps:$4 sm:$0xff]  }
 0x3c7   :  { %4546 = vrcp.f32 %v1560_v35  ;;  %v5780_v35 = vld [vmem:[#allocation10 + $0x28] ss:$16 sps:$4 sm:$0xff]   ;;  %v5799_v48 = vld [vmem:[#allocation9 + $0xc4] ss:$16 sps:$4 sm:$0xff]   ;;  %v5807_v56 = vld [vmem:[#allocation9 + $0xc0] ss:$16 sps:$4 sm:$0xff]  }
 0x3c8   :  { %4548 = vtanh.f32 %v5694_v44  ;;  %v5792_v43 = vld [vmem:[#allocation10 + $0x8] ss:$16 sps:$4 sm:$0xff]   ;;  %6868 = vst [vmem:[#allocation46_spill] sm:$0xff] %v5807_v56 }
 0x3c9   :  { %4550 = vpow2.f32 %v4252_v12  ;;  %v5802_v12 = vld [vmem:[#allocation9 + $0xcc] ss:$16 sps:$4 sm:$0xff]  }
 0x3d1   :  { %v4543_v46 = vpop.eup %4542 }
 0x3d2   :  { %v1688_v60 = vadd.f32 1.0, %v4543_v46  ;;  %v5810_v46 = vld [vmem:[#allocation9 + $0xc8] ss:$16 sps:$4 sm:$0xff]  }
 0x3d3   :  { %v4545_v49 = vpop.eup %4544  ;;  %6869 = vst [vmem:[#allocation20_spill] sm:$0xff] %v5810_v46 }
 0x3d4   :  { %v4547_v63 = vpop.eup %4546  ;;  %4552 = vrcp.f32 %v1688_v60  ;;  %v1689_v14 = vadd.f32 1.0, %v4545_v49  ;;  %v5816_v60 = vld [vmem:[#allocation9 + $0xac] ss:$16 sps:$4 sm:$0xff]   ;;  %v5819_v49 = vld [vmem:[#allocation9 + $0xa0] ss:$16 sps:$4 sm:$0xff]  }
 0x3d5   :  { %v4549_v16 = vpop.eup %4548  ;;  %4554 = vtanh.f32 %v1675_v47  ;;  %v5813_v47 = vld [vmem:[#allocation9 + $0xa4] ss:$16 sps:$4 sm:$0xff]   ;;  %6871 = vst [vmem:[#allocation22_spill] sm:$0xff] %v5816_v60  ;;  %6872 = vst [vmem:[#allocation23_spill] sm:$0xff] %v5819_v49 }
 0x3d6   :  { %4556 = vrcp.f32 %v1689_v14  ;;  %v1572_v58 = vmul.f32 %v4549_v16, %v4547_v63  ;;  %v4551_v57 = vpop.eup %4550  ;;  %6870 = vst [vmem:[#allocation21_spill] sm:$0xff] %v5813_v47  ;;  %v5822_v63 = vld [vmem:[#allocation9 + $0xa8] ss:$16 sps:$4 sm:$0xff]   ;;  %v5825_v14 = vld [vmem:[#allocation9 + $0x84] ss:$16 sps:$4 sm:$0xff]  }
 0x3d7   :  { %v1690_v1 = vadd.f32 1.0, %v4551_v57  ;;  %6873 = vst [vmem:[#allocation24_spill] sm:$0xff] %v5822_v63  ;;  %6874 = vst [vmem:[#allocation25_spill] sm:$0xff] %v5825_v14  ;;  %v5828_v16 = vld [vmem:[#allocation9 + $0x8c] ss:$16 sps:$4 sm:$0xff]  }
 0x3d8   :  { %v1703_v6 = vpack.c.bf16 %v1572_v58, %v1572_v58  ;;  %6875 = vst [vmem:[#allocation26_spill] sm:$0xff] %v5828_v16  ;;  %v5831_v58 = vld [vmem:[#allocation9 + $0x80] ss:$16 sps:$4 sm:$0xff]   ;;  %v5837_v57 = vld [vmem:[#allocation9 + $0x64] ss:$16 sps:$4 sm:$0xff]  }
 0x3d9   :  { %4558 = vrcp.f32 %v1690_v1  ;;  %6876 = vst [vmem:[#allocation27_spill] sm:$0xff] %v5831_v58  ;;  %6878 = vst [vmem:[#allocation29_spill] sm:$0xff] %v5837_v57  ;;  %v5849_v1 = vld [vmem:[#allocation9 + $0x44] ss:$16 sps:$4 sm:$0xff]  }
 0x3da   :  { %1760 = vmatmul.mubr.bf16.vlgmr.msra.gmra.mxu0 %v1703_v6  ;;  %1801 = vmatmul.mubr.bf16.vlgmr.msra.gmra.mxu1 %v1703_v6  ;;  %v5834_v6 = vld [vmem:[#allocation9 + $0x88] ss:$16 sps:$4 sm:$0xff]   ;;  %6882 = vst [vmem:[#allocation33_spill] sm:$0xff] %v5849_v1 }
 0x3db   :  { %1858 = vmatpush1.bf16.msra.mxu0 %v5699_v8  ;;  %1899 = vmatpush1.bf16.msra.mxu1 %v5702_v10  ;;  %6877 = vst [vmem:[#allocation28_spill] sm:$0xff] %v5834_v6 }
 0x3dc   :  { %1859 = vmatprep.subr.bf16.mxu0 %v5705_v17  ;;  %1900 = vmatprep.subr.bf16.mxu1 %v5708_v61 }
 0x3dd   :  { %1889 = vmatprep.mubr.bf16.mxu0 %v6812_v42  ;;  %1930 = vmatprep.mubr.bf16.mxu1 %v6812_v42 }
 0x3df   :  { %1860 = vmatpush1.bf16.msra.mxu0 %v5713_v4  ;;  %1901 = vmatpush1.bf16.msra.mxu1 %v5716_v55 }
 0x3e0   :  { %1861 = vmatprep.subr.bf16.mxu0 %v5719_v50  ;;  %1902 = vmatprep.subr.bf16.mxu1 %v5722_v15 }
 0x3e1   :  { %v4553_v3 = vpop.eup %4552 }
 0x3e2   :  { %v4555_v5 = vpop.eup %4554 }
 0x3e3   :  { %v4557_v7 = vpop.eup %4556  ;;  %1862 = vmatpush1.bf16.msra.mxu0 %v5725_v18  ;;  %1903 = vmatpush1.bf16.msra.mxu1 %v5728_v2  ;;  %v1699_v59 = vmul.f32 %v4555_v5, %v4553_v3  ;;  %v5840_v3 = vld [vmem:[#allocation9 + $0x6c] ss:$16 sps:$4 sm:$0xff]   ;;  %v5843_v5 = vld [vmem:[#allocation9 + $0x60] ss:$16 sps:$4 sm:$0xff]  }
 0x3e4   :  { %v1698_v19 = vmul.f32 %v4557_v7, %v5622_v23  ;;  %1863 = vmatprep.subr.bf16.mxu0 %v5732_v20  ;;  %1904 = vmatprep.subr.bf16.mxu1 %v5735_v21  ;;  %v5747_v23 = vld [vmem:[#allocation10 + $0x64] ss:$16 sps:$4 sm:$0xff]   ;;  %6879 = vst [vmem:[#allocation30_spill] sm:$0xff] %v5840_v3  ;;  %6880 = vst [vmem:[#allocation31_spill] sm:$0xff] %v5843_v5  ;;  %v5846_v7 = vld [vmem:[#allocation9 + $0x68] ss:$16 sps:$4 sm:$0xff]  }
 0x3e5   :  { %6881 = vst [vmem:[#allocation32_spill] sm:$0xff] %v5846_v7 }
 0x3e6   :  { %v5738_v24 = vadd.f32 %v1699_v59, %v1698_v19  ;;  %v4559_v36 = vpop.eup %4558  ;;  %v5852_v19 = vld [vmem:[#allocation9 + $0x4c] ss:$16 sps:$4 sm:$0xff]   ;;  %v5855_v59 = vld [vmem:[#allocation9 + $0x40] ss:$16 sps:$4 sm:$0xff]  }
 0x3e7   :  { %1864 = vmatpush1.bf16.msra.mxu0 %v5740_v25  ;;  %1905 = vmatpush1.bf16.msra.mxu1 %v5743_v26  ;;  %6883 = vst [vmem:[#allocation34_spill] sm:$0xff] %v5852_v19  ;;  %6884 = vst [vmem:[#allocation35_spill] sm:$0xff] %v5855_v59 }
 0x3e8   :  { %4560 = vtanh.f32 %v5738_v24  ;;  %1865 = vmatprep.subr.bf16.mxu0 %v5747_v23  ;;  %1906 = vmatprep.subr.bf16.mxu1 %v5750_v27 }
 0x3eb   :  { %1866 = vmatpush1.bf16.msra.mxu0 %v5753_v0  ;;  %1907 = vmatpush1.bf16.msra.mxu1 %v5756_v22 }
 0x3ec   :  { %1867 = vmatprep.subr.bf16.mxu0 %v5759_v32  ;;  %1908 = vmatprep.subr.bf16.mxu1 %v5762_v51 }
 0x3ef   :  { %1868 = vmatpush1.bf16.msra.mxu0 %v5765_v52  ;;  %1909 = vmatpush1.bf16.msra.mxu1 %v5768_v33 }
 0x3f0   :  { %1869 = vmatprep.subr.bf16.mxu0 %v5771_v34  ;;  %1910 = vmatprep.subr.bf16.mxu1 %v5774_v53 }
 0x3f3   :  { %1870 = vmatpush1.bf16.msra.mxu0 %v5777_v54  ;;  %1911 = vmatpush1.bf16.msra.mxu1 %v5780_v35 }
 0x3f4   :  { %1871 = vmatprep.subr.bf16.mxu0 %v5783_v37  ;;  %1912 = vmatprep.subr.bf16.mxu1 %v5786_v38 }
 0x3f5   :  { %v4561_v39 = vpop.eup %4560 }
 0x3f6   :  { %v1702_v40 = vmul.f32 %v4561_v39, %v4559_v36  ;;  %v5858_v36 = vld [vmem:[#allocation9 + $0x48] ss:$16 sps:$4 sm:$0xff]   ;;  %v5861_v39 = vld [vmem:[#allocation9 + $0x24] ss:$16 sps:$4 sm:$0xff]  }
 0x3f7   :  { %1872 = vmatpush1.bf16.msra.mxu0 %v5789_v41  ;;  %1913 = vmatpush1.bf16.msra.mxu1 %v5792_v43  ;;  %6885 = vst [vmem:[#allocation36_spill] sm:$0xff] %v5858_v36  ;;  %6886 = vst [vmem:[#allocation37_spill] sm:$0xff] %v5861_v39 }
 0x3f8   :  { %v1833_v45 = vpack.c.bf16 %v1702_v40, %v1702_v40  ;;  %1987 = vmatprep.subr.bf16.mxu0 %v5643_v28  ;;  %2028 = vmatprep.subr.bf16.mxu1 %v5646_v29  ;;  %v5864_v40 = vld [vmem:[#allocation9 + $0x2c] ss:$16 sps:$4 sm:$0xff]  }
 0x3f9   :  { %6887 = vst [vmem:[#allocation38_spill] sm:$0xff] %v5864_v40 }
 0x3fa   :  { %1890 = vmatmul.mubr.bf16.vlgmr.msra.gmra.mxu0 %v1833_v45  ;;  %1931 = vmatmul.mubr.bf16.vlgmr.msra.gmra.mxu1 %v1833_v45  ;;  %v5867_v45 = vld [vmem:[#allocation9 + $0x20] ss:$16 sps:$4 sm:$0xff]  }
 0x3fb   :  { %1988 = vmatpush1.bf16.msra.mxu0 %v5649_v30  ;;  %2029 = vmatpush1.bf16.msra.mxu1 %v5652_v31  ;;  %6888 = vst [vmem:[#allocation39_spill] sm:$0xff] %v5867_v45 }
 0x3fc   :  { %1989 = vmatprep.subr.bf16.mxu0 %v5799_v48  ;;  %2030 = vmatprep.subr.bf16.mxu1 %v5802_v12 }
 0x3fd   :  { %2019 = vmatprep.mubr.bf16.mxu0 %v6812_v42  ;;  %2060 = vmatprep.mubr.bf16.mxu1 %v6812_v42 }
 0x3ff   :  { %1990 = vmatpush1.bf16.msra.mxu0 %v5807_v56  ;;  %2031 = vmatpush1.bf16.msra.mxu1 %v5810_v46 }
 0x400   :  { %1991 = vmatprep.subr.bf16.mxu0 %v5813_v47  ;;  %2032 = vmatprep.subr.bf16.mxu1 %v5816_v60 }
 0x403   :  { %1992 = vmatpush1.bf16.msra.mxu0 %v5819_v49  ;;  %2033 = vmatpush1.bf16.msra.mxu1 %v5822_v63 }
 0x404   :  { %1993 = vmatprep.subr.bf16.mxu0 %v5825_v14  ;;  %2034 = vmatprep.subr.bf16.mxu1 %v5828_v16 }
 0x407   :  { %1994 = vmatpush1.bf16.msra.mxu0 %v5831_v58  ;;  %2035 = vmatpush1.bf16.msra.mxu1 %v5834_v6 }
 0x408   :  { %1995 = vmatprep.subr.bf16.mxu0 %v5837_v57  ;;  %2036 = vmatprep.subr.bf16.mxu1 %v5840_v3 }
 0x40b   :  { %1996 = vmatpush1.bf16.msra.mxu0 %v5843_v5  ;;  %2037 = vmatpush1.bf16.msra.mxu1 %v5846_v7 }
 0x40c   :  { %1997 = vmatprep.subr.bf16.mxu0 %v5849_v1  ;;  %2038 = vmatprep.subr.bf16.mxu1 %v5852_v19  ;;  %v5870_v19 = vld [vmem:[#allocation9 + $0x28] ss:$16 sps:$4 sm:$0xff]  }
 0x40d   :  { %6889 = vst [vmem:[#allocation40_spill] sm:$0xff] %v5870_v19 }
 0x40f   :  { %1998 = vmatpush1.bf16.msra.mxu0 %v5855_v59  ;;  %2039 = vmatpush1.bf16.msra.mxu1 %v5858_v36  ;;  %v5873_v59 = vld [vmem:[#allocation9 + $0x4] ss:$16 sps:$4 sm:$0xff]   ;;  %v5876_v36 = vld [vmem:[#allocation9 + $0xc] ss:$16 sps:$4 sm:$0xff]  }
 0x410   :  { %1999 = vmatprep.subr.bf16.mxu0 %v5861_v39  ;;  %2040 = vmatprep.subr.bf16.mxu1 %v5864_v40  ;;  %6890 = vst [vmem:[#allocation41_spill] sm:$0xff] %v5873_v59  ;;  %6891 = vst [vmem:[#allocation42_spill] sm:$0xff] %v5876_v36  ;;  %v5879_v39 = vld [vmem:[#allocation9] ss:$16 sps:$4 sm:$0xff]   ;;  %v5882_v40 = vld [vmem:[#allocation9 + $0x8] ss:$16 sps:$4 sm:$0xff]  }
 0x411   :  { %6892 = vst [vmem:[#allocation43_spill] sm:$0xff] %v5879_v39  ;;  %6893 = vst [vmem:[#allocation44_spill] sm:$0xff] %v5882_v40 }
 0x413   :  { %2000 = vmatpush1.bf16.msra.mxu0 %v5867_v45  ;;  %2041 = vmatpush1.bf16.msra.mxu1 %v5870_v19  ;;  %v5885_v45 = vld [vmem:[#allocation10 + $0xe4] ss:$16 sps:$4 sm:$0xff]   ;;  %v5888_v19 = vld [vmem:[#allocation10 + $0xec] ss:$16 sps:$4 sm:$0xff]  }
 0x414   :  { %2001 = vmatprep.subr.bf16.mxu0 %v5873_v59  ;;  %2042 = vmatprep.subr.bf16.mxu1 %v5876_v36  ;;  %6894 = vst [vmem:[#allocation45_spill] sm:$0xff] %v5885_v45  ;;  %6895 = vst [vmem:[#allocation48_spill] sm:$0xff] %v5888_v19  ;;  %v1705_v59 = vld [vmem:[#allocation2 + $0x3] ss:$8 sm:$0xf] }
 0x415   :  { %v1710_v1 = vrot.slane %v1705_v59, %v6867_v62  ;;  %v1722_v47 = vrot.slane %v1705_v59, %v5500_v13 }
 0x417   :  { %2002 = vmatpush1.bf16.msra.mxu0 %v5879_v39  ;;  %2043 = vmatpush1.bf16.msra.mxu1 %v5882_v40  ;;  %v1714_v39 = vrot.slane %v1705_v59, %v5498_v11 }
 0x418   :  { %2117 = vmatprep.subr.bf16.mxu0 %v5885_v45  ;;  %2158 = vmatprep.subr.bf16.mxu1 %v5888_v19  ;;  %v1718_v19 = vrot.slane %v1705_v59, %v5493_v9 }
 0x49a   :  { %v1761_v36 = vpop.f32.mrf.mxu0  ;;  %v1802_v7 = vpop.f32.mrf.mxu1 }
 0x49b   :  { %v1762_v5 = vadd.f32 %v1761_v36, %v1710_v1  ;;  %v1803_v49 = vadd.f32 %v1802_v7, %v1718_v19 }
 0x49c   :  { %v1763_v3 = vpop.f32.mrf.mxu0  ;;  %v1804_v57 = vpop.f32.mrf.mxu1 }
 0x49d   :  { %v4253_v6 = vmul.f32 -1.442695, %v1762_v5  ;;  %v1764_v40 = vadd.f32 %v1763_v3, %v1714_v39  ;;  %v4255_v60 = vmul.f32 -1.442695, %v1803_v49  ;;  %v1805_v36 = vadd.f32 %v1804_v57, %v1722_v47 }
 0x49e   :  { %v1765_v58 = vpop.f32.mrf.mxu0  ;;  %v1806_v16 = vpop.f32.mrf.mxu1 }
 0x49f   :  { %4562 = vpow2.f32 %v4253_v6  ;;  %v4254_v45 = vmul.f32 -1.442695, %v1764_v40  ;;  %v1835_v16 = vld [vmem:[#allocation3 + $0x3] ss:$8 sm:$0xf] }
 0x4a0   :  { %v1766_v14 = vpop.f32.mrf.mxu0  ;;  %v1807_v63 = vpop.f32.mrf.mxu1  ;;  %v1844_v49 = vrot.slane %v1835_v16, %v5498_v11 }
 0x4a1   :  { %4564 = vpow2.f32 %v4254_v45  ;;  %v1840_v14 = vrot.slane %v1835_v16, %v6867_v62 }
 0x4a2   :  { %4566 = vpow2.f32 %v4255_v60 }
 0x4ac   :  { %v4563_v1 = vpop.eup %4562 }
 0x4ad   :  { %v1818_v46 = vadd.f32 1.0, %v4563_v1 }
 0x4ae   :  { %v4565_v56 = vpop.eup %4564 }
 0x4af   :  { %4568 = vrcp.f32 %v1818_v46  ;;  %v1819_v3 = vadd.f32 1.0, %v4565_v56  ;;  %v4567_v6 = vpop.eup %4566 }
 0x4b0   :  { %4570 = vtanh.f32 %v1805_v36  ;;  %v1820_v46 = vadd.f32 1.0, %v4567_v6  ;;  %v1852_v6 = vrot.slane %v1835_v16, %v5500_v13 }
 0x4b1   :  { %4572 = vrcp.f32 %v1819_v3 }
 0x4ba   :  { %v1891_v63 = vpop.f32.mrf.mxu0  ;;  %v1932_v58 = vpop.f32.mrf.mxu1 }
 0x4bb   :  { %v1892_v5 = vadd.f32 %v1891_v63, %v1840_v14  ;;  %v1848_v63 = vrot.slane %v1835_v16, %v5493_v9 }
 0x4bc   :  { %v4569_v7 = vpop.eup %4568  ;;  %v1893_v19 = vpop.f32.mrf.mxu0 }
 0x4bd   :  { %v1934_v59 = vpop.f32.mrf.mxu1  ;;  %v4571_v47 = vpop.eup %4570  ;;  %v4256_v57 = vmul.f32 -1.442695, %v1892_v5  ;;  %v1894_v39 = vadd.f32 %v1893_v19, %v1844_v49  ;;  %v1933_v5 = vadd.f32 %v1932_v58, %v1848_v63 }
 0x4be   :  { %v4573_v60 = vpop.eup %4572  ;;  %v1895_v56 = vpop.f32.mrf.mxu0  ;;  %v1829_v1 = vmul.f32 %v4571_v47, %v4569_v7 }
 0x4bf   :  { %v1936_v40 = vpop.f32.mrf.mxu1  ;;  %v1828_v45 = vmul.f32 %v4573_v60, %v5694_v44  ;;  %4574 = vpow2.f32 %v4256_v57  ;;  %v4257_v36 = vmul.f32 -1.442695, %v1894_v39  ;;  %v4258_v49 = vmul.f32 -1.442695, %v1933_v5 }
 0x4c0   :  { %v1896_v3 = vpop.f32.mrf.mxu0  ;;  %v1935_v56 = vadd.f32 %v1934_v59, %v1852_v6  ;;  %v6897_v6 = vld [vmem:[#allocation20_spill] sm:$0xff] }
 0x4c1   :  { %v1937_v62 = vpop.f32.mrf.mxu1  ;;  %v5898_v14 = vadd.f32 %v1829_v1, %v1828_v45  ;;  %4576 = vpow2.f32 %v4257_v36 }
 0x4c2   :  { %4578 = vrcp.f32 %v1820_v46 }
 0x4c3   :  { %4580 = vtanh.f32 %v5898_v14 }
 0x4c4   :  { %4582 = vpow2.f32 %v4258_v49  ;;  %v6896_v49 = vld [vmem:[#allocation46_spill] sm:$0xff] }
 0x4cc   :  { %v4575_v19 = vpop.eup %4574 }
 0x4cd   :  { %v1948_v44 = vadd.f32 1.0, %v4575_v19  ;;  %v6898_v19 = vld [vmem:[#allocation21_spill] sm:$0xff] }
 0x4ce   :  { %v4577_v7 = vpop.eup %4576 }
 0x4cf   :  { %v4579_v47 = vpop.eup %4578  ;;  %4584 = vrcp.f32 %v1948_v44  ;;  %v1949_v62 = vadd.f32 1.0, %v4577_v7  ;;  %v6900_v44 = vld [vmem:[#allocation23_spill] sm:$0xff]  ;;  %v6901_v7 = vld [vmem:[#allocation24_spill] sm:$0xff] }
 0x4d0   :  { %v4581_v57 = vpop.eup %4580  ;;  %4586 = vtanh.f32 %v1935_v56  ;;  %v6899_v56 = vld [vmem:[#allocation22_spill] sm:$0xff] }
 0x4d1   :  { %4588 = vrcp.f32 %v1949_v62  ;;  %v1832_v39 = vmul.f32 %v4581_v57, %v4579_v47  ;;  %v4583_v16 = vpop.eup %4582  ;;  %v6902_v47 = vld [vmem:[#allocation25_spill] sm:$0xff]  ;;  %v6903_v62 = vld [vmem:[#allocation26_spill] sm:$0xff]  ;;  %v6904_v57 = vld [vmem:[#allocation27_spill] sm:$0xff] }
 0x4d2   :  { %v1950_v40 = vadd.f32 1.0, %v4583_v16  ;;  %v6907_v16 = vld [vmem:[#allocation30_spill] sm:$0xff] }
 0x4d3   :  { %v1963_v60 = vpack.c.bf16 %v1832_v39, %v1832_v39  ;;  %v6905_v39 = vld [vmem:[#allocation28_spill] sm:$0xff] }
 0x4d4   :  { %4590 = vrcp.f32 %v1950_v40  ;;  %v6911_v40 = vld [vmem:[#allocation34_spill] sm:$0xff] }
 0x4d5   :  { %2020 = vmatmul.mubr.bf16.vlgmr.msra.gmra.mxu0 %v1963_v60  ;;  %2061 = vmatmul.mubr.bf16.vlgmr.msra.gmra.mxu1 %v1963_v60  ;;  %v6906_v60 = vld [vmem:[#allocation29_spill] sm:$0xff] }
 0x4d6   :  { %2118 = vmatpush1.bf16.msra.mxu0 %v5699_v8  ;;  %2159 = vmatpush1.bf16.msra.mxu1 %v5702_v10 }
 0x4d7   :  { %2119 = vmatprep.subr.bf16.mxu0 %v5705_v17  ;;  %2160 = vmatprep.subr.bf16.mxu1 %v5708_v61 }
 0x4d8   :  { %2149 = vmatprep.mubr.bf16.mxu0 %v6812_v42  ;;  %2190 = vmatprep.mubr.bf16.mxu1 %v6812_v42 }
 0x4da   :  { %2120 = vmatpush1.bf16.msra.mxu0 %v5713_v4  ;;  %2161 = vmatpush1.bf16.msra.mxu1 %v5716_v55 }
 0x4db   :  { %2121 = vmatprep.subr.bf16.mxu0 %v5719_v50  ;;  %2162 = vmatprep.subr.bf16.mxu1 %v5722_v15 }
 0x4dc   :  { %v4585_v58 = vpop.eup %4584 }
 0x4dd   :  { %v4587_v59 = vpop.eup %4586 }
 0x4de   :  { %v4589_v46 = vpop.eup %4588  ;;  %2122 = vmatpush1.bf16.msra.mxu0 %v5725_v18  ;;  %2163 = vmatpush1.bf16.msra.mxu1 %v5728_v2  ;;  %v1959_v1 = vmul.f32 %v4587_v59, %v4585_v58  ;;  %v6908_v58 = vld [vmem:[#allocation31_spill] sm:$0xff]  ;;  %v6909_v59 = vld [vmem:[#allocation32_spill] sm:$0xff] }
 0x4df   :  { %v1958_v45 = vmul.f32 %v4589_v46, %v5738_v24  ;;  %2123 = vmatprep.subr.bf16.mxu0 %v5732_v20  ;;  %2164 = vmatprep.subr.bf16.mxu1 %v5735_v21  ;;  %v6910_v46 = vld [vmem:[#allocation33_spill] sm:$0xff] }
 0x4e1   :  { %v5918_v36 = vadd.f32 %v1959_v1, %v1958_v45  ;;  %v4591_v24 = vpop.eup %4590  ;;  %v6912_v45 = vld [vmem:[#allocation35_spill] sm:$0xff]  ;;  %v6913_v1 = vld [vmem:[#allocation36_spill] sm:$0xff] }
 0x4e2   :  { %2124 = vmatpush1.bf16.msra.mxu0 %v5740_v25  ;;  %2165 = vmatpush1.bf16.msra.mxu1 %v5743_v26 }
 0x4e3   :  { %4592 = vtanh.f32 %v5918_v36  ;;  %2125 = vmatprep.subr.bf16.mxu0 %v5747_v23  ;;  %2166 = vmatprep.subr.bf16.mxu1 %v5750_v27 }
 0x4e6   :  { %2126 = vmatpush1.bf16.msra.mxu0 %v5753_v0  ;;  %2167 = vmatpush1.bf16.msra.mxu1 %v5756_v22 }
 0x4e7   :  { %2127 = vmatprep.subr.bf16.mxu0 %v5759_v32  ;;  %2168 = vmatprep.subr.bf16.mxu1 %v5762_v51 }
 0x4ea   :  { %2128 = vmatpush1.bf16.msra.mxu0 %v5765_v52  ;;  %2169 = vmatpush1.bf16.msra.mxu1 %v5768_v33 }
 0x4eb   :  { %2129 = vmatprep.subr.bf16.mxu0 %v5771_v34  ;;  %2170 = vmatprep.subr.bf16.mxu1 %v5774_v53 }
 0x4ee   :  { %2130 = vmatpush1.bf16.msra.mxu0 %v5777_v54  ;;  %2171 = vmatpush1.bf16.msra.mxu1 %v5780_v35 }
 0x4ef   :  { %2131 = vmatprep.subr.bf16.mxu0 %v5783_v37  ;;  %2172 = vmatprep.subr.bf16.mxu1 %v5786_v38 }
 0x4f0   :  { %v4593_v3 = vpop.eup %4592 }
 0x4f1   :  { %v1962_v63 = vmul.f32 %v4593_v3, %v4591_v24  ;;  %v6914_v24 = vld [vmem:[#allocation37_spill] sm:$0xff]  ;;  %v6915_v3 = vld [vmem:[#allocation38_spill] sm:$0xff] }
 0x4f2   :  { %2132 = vmatpush1.bf16.msra.mxu0 %v5789_v41  ;;  %2173 = vmatpush1.bf16.msra.mxu1 %v5792_v43 }
 0x4f3   :  { %v2093_v5 = vpack.c.bf16 %v1962_v63, %v1962_v63  ;;  %2247 = vmatprep.subr.bf16.mxu0 %v5643_v28  ;;  %2288 = vmatprep.subr.bf16.mxu1 %v5646_v29  ;;  %v6916_v63 = vld [vmem:[#allocation39_spill] sm:$0xff] }
 0x4f5   :  { %2150 = vmatmul.mubr.bf16.vlgmr.msra.gmra.mxu0 %v2093_v5  ;;  %2191 = vmatmul.mubr.bf16.vlgmr.msra.gmra.mxu1 %v2093_v5  ;;  %v6917_v5 = vld [vmem:[#allocation40_spill] sm:$0xff] }
 0x4f6   :  { %2248 = vmatpush1.bf16.msra.mxu0 %v5649_v30  ;;  %2289 = vmatpush1.bf16.msra.mxu1 %v5652_v31 }
 0x4f7   :  { %2249 = vmatprep.subr.bf16.mxu0 %v5799_v48  ;;  %2290 = vmatprep.subr.bf16.mxu1 %v5802_v12 }
 0x4f8   :  { %2279 = vmatprep.mubr.bf16.mxu0 %v6812_v42  ;;  %2320 = vmatprep.mubr.bf16.mxu1 %v6812_v42 }
 0x4fa   :  { %2250 = vmatpush1.bf16.msra.mxu0 %v6896_v49  ;;  %2291 = vmatpush1.bf16.msra.mxu1 %v6897_v6 }
 0x4fb   :  { %2251 = vmatprep.subr.bf16.mxu0 %v6898_v19  ;;  %2292 = vmatprep.subr.bf16.mxu1 %v6899_v56 }
 0x4fe   :  { %2252 = vmatpush1.bf16.msra.mxu0 %v6900_v44  ;;  %2293 = vmatpush1.bf16.msra.mxu1 %v6901_v7 }
 0x4ff   :  { %2253 = vmatprep.subr.bf16.mxu0 %v6902_v47  ;;  %2294 = vmatprep.subr.bf16.mxu1 %v6903_v62 }
 0x502   :  { %2254 = vmatpush1.bf16.msra.mxu0 %v6904_v57  ;;  %2295 = vmatpush1.bf16.msra.mxu1 %v6905_v39 }
 0x503   :  { %2255 = vmatprep.subr.bf16.mxu0 %v6906_v60  ;;  %2296 = vmatprep.subr.bf16.mxu1 %v6907_v16  ;;  %v6918_v16 = vld [vmem:[#allocation41_spill] sm:$0xff] }
 0x506   :  { %2256 = vmatpush1.bf16.msra.mxu0 %v6908_v58  ;;  %2297 = vmatpush1.bf16.msra.mxu1 %v6909_v59  ;;  %v6919_v58 = vld [vmem:[#allocation42_spill] sm:$0xff]  ;;  %v6920_v59 = vld [vmem:[#allocation43_spill] sm:$0xff] }
 0x507   :  { %2257 = vmatprep.subr.bf16.mxu0 %v6910_v46  ;;  %2298 = vmatprep.subr.bf16.mxu1 %v6911_v40  ;;  %v6921_v46 = vld [vmem:[#allocation44_spill] sm:$0xff]  ;;  %v6922_v40 = vld [vmem:[#allocation45_spill] sm:$0xff] }
 0x50a   :  { %2258 = vmatpush1.bf16.msra.mxu0 %v6912_v45  ;;  %2299 = vmatpush1.bf16.msra.mxu1 %v6913_v1  ;;  %v6923_v45 = vld [vmem:[#allocation48_spill] sm:$0xff] }
 0x50b   :  { %2259 = vmatprep.subr.bf16.mxu0 %v6914_v24  ;;  %2300 = vmatprep.subr.bf16.mxu1 %v6915_v3  ;;  %v1965_v1 = vld [vmem:[#allocation2 + $0x4] ss:$8 sm:$0xf] }
 0x50c   :  { %v6924_v24 = vld [vmem:[#allocation47_spill] sm:$0xff]  ;;  %v1982_v19 = vrot.slane %v1965_v1, %v5500_v13 }
 0x50d   :  { %v1970_v60 = vrot.slane %v1965_v1, %v6924_v24 }
 0x50e   :  { %2260 = vmatpush1.bf16.msra.mxu0 %v6916_v63  ;;  %2301 = vmatpush1.bf16.msra.mxu1 %v6917_v5  ;;  %v1974_v5 = vrot.slane %v1965_v1, %v5498_v11 }
 0x50f   :  { %2261 = vmatprep.subr.bf16.mxu0 %v6918_v16  ;;  %2302 = vmatprep.subr.bf16.mxu1 %v6919_v58 }
 0x512   :  { %2262 = vmatpush1.bf16.msra.mxu0 %v6920_v59  ;;  %2303 = vmatpush1.bf16.msra.mxu1 %v6921_v46 }
 0x513   :  { %2377 = vmatprep.subr.bf16.mxu0 %v6922_v40  ;;  %2418 = vmatprep.subr.bf16.mxu1 %v6923_v45  ;;  %v1978_v45 = vrot.slane %v1965_v1, %v5493_v9 }
 0x595   :  { %v2021_v3 = vpop.f32.mrf.mxu0  ;;  %v2062_v39 = vpop.f32.mrf.mxu1 }
 0x596   :  { %v2022_v63 = vadd.f32 %v2021_v3, %v1970_v60  ;;  %v2063_v44 = vadd.f32 %v2062_v39, %v1978_v45 }
 0x597   :  { %v2023_v57 = vpop.f32.mrf.mxu0  ;;  %v2064_v16 = vpop.f32.mrf.mxu1 }
 0x598   :  { %v4259_v62 = vmul.f32 -1.442695, %v2022_v63  ;;  %v2024_v58 = vadd.f32 %v2023_v57, %v1974_v5  ;;  %v4261_v56 = vmul.f32 -1.442695, %v2063_v44  ;;  %v2065_v3 = vadd.f32 %v2064_v16, %v1982_v19 }
 0x599   :  { %v2025_v47 = vpop.f32.mrf.mxu0  ;;  %v2066_v59 = vpop.f32.mrf.mxu1 }
 0x59a   :  { %4594 = vpow2.f32 %v4259_v62  ;;  %v4260_v46 = vmul.f32 -1.442695, %v2024_v58  ;;  %v2095_v47 = vld [vmem:[#allocation3 + $0x4] ss:$8 sm:$0xf] }
 0x59b   :  { %v2026_v7 = vpop.f32.mrf.mxu0  ;;  %v2067_v40 = vpop.f32.mrf.mxu1  ;;  %v2104_v44 = vrot.slane %v2095_v47, %v5498_v11 }
 0x59c   :  { %4596 = vpow2.f32 %v4260_v46  ;;  %v2100_v7 = vrot.slane %v2095_v47, %v6924_v24 }
 0x59d   :  { %4598 = vpow2.f32 %v4261_v56 }
 0x5a7   :  { %v4595_v60 = vpop.eup %4594 }
 0x5a8   :  { %v2078_v6 = vadd.f32 1.0, %v4595_v60 }
 0x5a9   :  { %v4597_v49 = vpop.eup %4596 }
 0x5aa   :  { %4600 = vrcp.f32 %v2078_v6  ;;  %v2079_v57 = vadd.f32 1.0, %v4597_v49  ;;  %v4599_v59 = vpop.eup %4598 }
 0x5ab   :  { %4602 = vtanh.f32 %v2065_v3  ;;  %v2080_v6 = vadd.f32 1.0, %v4599_v59  ;;  %v2112_v59 = vrot.slane %v2095_v47, %v5500_v13 }
 0x5ac   :  { %4604 = vrcp.f32 %v2079_v57 }
 0x5b5   :  { %v2151_v62 = vpop.f32.mrf.mxu0  ;;  %v2192_v58 = vpop.f32.mrf.mxu1 }
 0x5b6   :  { %v2152_v46 = vadd.f32 %v2151_v62, %v2100_v7  ;;  %v2108_v62 = vrot.slane %v2095_v47, %v5493_v9 }
 0x5b7   :  { %v4601_v39 = vpop.eup %4600  ;;  %v2153_v40 = vpop.f32.mrf.mxu0 }
 0x5b8   :  { %v2194_v45 = vpop.f32.mrf.mxu1  ;;  %v4603_v19 = vpop.eup %4602  ;;  %v4262_v16 = vmul.f32 -1.442695, %v2152_v46  ;;  %v2154_v1 = vadd.f32 %v2153_v40, %v2104_v44  ;;  %v2193_v46 = vadd.f32 %v2192_v58, %v2108_v62 }
 0x5b9   :  { %v4605_v56 = vpop.eup %4604  ;;  %v2155_v49 = vpop.f32.mrf.mxu0  ;;  %v2089_v60 = vmul.f32 %v4603_v19, %v4601_v39 }
 0x5ba   :  { %v2196_v63 = vpop.f32.mrf.mxu1  ;;  %v2088_v5 = vmul.f32 %v4605_v56, %v5898_v14  ;;  %4606 = vpow2.f32 %v4262_v16  ;;  %v4263_v3 = vmul.f32 -1.442695, %v2154_v1  ;;  %v4264_v44 = vmul.f32 -1.442695, %v2193_v46 }
 0x5bb   :  { %v2156_v57 = vpop.f32.mrf.mxu0  ;;  %v2195_v49 = vadd.f32 %v2194_v45, %v2112_v59  ;;  %v6926_v59 = vld [vmem:[#allocation20_spill] sm:$0xff] }
 0x5bc   :  { %v2197_v24 = vpop.f32.mrf.mxu1  ;;  %v5982_v7 = vadd.f32 %v2089_v60, %v2088_v5  ;;  %4608 = vpow2.f32 %v4263_v3 }
 0x5bd   :  { %4610 = vrcp.f32 %v2080_v6 }
 0x5be   :  { %4612 = vtanh.f32 %v5982_v7 }
 0x5bf   :  { %4614 = vpow2.f32 %v4264_v44  ;;  %v6925_v44 = vld [vmem:[#allocation46_spill] sm:$0xff] }
 0x5c7   :  { %v4607_v40 = vpop.eup %4606 }
 0x5c8   :  { %v2208_v14 = vadd.f32 1.0, %v4607_v40  ;;  %v6929_v40 = vld [vmem:[#allocation23_spill] sm:$0xff] }
 0x5c9   :  { %v4609_v39 = vpop.eup %4608 }
 0x5ca   :  { %v4611_v19 = vpop.eup %4610  ;;  %4616 = vrcp.f32 %v2208_v14  ;;  %v2209_v24 = vadd.f32 1.0, %v4609_v39  ;;  %v6933_v14 = vld [vmem:[#allocation27_spill] sm:$0xff]  ;;  %v6934_v39 = vld [vmem:[#allocation28_spill] sm:$0xff] }
 0x5cb   :  { %v4613_v16 = vpop.eup %4612  ;;  %4618 = vtanh.f32 %v2195_v49  ;;  %v6932_v49 = vld [vmem:[#allocation26_spill] sm:$0xff] }
 0x5cc   :  { %4620 = vrcp.f32 %v2209_v24  ;;  %v2092_v1 = vmul.f32 %v4613_v16, %v4611_v19  ;;  %v4615_v47 = vpop.eup %4614  ;;  %v6935_v19 = vld [vmem:[#allocation29_spill] sm:$0xff]  ;;  %v6936_v24 = vld [vmem:[#allocation30_spill] sm:$0xff]  ;;  %v6937_v16 = vld [vmem:[#allocation31_spill] sm:$0xff] }
 0x5cd   :  { %v2210_v63 = vadd.f32 1.0, %v4615_v47  ;;  %v6940_v47 = vld [vmem:[#allocation34_spill] sm:$0xff] }
 0x5ce   :  { %v2223_v56 = vpack.c.bf16 %v2092_v1, %v2092_v1  ;;  %v6938_v1 = vld [vmem:[#allocation32_spill] sm:$0xff] }
 0x5cf   :  { %4622 = vrcp.f32 %v2210_v63  ;;  %v6944_v63 = vld [vmem:[#allocation38_spill] sm:$0xff] }
 0x5d0   :  { %2280 = vmatmul.mubr.bf16.vlgmr.msra.gmra.mxu0 %v2223_v56  ;;  %2321 = vmatmul.mubr.bf16.vlgmr.msra.gmra.mxu1 %v2223_v56  ;;  %v6939_v56 = vld [vmem:[#allocation33_spill] sm:$0xff] }
 0x5d1   :  { %2378 = vmatpush1.bf16.msra.mxu0 %v5699_v8  ;;  %2419 = vmatpush1.bf16.msra.mxu1 %v5702_v10 }
 0x5d2   :  { %2379 = vmatprep.subr.bf16.mxu0 %v5705_v17  ;;  %2420 = vmatprep.subr.bf16.mxu1 %v5708_v61 }
 0x5d3   :  { %2409 = vmatprep.mubr.bf16.mxu0 %v6812_v42  ;;  %2450 = vmatprep.mubr.bf16.mxu1 %v6812_v42 }
 0x5d5   :  { %2380 = vmatpush1.bf16.msra.mxu0 %v5713_v4  ;;  %2421 = vmatpush1.bf16.msra.mxu1 %v5716_v55 }
 0x5d6   :  { %2381 = vmatprep.subr.bf16.mxu0 %v5719_v50  ;;  %2422 = vmatprep.subr.bf16.mxu1 %v5722_v15 }
 0x5d7   :  { %v4617_v58 = vpop.eup %4616 }
 0x5d8   :  { %v4619_v45 = vpop.eup %4618 }
 0x5d9   :  { %v4621_v6 = vpop.eup %4620  ;;  %2382 = vmatpush1.bf16.msra.mxu0 %v5725_v18  ;;  %2423 = vmatpush1.bf16.msra.mxu1 %v5728_v2  ;;  %v2219_v60 = vmul.f32 %v4619_v45, %v4617_v58  ;;  %v6941_v58 = vld [vmem:[#allocation35_spill] sm:$0xff]  ;;  %v6942_v45 = vld [vmem:[#allocation36_spill] sm:$0xff] }
 0x5da   :  { %v2218_v5 = vmul.f32 %v4621_v6, %v5918_v36  ;;  %2383 = vmatprep.subr.bf16.mxu0 %v5732_v20  ;;  %2424 = vmatprep.subr.bf16.mxu1 %v5735_v21  ;;  %v6943_v6 = vld [vmem:[#allocation37_spill] sm:$0xff] }
 0x5dc   :  { %v6002_v3 = vadd.f32 %v2219_v60, %v2218_v5  ;;  %v4623_v36 = vpop.eup %4622  ;;  %v6945_v5 = vld [vmem:[#allocation39_spill] sm:$0xff]  ;;  %v6946_v60 = vld [vmem:[#allocation40_spill] sm:$0xff] }
 0x5dd   :  { %2384 = vmatpush1.bf16.msra.mxu0 %v5740_v25  ;;  %2425 = vmatpush1.bf16.msra.mxu1 %v5743_v26 }
 0x5de   :  { %4624 = vtanh.f32 %v6002_v3  ;;  %2385 = vmatprep.subr.bf16.mxu0 %v5747_v23  ;;  %2426 = vmatprep.subr.bf16.mxu1 %v5750_v27 }
 0x5e1   :  { %2386 = vmatpush1.bf16.msra.mxu0 %v5753_v0  ;;  %2427 = vmatpush1.bf16.msra.mxu1 %v5756_v22 }
 0x5e2   :  { %2387 = vmatprep.subr.bf16.mxu0 %v5759_v32  ;;  %2428 = vmatprep.subr.bf16.mxu1 %v5762_v51 }
 0x5e5   :  { %2388 = vmatpush1.bf16.msra.mxu0 %v5765_v52  ;;  %2429 = vmatpush1.bf16.msra.mxu1 %v5768_v33 }
 0x5e6   :  { %2389 = vmatprep.subr.bf16.mxu0 %v5771_v34  ;;  %2430 = vmatprep.subr.bf16.mxu1 %v5774_v53 }
 0x5e9   :  { %2390 = vmatpush1.bf16.msra.mxu0 %v5777_v54  ;;  %2431 = vmatpush1.bf16.msra.mxu1 %v5780_v35 }
 0x5ea   :  { %2391 = vmatprep.subr.bf16.mxu0 %v5783_v37  ;;  %2432 = vmatprep.subr.bf16.mxu1 %v5786_v38 }
 0x5eb   :  { %v4625_v57 = vpop.eup %4624 }
 0x5ec   :  { %v2222_v62 = vmul.f32 %v4625_v57, %v4623_v36  ;;  %v6947_v36 = vld [vmem:[#allocation41_spill] sm:$0xff]  ;;  %v6948_v57 = vld [vmem:[#allocation42_spill] sm:$0xff] }
 0x5ed   :  { %2392 = vmatpush1.bf16.msra.mxu0 %v5789_v41  ;;  %2433 = vmatpush1.bf16.msra.mxu1 %v5792_v43 }
 0x5ee   :  { %v2353_v46 = vpack.c.bf16 %v2222_v62, %v2222_v62  ;;  %2507 = vmatprep.subr.bf16.mxu0 %v5643_v28  ;;  %2548 = vmatprep.subr.bf16.mxu1 %v5646_v29  ;;  %v6927_v28 = vld [vmem:[#allocation21_spill] sm:$0xff]  ;;  %v6928_v29 = vld [vmem:[#allocation22_spill] sm:$0xff]  ;;  %v6949_v62 = vld [vmem:[#allocation43_spill] sm:$0xff] }
 0x5f0   :  { %2410 = vmatmul.mubr.bf16.vlgmr.msra.gmra.mxu0 %v2353_v46  ;;  %2451 = vmatmul.mubr.bf16.vlgmr.msra.gmra.mxu1 %v2353_v46  ;;  %v6950_v46 = vld [vmem:[#allocation44_spill] sm:$0xff] }
 0x5f1   :  { %2508 = vmatpush1.bf16.msra.mxu0 %v5649_v30  ;;  %2549 = vmatpush1.bf16.msra.mxu1 %v5652_v31  ;;  %v6930_v30 = vld [vmem:[#allocation24_spill] sm:$0xff]  ;;  %v6931_v31 = vld [vmem:[#allocation25_spill] sm:$0xff] }
 0x5f2   :  { %2509 = vmatprep.subr.bf16.mxu0 %v5799_v48  ;;  %2550 = vmatprep.subr.bf16.mxu1 %v5802_v12 }
 0x5f3   :  { %2539 = vmatprep.mubr.bf16.mxu0 %v6812_v42  ;;  %2580 = vmatprep.mubr.bf16.mxu1 %v6812_v42 }
 0x5f5   :  { %2510 = vmatpush1.bf16.msra.mxu0 %v6925_v44  ;;  %2551 = vmatpush1.bf16.msra.mxu1 %v6926_v59 }
 0x5f6   :  { %2511 = vmatprep.subr.bf16.mxu0 %v6927_v28  ;;  %2552 = vmatprep.subr.bf16.mxu1 %v6928_v29 }
 0x5f9   :  { %2512 = vmatpush1.bf16.msra.mxu0 %v6929_v40  ;;  %2553 = vmatpush1.bf16.msra.mxu1 %v6930_v30 }
 0x5fa   :  { %2513 = vmatprep.subr.bf16.mxu0 %v6931_v31  ;;  %2554 = vmatprep.subr.bf16.mxu1 %v6932_v49 }
 0x5fd   :  { %2514 = vmatpush1.bf16.msra.mxu0 %v6933_v14  ;;  %2555 = vmatpush1.bf16.msra.mxu1 %v6934_v39 }
 0x5fe   :  { %2515 = vmatprep.subr.bf16.mxu0 %v6935_v19  ;;  %2556 = vmatprep.subr.bf16.mxu1 %v6936_v24 }
 0x601   :  { %2516 = vmatpush1.bf16.msra.mxu0 %v6937_v16  ;;  %2557 = vmatpush1.bf16.msra.mxu1 %v6938_v1 }
 0x602   :  { %2517 = vmatprep.subr.bf16.mxu0 %v6939_v56  ;;  %2558 = vmatprep.subr.bf16.mxu1 %v6940_v47  ;;  %v6951_v47 = vld [vmem:[#allocation45_spill] sm:$0xff] }
 0x605   :  { %2518 = vmatpush1.bf16.msra.mxu0 %v6941_v58  ;;  %2559 = vmatpush1.bf16.msra.mxu1 %v6942_v45  ;;  %v6952_v58 = vld [vmem:[#allocation48_spill] sm:$0xff] }
 0x606   :  { %2519 = vmatprep.subr.bf16.mxu0 %v6943_v6  ;;  %2560 = vmatprep.subr.bf16.mxu1 %v6944_v63  ;;  %v2225_v45 = vld [vmem:[#allocation2 + $0x5] ss:$8 sm:$0xf] }
 0x607   :  { %v6953_v6 = vld [vmem:[#allocation47_spill] sm:$0xff]  ;;  %v2242_v31 = vrot.slane %v2225_v45, %v5500_v13 }
 0x608   :  { %v2230_v56 = vrot.slane %v2225_v45, %v6953_v6 }
 0x609   :  { %2520 = vmatpush1.bf16.msra.mxu0 %v6945_v5  ;;  %2561 = vmatpush1.bf16.msra.mxu1 %v6946_v60  ;;  %v2234_v60 = vrot.slane %v2225_v45, %v5498_v11 }
 0x60a   :  { %2521 = vmatprep.subr.bf16.mxu0 %v6947_v36  ;;  %2562 = vmatprep.subr.bf16.mxu1 %v6948_v57 }
 0x60d   :  { %2522 = vmatpush1.bf16.msra.mxu0 %v6949_v62  ;;  %2563 = vmatpush1.bf16.msra.mxu1 %v6950_v46 }
 0x60e   :  { %2637 = vmatprep.subr.bf16.mxu0 %v6951_v47  ;;  %2678 = vmatprep.subr.bf16.mxu1 %v6952_v58  ;;  %v2238_v58 = vrot.slane %v2225_v45, %v5493_v9 }
 0x690   :  { %v2281_v63 = vpop.f32.mrf.mxu0  ;;  %v2322_v1 = vpop.f32.mrf.mxu1 }
 0x691   :  { %v2282_v5 = vadd.f32 %v2281_v63, %v2230_v56  ;;  %v2323_v14 = vadd.f32 %v2322_v1, %v2238_v58 }
 0x692   :  { %v2283_v16 = vpop.f32.mrf.mxu0  ;;  %v2324_v36 = vpop.f32.mrf.mxu1 }
 0x693   :  { %v4265_v24 = vmul.f32 -1.442695, %v2282_v5  ;;  %v2284_v57 = vadd.f32 %v2283_v16, %v2234_v60  ;;  %v4267_v49 = vmul.f32 -1.442695, %v2323_v14  ;;  %v2325_v63 = vadd.f32 %v2324_v36, %v2242_v31 }
 0x694   :  { %v2285_v19 = vpop.f32.mrf.mxu0  ;;  %v2326_v62 = vpop.f32.mrf.mxu1 }
 0x695   :  { %4626 = vpow2.f32 %v4265_v24  ;;  %v4266_v46 = vmul.f32 -1.442695, %v2284_v57  ;;  %v2355_v19 = vld [vmem:[#allocation3 + $0x5] ss:$8 sm:$0xf] }
 0x696   :  { %v2286_v39 = vpop.f32.mrf.mxu0  ;;  %v2327_v47 = vpop.f32.mrf.mxu1  ;;  %v2364_v14 = vrot.slane %v2355_v19, %v5498_v11 }
 0x697   :  { %4628 = vpow2.f32 %v4266_v46  ;;  %v2360_v39 = vrot.slane %v2355_v19, %v6953_v6 }
 0x698   :  { %4630 = vpow2.f32 %v4267_v49 }
 0x6a2   :  { %v4627_v56 = vpop.eup %4626 }
 0x6a3   :  { %v2338_v30 = vadd.f32 1.0, %v4627_v56 }
 0x6a4   :  { %v4629_v40 = vpop.eup %4628 }
 0x6a5   :  { %4632 = vrcp.f32 %v2338_v30  ;;  %v2339_v16 = vadd.f32 1.0, %v4629_v40  ;;  %v4631_v5 = vpop.eup %4630 }
 0x6a6   :  { %4634 = vtanh.f32 %v2325_v63  ;;  %v2340_v30 = vadd.f32 1.0, %v4631_v5  ;;  %v2372_v5 = vrot.slane %v2355_v19, %v5500_v13 }
 0x6a7   :  { %4636 = vrcp.f32 %v2339_v16 }
 0x6b0   :  { %v2411_v24 = vpop.f32.mrf.mxu0  ;;  %v2452_v47 = vpop.f32.mrf.mxu1 }
 0x6b1   :  { %v2412_v60 = vadd.f32 %v2411_v24, %v2360_v39  ;;  %v2368_v24 = vrot.slane %v2355_v19, %v5493_v9 }
 0x6b2   :  { %v4633_v1 = vpop.eup %4632  ;;  %v2413_v58 = vpop.f32.mrf.mxu0 }
 0x6b3   :  { %v2454_v45 = vpop.f32.mrf.mxu1  ;;  %v4635_v31 = vpop.eup %4634  ;;  %v4268_v36 = vmul.f32 -1.442695, %v2412_v60  ;;  %v2414_v57 = vadd.f32 %v2413_v58, %v2364_v14  ;;  %v2453_v60 = vadd.f32 %v2452_v47, %v2368_v24 }
 0x6b4   :  { %v4637_v49 = vpop.eup %4636  ;;  %v2415_v40 = vpop.f32.mrf.mxu0  ;;  %v2349_v56 = vmul.f32 %v4635_v31, %v4633_v1 }
 0x6b5   :  { %v2456_v62 = vpop.f32.mrf.mxu1  ;;  %v2348_v46 = vmul.f32 %v4637_v49, %v5982_v7  ;;  %4638 = vpow2.f32 %v4268_v36  ;;  %v4269_v63 = vmul.f32 -1.442695, %v2414_v57  ;;  %v4270_v14 = vmul.f32 -1.442695, %v2453_v60 }
 0x6b6   :  { %v2416_v16 = vpop.f32.mrf.mxu0  ;;  %v2455_v40 = vadd.f32 %v2454_v45, %v2372_v5  ;;  %v6978_v62 = vld [vmem:[#allocation47_spill] sm:$0xff] }
 0x6b7   :  { %v2457_v6 = vpop.f32.mrf.mxu1  ;;  %v6066_v39 = vadd.f32 %v2349_v56, %v2348_v46  ;;  %4640 = vpow2.f32 %v4269_v63 }
 0x6b8   :  { %4642 = vrcp.f32 %v2340_v30  ;;  %v2485_v30 = vld [vmem:[#allocation2 + $0x6] ss:$8 sm:$0xf] }
 0x6b9   :  { %4644 = vtanh.f32 %v6066_v39  ;;  %v2490_v46 = vrot.slane %v2485_v30, %v6978_v62  ;;  %v2494_v24 = vrot.slane %v2485_v30, %v5498_v11 }
 0x6ba   :  { %4646 = vpow2.f32 %v4270_v14 }
 0x6c2   :  { %v4639_v58 = vpop.eup %4638 }
 0x6c3   :  { %v2468_v7 = vadd.f32 1.0, %v4639_v58 }
 0x6c4   :  { %v4641_v1 = vpop.eup %4640 }
 0x6c5   :  { %v4643_v31 = vpop.eup %4642  ;;  %4648 = vrcp.f32 %v2468_v7  ;;  %v2469_v6 = vadd.f32 1.0, %v4641_v1 }
 0x6c6   :  { %v4645_v36 = vpop.eup %4644  ;;  %4650 = vtanh.f32 %v2455_v40 }
 0x6c7   :  { %4652 = vrcp.f32 %v2469_v6  ;;  %v2352_v57 = vmul.f32 %v4645_v36, %v4643_v31  ;;  %v4647_v19 = vpop.eup %4646  ;;  %v2498_v36 = vrot.slane %v2485_v30, %v5493_v9 }
 0x6c8   :  { %v2470_v45 = vadd.f32 1.0, %v4647_v19  ;;  %v2502_v19 = vrot.slane %v2485_v30, %v5500_v13 }
 0x6c9   :  { %v2483_v49 = vpack.c.bf16 %v2352_v57, %v2352_v57 }
 0x6ca   :  { %4654 = vrcp.f32 %v2470_v45 }
 0x6cb   :  { %2540 = vmatmul.mubr.bf16.vlgmr.msra.gmra.mxu0 %v2483_v49  ;;  %2581 = vmatmul.mubr.bf16.vlgmr.msra.gmra.mxu1 %v2483_v49 }
 0x6cc   :  { %2638 = vmatpush1.bf16.msra.mxu0 %v5699_v8  ;;  %2679 = vmatpush1.bf16.msra.mxu1 %v5702_v10 }
 0x6cd   :  { %2639 = vmatprep.subr.bf16.mxu0 %v5705_v17  ;;  %2680 = vmatprep.subr.bf16.mxu1 %v5708_v61 }
 0x6ce   :  { %2669 = vmatprep.mubr.bf16.mxu0 %v6812_v42  ;;  %2710 = vmatprep.mubr.bf16.mxu1 %v6812_v42 }
 0x6d0   :  { %2640 = vmatpush1.bf16.msra.mxu0 %v5713_v4  ;;  %2681 = vmatpush1.bf16.msra.mxu1 %v5716_v55 }
 0x6d1   :  { %2641 = vmatprep.subr.bf16.mxu0 %v5719_v50  ;;  %2682 = vmatprep.subr.bf16.mxu1 %v5722_v15 }
 0x6d2   :  { %v4649_v8 = vpop.eup %4648 }
 0x6d3   :  { %v4651_v47 = vpop.eup %4650 }
 0x6d4   :  { %v4653_v10 = vpop.eup %4652  ;;  %2642 = vmatpush1.bf16.msra.mxu0 %v5725_v18  ;;  %2683 = vmatpush1.bf16.msra.mxu1 %v5728_v2  ;;  %v2479_v61 = vmul.f32 %v4651_v47, %v4649_v8  ;;  %v6107_v2 = vld [vmem:[#allocation9 + $0xe4] ss:$16 sps:$4 sm:$0xff]  }
 0x6d5   :  { %v2478_v17 = vmul.f32 %v4653_v10, %v6002_v3  ;;  %2643 = vmatprep.subr.bf16.mxu0 %v5732_v20  ;;  %2684 = vmatprep.subr.bf16.mxu1 %v5735_v21  ;;  %v6110_v20 = vld [vmem:[#allocation9 + $0xec] ss:$16 sps:$4 sm:$0xff]   ;;  %v6113_v21 = vld [vmem:[#allocation9 + $0xe0] ss:$16 sps:$4 sm:$0xff]   ;;  %v6973_v3 = vld [vmem:[#allocation42_spill] sm:$0xff] }
 0x6d7   :  { %v6086_v4 = vadd.f32 %v2479_v61, %v2478_v17  ;;  %v4655_v55 = vpop.eup %4654  ;;  %v2615_v61 = vld [vmem:[#allocation3 + $0x6] ss:$8 sm:$0xf] }
 0x6d8   :  { %2644 = vmatpush1.bf16.msra.mxu0 %v5740_v25  ;;  %2685 = vmatpush1.bf16.msra.mxu1 %v5743_v26  ;;  %v6116_v25 = vld [vmem:[#allocation9 + $0xe8] ss:$16 sps:$4 sm:$0xff]   ;;  %v6954_v26 = vld [vmem:[#allocation23_spill] sm:$0xff] }
 0x6d9   :  { %4656 = vtanh.f32 %v6086_v4  ;;  %2645 = vmatprep.subr.bf16.mxu0 %v5747_v23  ;;  %2686 = vmatprep.subr.bf16.mxu1 %v5750_v27  ;;  %v6955_v23 = vld [vmem:[#allocation24_spill] sm:$0xff]  ;;  %v6956_v27 = vld [vmem:[#allocation25_spill] sm:$0xff] }
 0x6dc   :  { %2646 = vmatpush1.bf16.msra.mxu0 %v5753_v0  ;;  %2687 = vmatpush1.bf16.msra.mxu1 %v5756_v22  ;;  %v6957_v0 = vld [vmem:[#allocation26_spill] sm:$0xff]  ;;  %v6958_v22 = vld [vmem:[#allocation27_spill] sm:$0xff] }
 0x6dd   :  { %2647 = vmatprep.subr.bf16.mxu0 %v5759_v32  ;;  %2688 = vmatprep.subr.bf16.mxu1 %v5762_v51  ;;  %v6959_v32 = vld [vmem:[#allocation28_spill] sm:$0xff]  ;;  %v6960_v51 = vld [vmem:[#allocation29_spill] sm:$0xff] }
 0x6e0   :  { %2648 = vmatpush1.bf16.msra.mxu0 %v5765_v52  ;;  %2689 = vmatpush1.bf16.msra.mxu1 %v5768_v33  ;;  %v6961_v52 = vld [vmem:[#allocation30_spill] sm:$0xff]  ;;  %v6962_v33 = vld [vmem:[#allocation31_spill] sm:$0xff] }
 0x6e1   :  { %2649 = vmatprep.subr.bf16.mxu0 %v5771_v34  ;;  %2690 = vmatprep.subr.bf16.mxu1 %v5774_v53  ;;  %v6963_v34 = vld [vmem:[#allocation32_spill] sm:$0xff]  ;;  %v6964_v53 = vld [vmem:[#allocation33_spill] sm:$0xff] }
 0x6e4   :  { %2650 = vmatpush1.bf16.msra.mxu0 %v5777_v54  ;;  %2691 = vmatpush1.bf16.msra.mxu1 %v5780_v35  ;;  %v6965_v54 = vld [vmem:[#allocation34_spill] sm:$0xff]  ;;  %v6966_v35 = vld [vmem:[#allocation35_spill] sm:$0xff] }
 0x6e5   :  { %2651 = vmatprep.subr.bf16.mxu0 %v5783_v37  ;;  %2692 = vmatprep.subr.bf16.mxu1 %v5786_v38  ;;  %v6967_v37 = vld [vmem:[#allocation36_spill] sm:$0xff]  ;;  %v6968_v38 = vld [vmem:[#allocation37_spill] sm:$0xff] }
 0x6e6   :  { %v4657_v50 = vpop.eup %4656 }
 0x6e7   :  { %v2482_v15 = vmul.f32 %v4657_v50, %v4655_v55  ;;  %v2620_v55 = vrot.slane %v2615_v61, %v6978_v62 }
 0x6e8   :  { %2652 = vmatpush1.bf16.msra.mxu0 %v5789_v41  ;;  %2693 = vmatpush1.bf16.msra.mxu1 %v5792_v43  ;;  %v6969_v41 = vld [vmem:[#allocation38_spill] sm:$0xff]  ;;  %v6970_v43 = vld [vmem:[#allocation39_spill] sm:$0xff] }
 0x6e9   :  { %v2613_v18 = vpack.c.bf16 %v2482_v15, %v2482_v15  ;;  %2767 = vmatprep.subr.bf16.mxu0 %v6107_v2  ;;  %2808 = vmatprep.subr.bf16.mxu1 %v6110_v20 }
 0x6eb   :  { %2670 = vmatmul.mubr.bf16.vlgmr.msra.gmra.mxu0 %v2613_v18  ;;  %2711 = vmatmul.mubr.bf16.vlgmr.msra.gmra.mxu1 %v2613_v18 }
 0x6ec   :  { %2768 = vmatpush1.bf16.msra.mxu0 %v6113_v21  ;;  %2809 = vmatpush1.bf16.msra.mxu1 %v6116_v25 }
 0x6ed   :  { %2769 = vmatprep.subr.bf16.mxu0 %v5799_v48  ;;  %2810 = vmatprep.subr.bf16.mxu1 %v5802_v12  ;;  %v6971_v48 = vld [vmem:[#allocation40_spill] sm:$0xff]  ;;  %v6972_v12 = vld [vmem:[#allocation41_spill] sm:$0xff] }
 0x6ee   :  { %2799 = vmatprep.mubr.bf16.mxu0 %v6812_v42  ;;  %2840 = vmatprep.mubr.bf16.mxu1 %v6812_v42 }
 0x6f0   :  { %2770 = vmatpush1.bf16.msra.mxu0 %v6925_v44  ;;  %2811 = vmatpush1.bf16.msra.mxu1 %v6926_v59  ;;  %v6974_v44 = vld [vmem:[#allocation43_spill] sm:$0xff]  ;;  %v6975_v59 = vld [vmem:[#allocation44_spill] sm:$0xff] }
 0x6f1   :  { %2771 = vmatprep.subr.bf16.mxu0 %v6927_v28  ;;  %2812 = vmatprep.subr.bf16.mxu1 %v6928_v29  ;;  %v6976_v28 = vld [vmem:[#allocation45_spill] sm:$0xff]  ;;  %v6977_v29 = vld [vmem:[#allocation48_spill] sm:$0xff] }
 0x6f4   :  { %2772 = vmatpush1.bf16.msra.mxu0 %v6954_v26  ;;  %2813 = vmatpush1.bf16.msra.mxu1 %v6955_v23  ;;  %v2624_v23 = vrot.slane %v2615_v61, %v5498_v11 }
 0x6f5   :  { %2773 = vmatprep.subr.bf16.mxu0 %v6956_v27  ;;  %2814 = vmatprep.subr.bf16.mxu1 %v6957_v0 }
 0x6f8   :  { %2774 = vmatpush1.bf16.msra.mxu0 %v6958_v22  ;;  %2815 = vmatpush1.bf16.msra.mxu1 %v6959_v32 }
 0x6f9   :  { %2775 = vmatprep.subr.bf16.mxu0 %v6960_v51  ;;  %2816 = vmatprep.subr.bf16.mxu1 %v6961_v52 }
 0x6fc   :  { %2776 = vmatpush1.bf16.msra.mxu0 %v6962_v33  ;;  %2817 = vmatpush1.bf16.msra.mxu1 %v6963_v34 }
 0x6fd   :  { %2777 = vmatprep.subr.bf16.mxu0 %v6964_v53  ;;  %2818 = vmatprep.subr.bf16.mxu1 %v6965_v54 }
 0x700   :  { %2778 = vmatpush1.bf16.msra.mxu0 %v6966_v35  ;;  %2819 = vmatpush1.bf16.msra.mxu1 %v6967_v37 }
 0x701   :  { %2779 = vmatprep.subr.bf16.mxu0 %v6968_v38  ;;  %2820 = vmatprep.subr.bf16.mxu1 %v6969_v41 }
 0x704   :  { %2780 = vmatpush1.bf16.msra.mxu0 %v6970_v43  ;;  %2821 = vmatpush1.bf16.msra.mxu1 %v6971_v48 }
 0x705   :  { %2781 = vmatprep.subr.bf16.mxu0 %v6972_v12  ;;  %2822 = vmatprep.subr.bf16.mxu1 %v6973_v3  ;;  %v2628_v12 = vrot.slane %v2615_v61, %v5493_v9 }
 0x708   :  { %2782 = vmatpush1.bf16.msra.mxu0 %v6974_v44  ;;  %2823 = vmatpush1.bf16.msra.mxu1 %v6975_v59  ;;  %v2632_v59 = vrot.slane %v2615_v61, %v5500_v13  ;;  %v4929_v61 = vld [vmem:[#allocation10 + $0x8c] ss:$16 sps:$4 sm:$0xff]  }
 0x709   :  { %2897 = vmatprep.subr.bf16.mxu0 %v6976_v28  ;;  %2938 = vmatprep.subr.bf16.mxu1 %v6977_v29 }
 0x78b   :  { %v2541_v56 = vpop.f32.mrf.mxu0  ;;  %v2582_v63 = vpop.f32.mrf.mxu1 }
 0x78c   :  { %v2542_v16 = vadd.f32 %v2541_v56, %v2490_v46  ;;  %v2583_v57 = vadd.f32 %v2582_v63, %v2498_v36 }
 0x78d   :  { %v2543_v60 = vpop.f32.mrf.mxu0  ;;  %v2584_v14 = vpop.f32.mrf.mxu1 }
 0x78e   :  { %v4271_v5 = vmul.f32 -1.442695, %v2542_v16  ;;  %v2544_v58 = vadd.f32 %v2543_v60, %v2494_v24  ;;  %v4273_v49 = vmul.f32 -1.442695, %v2583_v57  ;;  %v2585_v47 = vadd.f32 %v2584_v14, %v2502_v19  ;;  %v4918_v60 = vld [vmem:[#allocation10 + $0xe0] ss:$16 sps:$4 sm:$0xff]  }
 0x78f   :  { %v2545_v40 = vpop.f32.mrf.mxu0  ;;  %v2586_v7 = vpop.f32.mrf.mxu1  ;;  %v4919_v14 = vld [vmem:[#allocation10 + $0xe8] ss:$16 sps:$4 sm:$0xff]  }
 0x790   :  { %4658 = vpow2.f32 %v4271_v5  ;;  %v4272_v1 = vmul.f32 -1.442695, %v2544_v58  ;;  %v4920_v5 = vld [vmem:[#allocation10 + $0xc4] ss:$16 sps:$4 sm:$0xff]   ;;  %v4921_v58 = vld [vmem:[#allocation10 + $0xcc] ss:$16 sps:$4 sm:$0xff]  }
 0x791   :  { %v2546_v31 = vpop.f32.mrf.mxu0  ;;  %v2587_v6 = vpop.f32.mrf.mxu1  ;;  %v4922_v40 = vld [vmem:[#allocation10 + $0xc0] ss:$16 sps:$4 sm:$0xff]   ;;  %v4923_v7 = vld [vmem:[#allocation10 + $0xc8] ss:$16 sps:$4 sm:$0xff]  }
 0x792   :  { %4660 = vpow2.f32 %v4272_v1  ;;  %v4924_v31 = vld [vmem:[#allocation10 + $0xa4] ss:$16 sps:$4 sm:$0xff]   ;;  %v4925_v6 = vld [vmem:[#allocation10 + $0xac] ss:$16 sps:$4 sm:$0xff]  }
 0x793   :  { %4662 = vpow2.f32 %v4273_v49 }
 0x79d   :  { %v4659_v8 = vpop.eup %4658 }
 0x79e   :  { %v2598_v10 = vadd.f32 1.0, %v4659_v8  ;;  %v4926_v8 = vld [vmem:[#allocation10 + $0xa0] ss:$16 sps:$4 sm:$0xff]  }
 0x79f   :  { %v4661_v45 = vpop.eup %4660 }
 0x7a0   :  { %4664 = vrcp.f32 %v2598_v10  ;;  %v2599_v17 = vadd.f32 1.0, %v4661_v45  ;;  %v4663_v18 = vpop.eup %4662 }
 0x7a1   :  { %4666 = vtanh.f32 %v2585_v47  ;;  %v2600_v34 = vadd.f32 1.0, %v4663_v18  ;;  %v4927_v47 = vld [vmem:[#allocation10 + $0xa8] ss:$16 sps:$4 sm:$0xff]   ;;  %v4932_v18 = vld [vmem:[#allocation10 + $0x64] ss:$16 sps:$4 sm:$0xff]  }
 0x7a2   :  { %4668 = vrcp.f32 %v2599_v17  ;;  %v4928_v17 = vld [vmem:[#allocation10 + $0x84] ss:$16 sps:$4 sm:$0xff]  }
 0x7ab   :  { %v2671_v50 = vpop.f32.mrf.mxu0  ;;  %v2712_v15 = vpop.f32.mrf.mxu1 }
 0x7ac   :  { %v2672_v26 = vadd.f32 %v2671_v50, %v2620_v55  ;;  %v2713_v3 = vadd.f32 %v2712_v15, %v2628_v12  ;;  %v4930_v50 = vld [vmem:[#allocation10 + $0x80] ss:$16 sps:$4 sm:$0xff]   ;;  %v4931_v15 = vld [vmem:[#allocation10 + $0x88] ss:$16 sps:$4 sm:$0xff]  }
 0x7ad   :  { %v4665_v27 = vpop.eup %4664  ;;  %v2673_v0 = vpop.f32.mrf.mxu0 }
 0x7ae   :  { %v2714_v22 = vpop.f32.mrf.mxu1  ;;  %v4667_v32 = vpop.eup %4666  ;;  %v4274_v51 = vmul.f32 -1.442695, %v2672_v26  ;;  %v2674_v52 = vadd.f32 %v2673_v0, %v2624_v23  ;;  %v4276_v44 = vmul.f32 -1.442695, %v2713_v3  ;;  %v4933_v26 = vld [vmem:[#allocation10 + $0x6c] ss:$16 sps:$4 sm:$0xff]  }
 0x7af   :  { %v4669_v33 = vpop.eup %4668  ;;  %v2675_v53 = vpop.f32.mrf.mxu0  ;;  %v2609_v37 = vmul.f32 %v4667_v32, %v4665_v27  ;;  %v2715_v29 = vadd.f32 %v2714_v22, %v2632_v59  ;;  %v4934_v23 = vld [vmem:[#allocation10 + $0x60] ss:$16 sps:$4 sm:$0xff]   ;;  %v4936_v27 = vld [vmem:[#allocation10 + $0x44] ss:$16 sps:$4 sm:$0xff]   ;;  %v4937_v0 = vld [vmem:[#allocation10 + $0x4c] ss:$16 sps:$4 sm:$0xff]  }
 0x7b0   :  { %v2716_v54 = vpop.f32.mrf.mxu1  ;;  %v2608_v35 = vmul.f32 %v4669_v33, %v6066_v39  ;;  %4670 = vpow2.f32 %v4274_v51  ;;  %v4275_v38 = vmul.f32 -1.442695, %v2674_v52  ;;  %v4938_v22 = vld [vmem:[#allocation10 + $0x40] ss:$16 sps:$4 sm:$0xff]   ;;  %v4939_v32 = vld [vmem:[#allocation10 + $0x48] ss:$16 sps:$4 sm:$0xff]  }
 0x7b1   :  { %v2676_v41 = vpop.f32.mrf.mxu0  ;;  %v4940_v51 = vld [vmem:[#allocation10 + $0x24] ss:$16 sps:$4 sm:$0xff]   ;;  %v4941_v52 = vld [vmem:[#allocation10 + $0x2c] ss:$16 sps:$4 sm:$0xff]   ;;  %v4942_v33 = vld [vmem:[#allocation10 + $0x20] ss:$16 sps:$4 sm:$0xff]  }
 0x7b2   :  { %v2717_v43 = vpop.f32.mrf.mxu1  ;;  %v6158_v48 = vadd.f32 %v2609_v37, %v2608_v35  ;;  %4672 = vpow2.f32 %v4275_v38  ;;  %v4944_v54 = vld [vmem:[#allocation10 + $0x4] ss:$16 sps:$4 sm:$0xff]   ;;  %v4945_v35 = vld [vmem:[#allocation10 + $0xc] ss:$16 sps:$4 sm:$0xff]   ;;  %v4946_v41 = vld [vmem:[#allocation10] ss:$16 sps:$4 sm:$0xff]  }
 0x7b3   :  { %4674 = vrcp.f32 %v2600_v34  ;;  %v4943_v34 = vld [vmem:[#allocation10 + $0x28] ss:$16 sps:$4 sm:$0xff]   ;;  %v6173_v3 = vld [vmem:[#allocation9 + $0xc4] ss:$16 sps:$4 sm:$0xff]   ;;  %v6181_v59 = vld [vmem:[#allocation9 + $0xc0] ss:$16 sps:$4 sm:$0xff]  }
 0x7b4   :  { %4676 = vtanh.f32 %v6158_v48  ;;  %v4947_v43 = vld [vmem:[#allocation10 + $0x8] ss:$16 sps:$4 sm:$0xff]  }
 0x7b5   :  { %4678 = vpow2.f32 %v4276_v44  ;;  %v6176_v44 = vld [vmem:[#allocation9 + $0xcc] ss:$16 sps:$4 sm:$0xff]  }
 0x7bd   :  { %v4671_v28 = vpop.eup %4670 }
 0x7be   :  { %v2728_v39 = vadd.f32 1.0, %v4671_v28  ;;  %v6184_v28 = vld [vmem:[#allocation9 + $0xc8] ss:$16 sps:$4 sm:$0xff]  }
 0x7bf   :  { %v4673_v30 = vpop.eup %4672 }
 0x7c0   :  { %v4675_v46 = vpop.eup %4674  ;;  %4680 = vrcp.f32 %v2728_v39  ;;  %v2729_v56 = vadd.f32 1.0, %v4673_v30  ;;  %v6190_v39 = vld [vmem:[#allocation9 + $0xac] ss:$16 sps:$4 sm:$0xff]   ;;  %v6193_v30 = vld [vmem:[#allocation9 + $0xa0] ss:$16 sps:$4 sm:$0xff]  }
 0x7c1   :  { %v4677_v63 = vpop.eup %4676  ;;  %4682 = vtanh.f32 %v2715_v29  ;;  %v6187_v29 = vld [vmem:[#allocation9 + $0xa4] ss:$16 sps:$4 sm:$0xff]  }
 0x7c2   :  { %4684 = vrcp.f32 %v2729_v56  ;;  %v2612_v16 = vmul.f32 %v4677_v63, %v4675_v46  ;;  %v4679_v1 = vpop.eup %4678  ;;  %v6196_v46 = vld [vmem:[#allocation9 + $0xa8] ss:$16 sps:$4 sm:$0xff]   ;;  %v6199_v56 = vld [vmem:[#allocation9 + $0x84] ss:$16 sps:$4 sm:$0xff]   ;;  %v6202_v63 = vld [vmem:[#allocation9 + $0x8c] ss:$16 sps:$4 sm:$0xff]  }
 0x7c3   :  { %v2730_v19 = vadd.f32 1.0, %v4679_v1  ;;  %v6229_v1 = vld [vmem:[#allocation9 + $0x40] ss:$16 sps:$4 sm:$0xff]  }
 0x7c4   :  { %v2743_v24 = vpack.c.bf16 %v2612_v16, %v2612_v16  ;;  %v6205_v16 = vld [vmem:[#allocation9 + $0x80] ss:$16 sps:$4 sm:$0xff]  }
 0x7c5   :  { %4686 = vrcp.f32 %v2730_v19  ;;  %v6247_v19 = vld [vmem:[#allocation9 + $0x4] ss:$16 sps:$4 sm:$0xff]  }
 0x7c6   :  { %2800 = vmatmul.mubr.bf16.vlgmr.msra.gmra.mxu0 %v2743_v24  ;;  %2841 = vmatmul.mubr.bf16.vlgmr.msra.gmra.mxu1 %v2743_v24  ;;  %v6208_v24 = vld [vmem:[#allocation9 + $0x88] ss:$16 sps:$4 sm:$0xff]  }
 0x7c7   :  { %2898 = vmatpush1.bf16.msra.mxu0 %v4918_v60  ;;  %2939 = vmatpush1.bf16.msra.mxu1 %v4919_v14  ;;  %v6211_v60 = vld [vmem:[#allocation9 + $0x64] ss:$16 sps:$4 sm:$0xff]   ;;  %v6214_v14 = vld [vmem:[#allocation9 + $0x6c] ss:$16 sps:$4 sm:$0xff]  }
 0x7c8   :  { %2899 = vmatprep.subr.bf16.mxu0 %v4920_v5  ;;  %2940 = vmatprep.subr.bf16.mxu1 %v4921_v58  ;;  %v6217_v5 = vld [vmem:[#allocation9 + $0x60] ss:$16 sps:$4 sm:$0xff]   ;;  %v6220_v58 = vld [vmem:[#allocation9 + $0x68] ss:$16 sps:$4 sm:$0xff]  }
 0x7c9   :  { %2929 = vmatprep.mubr.bf16.mxu0 %v6812_v42  ;;  %2970 = vmatprep.mubr.bf16.mxu1 %v6812_v42 }
 0x7cb   :  { %2900 = vmatpush1.bf16.msra.mxu0 %v4922_v40  ;;  %2941 = vmatpush1.bf16.msra.mxu1 %v4923_v7  ;;  %v6223_v40 = vld [vmem:[#allocation9 + $0x44] ss:$16 sps:$4 sm:$0xff]   ;;  %v6226_v7 = vld [vmem:[#allocation9 + $0x4c] ss:$16 sps:$4 sm:$0xff]  }
 0x7cc   :  { %2901 = vmatprep.subr.bf16.mxu0 %v4924_v31  ;;  %2942 = vmatprep.subr.bf16.mxu1 %v4925_v6  ;;  %v6232_v31 = vld [vmem:[#allocation9 + $0x48] ss:$16 sps:$4 sm:$0xff]   ;;  %v6235_v6 = vld [vmem:[#allocation9 + $0x24] ss:$16 sps:$4 sm:$0xff]  }
 0x7cd   :  { %v4681_v36 = vpop.eup %4680 }
 0x7ce   :  { %v4683_v57 = vpop.eup %4682 }
 0x7cf   :  { %v4685_v49 = vpop.eup %4684  ;;  %2902 = vmatpush1.bf16.msra.mxu0 %v4926_v8  ;;  %2943 = vmatpush1.bf16.msra.mxu1 %v4927_v47  ;;  %v2739_v45 = vmul.f32 %v4683_v57, %v4681_v36  ;;  %v6238_v36 = vld [vmem:[#allocation9 + $0x2c] ss:$16 sps:$4 sm:$0xff]   ;;  %v6241_v57 = vld [vmem:[#allocation9 + $0x20] ss:$16 sps:$4 sm:$0xff]  }
 0x7d0   :  { %v2738_v10 = vmul.f32 %v4685_v49, %v6086_v4  ;;  %2903 = vmatprep.subr.bf16.mxu0 %v4928_v17  ;;  %2944 = vmatprep.subr.bf16.mxu1 %v4929_v61  ;;  %v4935_v4 = vld [vmem:[#allocation10 + $0x68] ss:$16 sps:$4 sm:$0xff]   ;;  %v6250_v8 = vld [vmem:[#allocation9 + $0xc] ss:$16 sps:$4 sm:$0xff]   ;;  %v6253_v47 = vld [vmem:[#allocation9] ss:$16 sps:$4 sm:$0xff]  }
 0x7d1   :  { %v6244_v49 = vld [vmem:[#allocation9 + $0x28] ss:$16 sps:$4 sm:$0xff]  }
 0x7d2   :  { %v6166_v55 = vadd.f32 %v2739_v45, %v2738_v10  ;;  %v4687_v53 = vpop.eup %4686  ;;  %v6256_v10 = vld [vmem:[#allocation9 + $0x8] ss:$16 sps:$4 sm:$0xff]   ;;  %v2745_v45 = vld [vmem:[#allocation2 + $0x7] ss:$8 sm:$0xf] }
 0x7d3   :  { %2904 = vmatpush1.bf16.msra.mxu0 %v4930_v50  ;;  %2945 = vmatpush1.bf16.msra.mxu1 %v4931_v15  ;;  %v2750_v17 = vrot.slane %v2745_v45, %v6978_v62 }
 0x7d4   :  { %4688 = vtanh.f32 %v6166_v55  ;;  %2905 = vmatprep.subr.bf16.mxu0 %v4932_v18  ;;  %2946 = vmatprep.subr.bf16.mxu1 %v4933_v26  ;;  %v2754_v18 = vrot.slane %v2745_v45, %v5498_v11 }
 0x7d7   :  { %2906 = vmatpush1.bf16.msra.mxu0 %v4934_v23  ;;  %2947 = vmatpush1.bf16.msra.mxu1 %v4935_v4 }
 0x7d8   :  { %2907 = vmatprep.subr.bf16.mxu0 %v4936_v27  ;;  %2948 = vmatprep.subr.bf16.mxu1 %v4937_v0 }
 0x7db   :  { %2908 = vmatpush1.bf16.msra.mxu0 %v4938_v22  ;;  %2949 = vmatpush1.bf16.msra.mxu1 %v4939_v32 }
 0x7dc   :  { %2909 = vmatprep.subr.bf16.mxu0 %v4940_v51  ;;  %2950 = vmatprep.subr.bf16.mxu1 %v4941_v52 }
 0x7df   :  { %2910 = vmatpush1.bf16.msra.mxu0 %v4942_v33  ;;  %2951 = vmatpush1.bf16.msra.mxu1 %v4943_v34  ;;  %v2758_v33 = vrot.slane %v2745_v45, %v5493_v9 }
 0x7e0   :  { %2911 = vmatprep.subr.bf16.mxu0 %v4944_v54  ;;  %2952 = vmatprep.subr.bf16.mxu1 %v4945_v35  ;;  %v2762_v54 = vrot.slane %v2745_v45, %v5500_v13 }
 0x7e1   :  { %v4689_v37 = vpop.eup %4688 }
 0x7e2   :  { %v2742_v38 = vmul.f32 %v4689_v37, %v4687_v53 }
 0x7e3   :  { %2912 = vmatpush1.bf16.msra.mxu0 %v4946_v41  ;;  %2953 = vmatpush1.bf16.msra.mxu1 %v4947_v43 }
 0x7e4   :  { %v2873_v12 = vpack.c.bf16 %v2742_v38, %v2742_v38  ;;  %3027 = vmatprep.subr.bf16.mxu0 %v6107_v2  ;;  %3068 = vmatprep.subr.bf16.mxu1 %v6110_v20 }
 0x7e6   :  { %2930 = vmatmul.mubr.bf16.vlgmr.msra.gmra.mxu0 %v2873_v12  ;;  %2971 = vmatmul.mubr.bf16.vlgmr.msra.gmra.mxu1 %v2873_v12  ;;  %v2875_v12 = vld [vmem:[#allocation3 + $0x7] ss:$8 sm:$0xf] }
 0x7e7   :  { %3028 = vmatpush1.bf16.msra.mxu0 %v6113_v21  ;;  %3069 = vmatpush1.bf16.msra.mxu1 %v6116_v25 }
 0x7e8   :  { %3029 = vmatprep.subr.bf16.mxu0 %v6173_v3  ;;  %3070 = vmatprep.subr.bf16.mxu1 %v6176_v44 }
 0x7e9   :  { %3059 = vmatprep.mubr.bf16.mxu0 %v6812_v42  ;;  %3100 = vmatprep.mubr.bf16.mxu1 %v6812_v42 }
 0x7eb   :  { %3030 = vmatpush1.bf16.msra.mxu0 %v6181_v59  ;;  %3071 = vmatpush1.bf16.msra.mxu1 %v6184_v28 }
 0x7ec   :  { %3031 = vmatprep.subr.bf16.mxu0 %v6187_v29  ;;  %3072 = vmatprep.subr.bf16.mxu1 %v6190_v39 }
 0x7ef   :  { %3032 = vmatpush1.bf16.msra.mxu0 %v6193_v30  ;;  %3073 = vmatpush1.bf16.msra.mxu1 %v6196_v46 }
 0x7f0   :  { %3033 = vmatprep.subr.bf16.mxu0 %v6199_v56  ;;  %3074 = vmatprep.subr.bf16.mxu1 %v6202_v63 }
 0x7f3   :  { %3034 = vmatpush1.bf16.msra.mxu0 %v6205_v16  ;;  %3075 = vmatpush1.bf16.msra.mxu1 %v6208_v24 }
 0x7f4   :  { %3035 = vmatprep.subr.bf16.mxu0 %v6211_v60  ;;  %3076 = vmatprep.subr.bf16.mxu1 %v6214_v14 }
 0x7f7   :  { %3036 = vmatpush1.bf16.msra.mxu0 %v6217_v5  ;;  %3077 = vmatpush1.bf16.msra.mxu1 %v6220_v58 }
 0x7f8   :  { %3037 = vmatprep.subr.bf16.mxu0 %v6223_v40  ;;  %3078 = vmatprep.subr.bf16.mxu1 %v6226_v7 }
 0x7fb   :  { %3038 = vmatpush1.bf16.msra.mxu0 %v6229_v1  ;;  %3079 = vmatpush1.bf16.msra.mxu1 %v6232_v31 }
 0x7fc   :  { %3039 = vmatprep.subr.bf16.mxu0 %v6235_v6  ;;  %3080 = vmatprep.subr.bf16.mxu1 %v6238_v36 }
 0x7ff   :  { %3040 = vmatpush1.bf16.msra.mxu0 %v6241_v57  ;;  %3081 = vmatpush1.bf16.msra.mxu1 %v6244_v49 }
 0x800   :  { %3041 = vmatprep.subr.bf16.mxu0 %v6247_v19  ;;  %3082 = vmatprep.subr.bf16.mxu1 %v6250_v8 }
 0x803   :  { %3042 = vmatpush1.bf16.msra.mxu0 %v6253_v47  ;;  %3083 = vmatpush1.bf16.msra.mxu1 %v6256_v10 }
 0x804   :  { %3157 = vmatprep.subr.bf16.mxu0 %v6107_v2  ;;  %3198 = vmatprep.subr.bf16.mxu1 %v6110_v20 }
 0x886   :  { %v2801_v61 = vpop.f32.mrf.mxu0  ;;  %v2842_v50 = vpop.f32.mrf.mxu1 }
 0x887   :  { %v2802_v15 = vadd.f32 %v2801_v61, %v2750_v17  ;;  %v2843_v34 = vadd.f32 %v2842_v50, %v2758_v33  ;;  %v2880_v17 = vrot.slane %v2875_v12, %v6978_v62  ;;  %v2884_v50 = vrot.slane %v2875_v12, %v5498_v11 }
 0x888   :  { %v2803_v26 = vpop.f32.mrf.mxu0  ;;  %v2844_v23 = vpop.f32.mrf.mxu1 }
 0x889   :  { %v4277_v4 = vmul.f32 -1.442695, %v2802_v15  ;;  %v2804_v27 = vadd.f32 %v2803_v26, %v2754_v18  ;;  %v4279_v53 = vmul.f32 -1.442695, %v2843_v34  ;;  %v2845_v37 = vadd.f32 %v2844_v23, %v2762_v54 }
 0x88a   :  { %v2805_v0 = vpop.f32.mrf.mxu0  ;;  %v2846_v22 = vpop.f32.mrf.mxu1 }
 0x88b   :  { %4690 = vpow2.f32 %v4277_v4  ;;  %v4278_v32 = vmul.f32 -1.442695, %v2804_v27 }
 0x88c   :  { %v2806_v51 = vpop.f32.mrf.mxu0  ;;  %v2847_v52 = vpop.f32.mrf.mxu1 }
 0x88d   :  { %4692 = vpow2.f32 %v4278_v32 }
 0x88e   :  { %4694 = vpow2.f32 %v4279_v53 }
 0x898   :  { %v4691_v35 = vpop.eup %4690 }
 0x899   :  { %v2858_v38 = vadd.f32 1.0, %v4691_v35 }
 0x89a   :  { %v4693_v41 = vpop.eup %4692 }
 0x89b   :  { %4696 = vrcp.f32 %v2858_v38  ;;  %v2859_v43 = vadd.f32 1.0, %v4693_v41  ;;  %v4695_v18 = vpop.eup %4694  ;;  %v2888_v41 = vrot.slane %v2875_v12, %v5493_v9 }
 0x89c   :  { %4698 = vtanh.f32 %v2845_v37  ;;  %v2860_v51 = vadd.f32 1.0, %v4695_v18 }
 0x89d   :  { %4700 = vrcp.f32 %v2859_v43 }
 0x8a6   :  { %v2931_v61 = vpop.f32.mrf.mxu0  ;;  %v2972_v15 = vpop.f32.mrf.mxu1 }
 0x8a7   :  { %v2932_v26 = vadd.f32 %v2931_v61, %v2880_v17  ;;  %v2973_v43 = vadd.f32 %v2972_v15, %v2888_v41  ;;  %v2892_v17 = vrot.slane %v2875_v12, %v5500_v13 }
 0x8a8   :  { %v4697_v4 = vpop.eup %4696  ;;  %v2933_v45 = vpop.f32.mrf.mxu0 }
 0x8a9   :  { %v2974_v27 = vpop.f32.mrf.mxu1  ;;  %v4699_v23 = vpop.eup %4698  ;;  %v4280_v0 = vmul.f32 -1.442695, %v2932_v26  ;;  %v2934_v22 = vadd.f32 %v2933_v45, %v2884_v50  ;;  %v4282_v61 = vmul.f32 -1.442695, %v2973_v43 }
 0x8aa   :  { %v4701_v32 = vpop.eup %4700  ;;  %v2935_v52 = vpop.f32.mrf.mxu0  ;;  %v2869_v53 = vmul.f32 %v4699_v23, %v4697_v4  ;;  %v2975_v18 = vadd.f32 %v2974_v27, %v2892_v17 }
 0x8ab   :  { %v2976_v33 = vpop.f32.mrf.mxu1  ;;  %v2868_v34 = vmul.f32 %v4701_v32, %v6158_v48  ;;  %4702 = vpow2.f32 %v4280_v0  ;;  %v4281_v54 = vmul.f32 -1.442695, %v2934_v22 }
 0x8ac   :  { %v2936_v35 = vpop.f32.mrf.mxu0 }
 0x8ad   :  { %v2977_v37 = vpop.f32.mrf.mxu1  ;;  %v6268_v38 = vadd.f32 %v2869_v53, %v2868_v34  ;;  %4704 = vpow2.f32 %v4281_v54  ;;  %v3005_v35 = vld [vmem:[#allocation2 + $0x20] ss:$8 sm:$0xf] }
 0x8ae   :  { %4706 = vrcp.f32 %v2860_v51  ;;  %v3010_v37 = vrot.slane %v3005_v35, %v6978_v62 }
 0x8af   :  { %4708 = vtanh.f32 %v6268_v38 }
 0x8b0   :  { %4710 = vpow2.f32 %v4282_v61  ;;  %v3014_v61 = vrot.slane %v3005_v35, %v5498_v11 }
 0x8b1   :  { %4712 = vtanh.f32 %v2975_v18 }
 0x8b8   :  { %v4703_v26 = vpop.eup %4702 }
 0x8b9   :  { %v2988_v48 = vadd.f32 1.0, %v4703_v26 }
 0x8ba   :  { %v4705_v50 = vpop.eup %4704 }
 0x8bb   :  { %v4707_v4 = vpop.eup %4706  ;;  %4714 = vrcp.f32 %v2988_v48  ;;  %v2989_v45 = vadd.f32 1.0, %v4705_v50 }
 0x8bc   :  { %v4709_v23 = vpop.eup %4708 }
 0x8bd   :  { %4716 = vrcp.f32 %v2989_v45  ;;  %v2872_v0 = vmul.f32 %v4709_v23, %v4707_v4  ;;  %v4711_v12 = vpop.eup %4710 }
 0x8be   :  { %v4713_v15 = vpop.eup %4712  ;;  %v2990_v52 = vadd.f32 1.0, %v4711_v12  ;;  %v3018_v12 = vrot.slane %v3005_v35, %v5493_v9 }
 0x8bf   :  { %v3003_v22 = vpack.c.bf16 %v2872_v0, %v2872_v0 }
 0x8c0   :  { %4718 = vrcp.f32 %v2990_v52 }
 0x8c1   :  { %3060 = vmatmul.mubr.bf16.vlgmr.msra.gmra.mxu0 %v3003_v22  ;;  %3101 = vmatmul.mubr.bf16.vlgmr.msra.gmra.mxu1 %v3003_v22 }
 0x8c2   :  { %3158 = vmatpush1.bf16.msra.mxu0 %v6113_v21  ;;  %3199 = vmatpush1.bf16.msra.mxu1 %v6116_v25 }
 0x8c3   :  { %3159 = vmatprep.subr.bf16.mxu0 %v6173_v3  ;;  %3200 = vmatprep.subr.bf16.mxu1 %v6176_v44 }
 0x8c4   :  { %3189 = vmatprep.mubr.bf16.mxu0 %v6812_v42  ;;  %3230 = vmatprep.mubr.bf16.mxu1 %v6812_v42 }
 0x8c6   :  { %3160 = vmatpush1.bf16.msra.mxu0 %v6181_v59  ;;  %3201 = vmatpush1.bf16.msra.mxu1 %v6184_v28 }
 0x8c7   :  { %3161 = vmatprep.subr.bf16.mxu0 %v6187_v29  ;;  %3202 = vmatprep.subr.bf16.mxu1 %v6190_v39 }
 0x8c8   :  { %v4715_v27 = vpop.eup %4714 }
 0x8c9   :  { %v2999_v32 = vmul.f32 %v4715_v27, %v4713_v15 }
 0x8ca   :  { %v4717_v51 = vpop.eup %4716  ;;  %3162 = vmatpush1.bf16.msra.mxu0 %v6193_v30  ;;  %3203 = vmatpush1.bf16.msra.mxu1 %v6196_v46 }
 0x8cb   :  { %v2998_v33 = vmul.f32 %v4717_v51, %v6166_v55  ;;  %3163 = vmatprep.subr.bf16.mxu0 %v6199_v56  ;;  %3204 = vmatprep.subr.bf16.mxu1 %v6202_v63 }
 0x8cd   :  { %v3000_v34 = vadd.f32 %v2999_v32, %v2998_v33  ;;  %v4719_v55 = vpop.eup %4718  ;;  %v3022_v32 = vrot.slane %v3005_v35, %v5500_v13 }
 0x8ce   :  { %3164 = vmatpush1.bf16.msra.mxu0 %v6205_v16  ;;  %3205 = vmatpush1.bf16.msra.mxu1 %v6208_v24 }
 0x8cf   :  { %4720 = vtanh.f32 %v3000_v34  ;;  %3165 = vmatprep.subr.bf16.mxu0 %v6211_v60  ;;  %3206 = vmatprep.subr.bf16.mxu1 %v6214_v14 }
 0x8d2   :  { %3166 = vmatpush1.bf16.msra.mxu0 %v6217_v5  ;;  %3207 = vmatpush1.bf16.msra.mxu1 %v6220_v58 }
 0x8d3   :  { %3167 = vmatprep.subr.bf16.mxu0 %v6223_v40  ;;  %3208 = vmatprep.subr.bf16.mxu1 %v6226_v7 }
 0x8d6   :  { %3168 = vmatpush1.bf16.msra.mxu0 %v6229_v1  ;;  %3209 = vmatpush1.bf16.msra.mxu1 %v6232_v31 }
 0x8d7   :  { %3169 = vmatprep.subr.bf16.mxu0 %v6235_v6  ;;  %3210 = vmatprep.subr.bf16.mxu1 %v6238_v36 }
 0x8da   :  { %3170 = vmatpush1.bf16.msra.mxu0 %v6241_v57  ;;  %3211 = vmatpush1.bf16.msra.mxu1 %v6244_v49 }
 0x8db   :  { %3171 = vmatprep.subr.bf16.mxu0 %v6247_v19  ;;  %3212 = vmatprep.subr.bf16.mxu1 %v6250_v8 }
 0x8dc   :  { %v4721_v53 = vpop.eup %4720 }
 0x8dd   :  { %v6304_v54 = vmul.f32 %v4721_v53, %v4719_v55 }
 0x8de   :  { %3172 = vmatpush1.bf16.msra.mxu0 %v6253_v47  ;;  %3213 = vmatpush1.bf16.msra.mxu1 %v6256_v10 }
 0x8df   :  { %3287 = vmatprep.subr.bf16.mxu0 %v6107_v2  ;;  %3328 = vmatprep.subr.bf16.mxu1 %v6110_v20 }
 0x981   :  { %v3061_v41 = vpop.f32.mrf.mxu0  ;;  %v3102_v43 = vpop.f32.mrf.mxu1 }
 0x982   :  { %v3062_v17 = vadd.f32 %v3061_v41, %v3010_v37  ;;  %v3103_v15 = vadd.f32 %v3102_v43, %v3018_v12 }
 0x983   :  { %v3063_v18 = vpop.f32.mrf.mxu0  ;;  %v3104_v26 = vpop.f32.mrf.mxu1 }
 0x984   :  { %v4283_v48 = vmul.f32 -1.442695, %v3062_v17  ;;  %v3064_v50 = vadd.f32 %v3063_v18, %v3014_v61  ;;  %v4285_v27 = vmul.f32 -1.442695, %v3103_v15  ;;  %v3105_v52 = vadd.f32 %v3104_v26, %v3022_v32 }
 0x985   :  { %v3065_v4 = vpop.f32.mrf.mxu0  ;;  %v3106_v45 = vpop.f32.mrf.mxu1 }
 0x986   :  { %4722 = vpow2.f32 %v4283_v48  ;;  %v4284_v23 = vmul.f32 -1.442695, %v3064_v50 }
 0x987   :  { %v3066_v0 = vpop.f32.mrf.mxu0  ;;  %v3107_v22 = vpop.f32.mrf.mxu1 }
 0x988   :  { %4724 = vpow2.f32 %v4284_v23 }
 0x989   :  { %4726 = vpow2.f32 %v4285_v27 }
 0x993   :  { %v4723_v51 = vpop.eup %4722 }
 0x994   :  { %v3118_v33 = vadd.f32 1.0, %v4723_v51 }
 0x995   :  { %v4725_v34 = vpop.eup %4724 }
 0x996   :  { %4728 = vrcp.f32 %v3118_v33  ;;  %v3119_v55 = vadd.f32 1.0, %v4725_v34  ;;  %v4727_v53 = vpop.eup %4726 }
 0x997   :  { %4730 = vtanh.f32 %v3105_v52  ;;  %v3120_v61 = vadd.f32 1.0, %v4727_v53 }
 0x998   :  { %4732 = vrcp.f32 %v3119_v55 }
 0x999   :  { %4734 = vrcp.f32 %v3120_v61 }
 0x9a3   :  { %v4729_v37 = vpop.eup %4728 }
 0x9a4   :  { %v4731_v41 = vpop.eup %4730 }
 0x9a5   :  { %v4733_v17 = vpop.eup %4732  ;;  %v3129_v43 = vmul.f32 %v4731_v41, %v4729_v37 }
 0x9a6   :  { %v3128_v18 = vmul.f32 %v4733_v17, %v6268_v38  ;;  %v4735_v35 = vpop.eup %4734  ;;  %v3135_v38 = vld [vmem:[#allocation2 + $0x21] ss:$8 sm:$0xf] }
 0x9a7   :  { %v3140_v45 = vrot.slane %v3135_v38, %v6978_v62  ;;  %v3144_v12 = vrot.slane %v3135_v38, %v5498_v11  ;;  %v3148_v37 = vrot.slane %v3135_v38, %v5493_v9  ;;  %v3152_v61 = vrot.slane %v3135_v38, %v5500_v13 }
 0x9a8   :  { %v6315_v48 = vadd.f32 %v3129_v43, %v3128_v18 }
 0x9aa   :  { %4736 = vtanh.f32 %v6315_v48 }
 0x9b7   :  { %v4737_v26 = vpop.eup %4736 }
 0x9b8   :  { %v3132_v50 = vmul.f32 %v4737_v26, %v4735_v35 }
 0x9ba   :  { %v3133_v4 = vpack.c.bf16 %v3132_v50, %v3132_v50 }
 0x9bc   :  { %3190 = vmatmul.mubr.bf16.vlgmr.msra.gmra.mxu0 %v3133_v4  ;;  %3231 = vmatmul.mubr.bf16.vlgmr.msra.gmra.mxu1 %v3133_v4 }
 0x9bd   :  { %3288 = vmatpush1.bf16.msra.mxu0 %v6113_v21  ;;  %3329 = vmatpush1.bf16.msra.mxu1 %v6116_v25 }
 0x9be   :  { %3289 = vmatprep.subr.bf16.mxu0 %v6173_v3  ;;  %3330 = vmatprep.subr.bf16.mxu1 %v6176_v44 }
 0x9bf   :  { %3319 = vmatprep.mubr.bf16.mxu0 %v6812_v42  ;;  %3360 = vmatprep.mubr.bf16.mxu1 %v6812_v42 }
 0x9c1   :  { %3290 = vmatpush1.bf16.msra.mxu0 %v6181_v59  ;;  %3331 = vmatpush1.bf16.msra.mxu1 %v6184_v28 }
 0x9c2   :  { %3291 = vmatprep.subr.bf16.mxu0 %v6187_v29  ;;  %3332 = vmatprep.subr.bf16.mxu1 %v6190_v39 }
 0x9c5   :  { %3292 = vmatpush1.bf16.msra.mxu0 %v6193_v30  ;;  %3333 = vmatpush1.bf16.msra.mxu1 %v6196_v46 }
 0x9c6   :  { %3293 = vmatprep.subr.bf16.mxu0 %v6199_v56  ;;  %3334 = vmatprep.subr.bf16.mxu1 %v6202_v63 }
 0x9c9   :  { %3294 = vmatpush1.bf16.msra.mxu0 %v6205_v16  ;;  %3335 = vmatpush1.bf16.msra.mxu1 %v6208_v24 }
 0x9ca   :  { %3295 = vmatprep.subr.bf16.mxu0 %v6211_v60  ;;  %3336 = vmatprep.subr.bf16.mxu1 %v6214_v14 }
 0x9cd   :  { %3296 = vmatpush1.bf16.msra.mxu0 %v6217_v5  ;;  %3337 = vmatpush1.bf16.msra.mxu1 %v6220_v58 }
 0x9ce   :  { %3297 = vmatprep.subr.bf16.mxu0 %v6223_v40  ;;  %3338 = vmatprep.subr.bf16.mxu1 %v6226_v7 }
 0x9d1   :  { %3298 = vmatpush1.bf16.msra.mxu0 %v6229_v1  ;;  %3339 = vmatpush1.bf16.msra.mxu1 %v6232_v31 }
 0x9d2   :  { %3299 = vmatprep.subr.bf16.mxu0 %v6235_v6  ;;  %3340 = vmatprep.subr.bf16.mxu1 %v6238_v36 }
 0x9d5   :  { %3300 = vmatpush1.bf16.msra.mxu0 %v6241_v57  ;;  %3341 = vmatpush1.bf16.msra.mxu1 %v6244_v49 }
 0x9d6   :  { %3301 = vmatprep.subr.bf16.mxu0 %v6247_v19  ;;  %3342 = vmatprep.subr.bf16.mxu1 %v6250_v8 }
 0x9d9   :  { %3302 = vmatpush1.bf16.msra.mxu0 %v6253_v47  ;;  %3343 = vmatpush1.bf16.msra.mxu1 %v6256_v10 }
 0x9da   :  { %3417 = vmatprep.subr.bf16.mxu0 %v6107_v2  ;;  %3458 = vmatprep.subr.bf16.mxu1 %v6110_v20 }
 0xa7c   :  { %v3191_v23 = vpop.f32.mrf.mxu0  ;;  %v3232_v0 = vpop.f32.mrf.mxu1 }
 0xa7d   :  { %v3192_v22 = vadd.f32 %v3191_v23, %v3140_v45  ;;  %v3233_v41 = vadd.f32 %v3232_v0, %v3148_v37 }
 0xa7e   :  { %v3193_v15 = vpop.f32.mrf.mxu0  ;;  %v3234_v27 = vpop.f32.mrf.mxu1 }
 0xa7f   :  { %v4286_v32 = vmul.f32 -1.442695, %v3192_v22  ;;  %v3194_v51 = vadd.f32 %v3193_v15, %v3144_v12  ;;  %v4288_v17 = vmul.f32 -1.442695, %v3233_v41  ;;  %v3235_v43 = vadd.f32 %v3234_v27, %v3152_v61 }
 0xa80   :  { %v3195_v52 = vpop.f32.mrf.mxu0  ;;  %v3236_v33 = vpop.f32.mrf.mxu1 }
 0xa81   :  { %4738 = vpow2.f32 %v4286_v32  ;;  %v4287_v34 = vmul.f32 -1.442695, %v3194_v51 }
 0xa82   :  { %v3196_v55 = vpop.f32.mrf.mxu0  ;;  %v3237_v53 = vpop.f32.mrf.mxu1 }
 0xa83   :  { %4740 = vpow2.f32 %v4287_v34 }
 0xa84   :  { %4742 = vpow2.f32 %v4288_v17 }
 0xa8e   :  { %v4739_v18 = vpop.eup %4738 }
 0xa8f   :  { %v3248_v35 = vadd.f32 1.0, %v4739_v18 }
 0xa90   :  { %v4741_v26 = vpop.eup %4740 }
 0xa91   :  { %4744 = vrcp.f32 %v3248_v35  ;;  %v3249_v50 = vadd.f32 1.0, %v4741_v26  ;;  %v4743_v4 = vpop.eup %4742 }
 0xa92   :  { %4746 = vtanh.f32 %v3235_v43  ;;  %v3250_v12 = vadd.f32 1.0, %v4743_v4 }
 0xa93   :  { %4748 = vrcp.f32 %v3249_v50 }
 0xa94   :  { %4750 = vrcp.f32 %v3250_v12 }
 0xa9e   :  { %v4745_v45 = vpop.eup %4744 }
 0xa9f   :  { %v4747_v23 = vpop.eup %4746 }
 0xaa0   :  { %v4749_v22 = vpop.eup %4748  ;;  %v3259_v0 = vmul.f32 %v4747_v23, %v4745_v45 }
 0xaa1   :  { %v3258_v15 = vmul.f32 %v4749_v22, %v6315_v48  ;;  %v4751_v38 = vpop.eup %4750 }
 0xaa3   :  { %v6357_v32 = vadd.f32 %v3259_v0, %v3258_v15 }
 0xaa5   :  { %4752 = vtanh.f32 %v6357_v32 }
 0xab2   :  { %v4753_v27 = vpop.eup %4752 }
 0xab3   :  { %v3262_v51 = vmul.f32 %v4753_v27, %v4751_v38 }
 0xab5   :  { %v3263_v52 = vpack.c.bf16 %v3262_v51, %v3262_v51 }
 0xab7   :  { %3320 = vmatmul.mubr.bf16.vlgmr.msra.gmra.mxu0 %v3263_v52  ;;  %3361 = vmatmul.mubr.bf16.vlgmr.msra.gmra.mxu1 %v3263_v52 }
 0xab8   :  { %3418 = vmatpush1.bf16.msra.mxu0 %v6113_v21  ;;  %3459 = vmatpush1.bf16.msra.mxu1 %v6116_v25  ;;  %v3265_v21 = vld [vmem:[#allocation2 + $0x22] ss:$8 sm:$0xf] }
 0xab9   :  { %3419 = vmatprep.subr.bf16.mxu0 %v6173_v3  ;;  %3460 = vmatprep.subr.bf16.mxu1 %v6176_v44  ;;  %v3270_v25 = vrot.slane %v3265_v21, %v6978_v62  ;;  %v3274_v55 = vrot.slane %v3265_v21, %v5498_v11  ;;  %v3282_v4 = vrot.slane %v3265_v21, %v5500_v13 }
 0xaba   :  { %3449 = vmatprep.mubr.bf16.mxu0 %v6812_v42  ;;  %3490 = vmatprep.mubr.bf16.mxu1 %v6812_v42 }
 0xabc   :  { %3420 = vmatpush1.bf16.msra.mxu0 %v6181_v59  ;;  %3461 = vmatpush1.bf16.msra.mxu1 %v6184_v28 }
 0xabd   :  { %3421 = vmatprep.subr.bf16.mxu0 %v6187_v29  ;;  %3462 = vmatprep.subr.bf16.mxu1 %v6190_v39 }
 0xac0   :  { %3422 = vmatpush1.bf16.msra.mxu0 %v6193_v30  ;;  %3463 = vmatpush1.bf16.msra.mxu1 %v6196_v46 }
 0xac1   :  { %3423 = vmatprep.subr.bf16.mxu0 %v6199_v56  ;;  %3464 = vmatprep.subr.bf16.mxu1 %v6202_v63 }
 0xac4   :  { %3424 = vmatpush1.bf16.msra.mxu0 %v6205_v16  ;;  %3465 = vmatpush1.bf16.msra.mxu1 %v6208_v24 }
 0xac5   :  { %3425 = vmatprep.subr.bf16.mxu0 %v6211_v60  ;;  %3466 = vmatprep.subr.bf16.mxu1 %v6214_v14 }
 0xac8   :  { %3426 = vmatpush1.bf16.msra.mxu0 %v6217_v5  ;;  %3467 = vmatpush1.bf16.msra.mxu1 %v6220_v58 }
 0xac9   :  { %3427 = vmatprep.subr.bf16.mxu0 %v6223_v40  ;;  %3468 = vmatprep.subr.bf16.mxu1 %v6226_v7 }
 0xacc   :  { %3428 = vmatpush1.bf16.msra.mxu0 %v6229_v1  ;;  %3469 = vmatpush1.bf16.msra.mxu1 %v6232_v31 }
 0xacd   :  { %3429 = vmatprep.subr.bf16.mxu0 %v6235_v6  ;;  %3470 = vmatprep.subr.bf16.mxu1 %v6238_v36 }
 0xad0   :  { %3430 = vmatpush1.bf16.msra.mxu0 %v6241_v57  ;;  %3471 = vmatpush1.bf16.msra.mxu1 %v6244_v49 }
 0xad1   :  { %3431 = vmatprep.subr.bf16.mxu0 %v6247_v19  ;;  %3472 = vmatprep.subr.bf16.mxu1 %v6250_v8 }
 0xad4   :  { %3432 = vmatpush1.bf16.msra.mxu0 %v6253_v47  ;;  %3473 = vmatpush1.bf16.msra.mxu1 %v6256_v10 }
 0xad5   :  { %3547 = vmatprep.subr.bf16.mxu0 %v6107_v2  ;;  %3588 = vmatprep.subr.bf16.mxu1 %v6110_v20  ;;  %v3278_v20 = vrot.slane %v3265_v21, %v5493_v9 }
 0xb77   :  { %v3321_v48 = vpop.f32.mrf.mxu0  ;;  %v3362_v33 = vpop.f32.mrf.mxu1 }
 0xb78   :  { %v3322_v34 = vadd.f32 %v3321_v48, %v3270_v25  ;;  %v3363_v26 = vadd.f32 %v3362_v33, %v3278_v20 }
 0xb79   :  { %v3323_v53 = vpop.f32.mrf.mxu0  ;;  %v3364_v37 = vpop.f32.mrf.mxu1 }
 0xb7a   :  { %v4289_v41 = vmul.f32 -1.442695, %v3322_v34  ;;  %v3324_v17 = vadd.f32 %v3323_v53, %v3274_v55  ;;  %v4291_v50 = vmul.f32 -1.442695, %v3363_v26  ;;  %v3365_v23 = vadd.f32 %v3364_v37, %v3282_v4  ;;  %v6402_v37 = vld [vmem:[#allocation9 + $0xe0] ss:$16 sps:$4 sm:$0xff]  }
 0xb7b   :  { %v3325_v61 = vpop.f32.mrf.mxu0  ;;  %v3366_v18 = vpop.f32.mrf.mxu1 }
 0xb7c   :  { %4754 = vpow2.f32 %v4289_v41  ;;  %v4290_v43 = vmul.f32 -1.442695, %v3324_v17  ;;  %v6405_v41 = vld [vmem:[#allocation9 + $0xe8] ss:$16 sps:$4 sm:$0xff]   ;;  %v6441_v17 = vld [vmem:[#allocation9 + $0xec] ss:$16 sps:$4 sm:$0xff]  }
 0xb7d   :  { %v3326_v35 = vpop.f32.mrf.mxu0  ;;  %v3367_v2 = vpop.f32.mrf.mxu1  ;;  %v3395_v61 = vld [vmem:[#allocation2 + $0x23] ss:$8 sm:$0xf] }
 0xb7e   :  { %4756 = vpow2.f32 %v4290_v43  ;;  %v3400_v18 = vrot.slane %v3395_v61, %v6978_v62  ;;  %v3404_v20 = vrot.slane %v3395_v61, %v5498_v11 }
 0xb7f   :  { %4758 = vpow2.f32 %v4291_v50 }
 0xb89   :  { %v4755_v45 = vpop.eup %4754 }
 0xb8a   :  { %v3378_v22 = vadd.f32 1.0, %v4755_v45 }
 0xb8b   :  { %v4757_v12 = vpop.eup %4756 }
 0xb8c   :  { %4760 = vrcp.f32 %v3378_v22  ;;  %v3379_v15 = vadd.f32 1.0, %v4757_v12  ;;  %v4759_v0 = vpop.eup %4758 }
 0xb8d   :  { %4762 = vtanh.f32 %v3365_v23  ;;  %v3380_v52 = vadd.f32 1.0, %v4759_v0 }
 0xb8e   :  { %4764 = vrcp.f32 %v3379_v15 }
 0xb8f   :  { %4766 = vrcp.f32 %v3380_v52  ;;  %v3412_v52 = vrot.slane %v3395_v61, %v5500_v13 }
 0xb99   :  { %v4761_v38 = vpop.eup %4760 }
 0xb9a   :  { %v4763_v27 = vpop.eup %4762 }
 0xb9b   :  { %v4765_v51 = vpop.eup %4764  ;;  %v3389_v48 = vmul.f32 %v4763_v27, %v4761_v38  ;;  %v3408_v38 = vrot.slane %v3395_v61, %v5493_v9 }
 0xb9c   :  { %v3388_v25 = vmul.f32 %v4765_v51, %v6357_v32  ;;  %v4767_v21 = vpop.eup %4766  ;;  %v6438_v32 = vld [vmem:[#allocation9 + $0xe4] ss:$16 sps:$4 sm:$0xff]  }
 0xb9e   :  { %v6399_v33 = vadd.f32 %v3389_v48, %v3388_v25 }
 0xba0   :  { %4768 = vtanh.f32 %v6399_v33 }
 0xbad   :  { %v4769_v34 = vpop.eup %4768 }
 0xbae   :  { %v3392_v55 = vmul.f32 %v4769_v34, %v4767_v21 }
 0xbb0   :  { %v3393_v53 = vpack.c.bf16 %v3392_v55, %v3392_v55 }
 0xbb2   :  { %3450 = vmatmul.mubr.bf16.vlgmr.msra.gmra.mxu0 %v3393_v53  ;;  %3491 = vmatmul.mubr.bf16.vlgmr.msra.gmra.mxu1 %v3393_v53 }
 0xbb3   :  { %3548 = vmatpush1.bf16.msra.mxu0 %v6402_v37  ;;  %3589 = vmatpush1.bf16.msra.mxu1 %v6405_v41 }
 0xbb4   :  { %3549 = vmatprep.subr.bf16.mxu0 %v6173_v3  ;;  %3590 = vmatprep.subr.bf16.mxu1 %v6176_v44 }
 0xbb5   :  { %3579 = vmatprep.mubr.bf16.mxu0 %v6812_v42  ;;  %3620 = vmatprep.mubr.bf16.mxu1 %v6812_v42 }
 0xbb7   :  { %3550 = vmatpush1.bf16.msra.mxu0 %v6181_v59  ;;  %3591 = vmatpush1.bf16.msra.mxu1 %v6184_v28 }
 0xbb8   :  { %3551 = vmatprep.subr.bf16.mxu0 %v6187_v29  ;;  %3592 = vmatprep.subr.bf16.mxu1 %v6190_v39 }
 0xbbb   :  { %3552 = vmatpush1.bf16.msra.mxu0 %v6193_v30  ;;  %3593 = vmatpush1.bf16.msra.mxu1 %v6196_v46 }
 0xbbc   :  { %3553 = vmatprep.subr.bf16.mxu0 %v6199_v56  ;;  %3594 = vmatprep.subr.bf16.mxu1 %v6202_v63 }
 0xbbf   :  { %3554 = vmatpush1.bf16.msra.mxu0 %v6205_v16  ;;  %3595 = vmatpush1.bf16.msra.mxu1 %v6208_v24 }
 0xbc0   :  { %3555 = vmatprep.subr.bf16.mxu0 %v6211_v60  ;;  %3596 = vmatprep.subr.bf16.mxu1 %v6214_v14 }
 0xbc3   :  { %3556 = vmatpush1.bf16.msra.mxu0 %v6217_v5  ;;  %3597 = vmatpush1.bf16.msra.mxu1 %v6220_v58 }
 0xbc4   :  { %3557 = vmatprep.subr.bf16.mxu0 %v6223_v40  ;;  %3598 = vmatprep.subr.bf16.mxu1 %v6226_v7 }
 0xbc7   :  { %3558 = vmatpush1.bf16.msra.mxu0 %v6229_v1  ;;  %3599 = vmatpush1.bf16.msra.mxu1 %v6232_v31 }
 0xbc8   :  { %3559 = vmatprep.subr.bf16.mxu0 %v6235_v6  ;;  %3600 = vmatprep.subr.bf16.mxu1 %v6238_v36 }
 0xbcb   :  { %3560 = vmatpush1.bf16.msra.mxu0 %v6241_v57  ;;  %3601 = vmatpush1.bf16.msra.mxu1 %v6244_v49 }
 0xbcc   :  { %3561 = vmatprep.subr.bf16.mxu0 %v6247_v19  ;;  %3602 = vmatprep.subr.bf16.mxu1 %v6250_v8 }
 0xbcf   :  { %3562 = vmatpush1.bf16.msra.mxu0 %v6253_v47  ;;  %3603 = vmatpush1.bf16.msra.mxu1 %v6256_v10 }
 0xbd0   :  { %3677 = vmatprep.subr.bf16.mxu0 %v6438_v32  ;;  %3718 = vmatprep.subr.bf16.mxu1 %v6441_v17 }
 0xc72   :  { %v3451_v43 = vpop.f32.mrf.mxu0  ;;  %v3492_v35 = vpop.f32.mrf.mxu1 }
 0xc73   :  { %v3452_v2 = vadd.f32 %v3451_v43, %v3400_v18  ;;  %v3493_v27 = vadd.f32 %v3492_v35, %v3408_v38 }
 0xc74   :  { %v3453_v26 = vpop.f32.mrf.mxu0  ;;  %v3494_v50 = vpop.f32.mrf.mxu1 }
 0xc75   :  { %v4292_v4 = vmul.f32 -1.442695, %v3452_v2  ;;  %v3454_v45 = vadd.f32 %v3453_v26, %v3404_v20  ;;  %v4294_v51 = vmul.f32 -1.442695, %v3493_v27  ;;  %v3495_v48 = vadd.f32 %v3494_v50, %v3412_v52  ;;  %v6496_v52 = vld [vmem:[#allocation9 + $0xc4] ss:$16 sps:$4 sm:$0xff]  }
 0xc76   :  { %v3455_v23 = vpop.f32.mrf.mxu0  ;;  %v3496_v22 = vpop.f32.mrf.mxu1 }
 0xc77   :  { %4770 = vpow2.f32 %v4292_v4  ;;  %v4293_v12 = vmul.f32 -1.442695, %v3454_v45 }
 0xc78   :  { %v3456_v15 = vpop.f32.mrf.mxu0  ;;  %v3497_v0 = vpop.f32.mrf.mxu1 }
 0xc79   :  { %4772 = vpow2.f32 %v4293_v12 }
 0xc7a   :  { %4774 = vpow2.f32 %v4294_v51 }
 0xc84   :  { %v4771_v25 = vpop.eup %4770 }
 0xc85   :  { %v3508_v21 = vadd.f32 1.0, %v4771_v25  ;;  %v6499_v25 = vld [vmem:[#allocation9 + $0xcc] ss:$16 sps:$4 sm:$0xff]  }
 0xc86   :  { %v4773_v34 = vpop.eup %4772 }
 0xc87   :  { %4776 = vrcp.f32 %v3508_v21  ;;  %v3509_v55 = vadd.f32 1.0, %v4773_v34  ;;  %v4775_v53 = vpop.eup %4774  ;;  %v6507_v21 = vld [vmem:[#allocation9 + $0xc8] ss:$16 sps:$4 sm:$0xff]   ;;  %v6510_v34 = vld [vmem:[#allocation9 + $0xa4] ss:$16 sps:$4 sm:$0xff]  }
 0xc88   :  { %4778 = vtanh.f32 %v3495_v48  ;;  %v3510_v20 = vadd.f32 1.0, %v4775_v53  ;;  %v6504_v48 = vld [vmem:[#allocation9 + $0xc0] ss:$16 sps:$4 sm:$0xff]  }
 0xc89   :  { %4780 = vrcp.f32 %v3509_v55  ;;  %v6513_v55 = vld [vmem:[#allocation9 + $0xac] ss:$16 sps:$4 sm:$0xff]   ;;  %v6516_v53 = vld [vmem:[#allocation9 + $0xa0] ss:$16 sps:$4 sm:$0xff]  }
 0xc8a   :  { %4782 = vrcp.f32 %v3510_v20  ;;  %v6528_v20 = vld [vmem:[#allocation9 + $0x80] ss:$16 sps:$4 sm:$0xff]  }
 0xc94   :  { %v4777_v18 = vpop.eup %4776 }
 0xc95   :  { %v4779_v43 = vpop.eup %4778 }
 0xc96   :  { %v4781_v2 = vpop.eup %4780  ;;  %v3519_v35 = vmul.f32 %v4779_v43, %v4777_v18  ;;  %v6519_v18 = vld [vmem:[#allocation9 + $0xa8] ss:$16 sps:$4 sm:$0xff]   ;;  %v6522_v43 = vld [vmem:[#allocation9 + $0x84] ss:$16 sps:$4 sm:$0xff]  }
 0xc97   :  { %v3518_v26 = vmul.f32 %v4781_v2, %v6399_v33  ;;  %v4783_v61 = vpop.eup %4782  ;;  %v6525_v2 = vld [vmem:[#allocation9 + $0x8c] ss:$16 sps:$4 sm:$0xff]  }
 0xc99   :  { %v6449_v4 = vadd.f32 %v3519_v35, %v3518_v26  ;;  %v6531_v26 = vld [vmem:[#allocation9 + $0x88] ss:$16 sps:$4 sm:$0xff]   ;;  %v6534_v35 = vld [vmem:[#allocation9 + $0x64] ss:$16 sps:$4 sm:$0xff]  }
 0xc9b   :  { %4784 = vtanh.f32 %v6449_v4 }
 0xca8   :  { %v4785_v50 = vpop.eup %4784 }
 0xca9   :  { %v3522_v45 = vmul.f32 %v4785_v50, %v4783_v61  ;;  %v6540_v61 = vld [vmem:[#allocation9 + $0x60] ss:$16 sps:$4 sm:$0xff]   ;;  %v6543_v50 = vld [vmem:[#allocation9 + $0x68] ss:$16 sps:$4 sm:$0xff]  }
 0xcab   :  { %v3523_v23 = vpack.c.bf16 %v3522_v45, %v3522_v45  ;;  %v6546_v45 = vld [vmem:[#allocation9 + $0x44] ss:$16 sps:$4 sm:$0xff]  }
 0xcad   :  { %3580 = vmatmul.mubr.bf16.vlgmr.msra.gmra.mxu0 %v3523_v23  ;;  %3621 = vmatmul.mubr.bf16.vlgmr.msra.gmra.mxu1 %v3523_v23  ;;  %v6549_v23 = vld [vmem:[#allocation9 + $0x4c] ss:$16 sps:$4 sm:$0xff]  }
 0xcae   :  { %3678 = vmatpush1.bf16.msra.mxu0 %v6402_v37  ;;  %3719 = vmatpush1.bf16.msra.mxu1 %v6405_v41 }
 0xcaf   :  { %3679 = vmatprep.subr.bf16.mxu0 %v6173_v3  ;;  %3720 = vmatprep.subr.bf16.mxu1 %v6176_v44  ;;  %v3525_v3 = vld [vmem:[#allocation2 + $0x24] ss:$8 sm:$0xf] }
 0xcb0   :  { %3709 = vmatprep.mubr.bf16.mxu0 %v6812_v42  ;;  %3750 = vmatprep.mubr.bf16.mxu1 %v6812_v42  ;;  %v3530_v44 = vrot.slane %v3525_v3, %v6978_v62 }
 0xcb2   :  { %3680 = vmatpush1.bf16.msra.mxu0 %v6181_v59  ;;  %3721 = vmatpush1.bf16.msra.mxu1 %v6184_v28 }
 0xcb3   :  { %3681 = vmatprep.subr.bf16.mxu0 %v6187_v29  ;;  %3722 = vmatprep.subr.bf16.mxu1 %v6190_v39  ;;  %v3534_v39 = vrot.slane %v3525_v3, %v5498_v11 }
 0xcb6   :  { %3682 = vmatpush1.bf16.msra.mxu0 %v6193_v30  ;;  %3723 = vmatpush1.bf16.msra.mxu1 %v6196_v46 }
 0xcb7   :  { %3683 = vmatprep.subr.bf16.mxu0 %v6199_v56  ;;  %3724 = vmatprep.subr.bf16.mxu1 %v6202_v63 }
 0xcba   :  { %3684 = vmatpush1.bf16.msra.mxu0 %v6205_v16  ;;  %3725 = vmatpush1.bf16.msra.mxu1 %v6208_v24 }
 0xcbb   :  { %3685 = vmatprep.subr.bf16.mxu0 %v6211_v60  ;;  %3726 = vmatprep.subr.bf16.mxu1 %v6214_v14 }
 0xcbe   :  { %3686 = vmatpush1.bf16.msra.mxu0 %v6217_v5  ;;  %3727 = vmatpush1.bf16.msra.mxu1 %v6220_v58  ;;  %v3538_v58 = vrot.slane %v3525_v3, %v5493_v9 }
 0xcbf   :  { %3687 = vmatprep.subr.bf16.mxu0 %v6223_v40  ;;  %3728 = vmatprep.subr.bf16.mxu1 %v6226_v7 }
 0xcc2   :  { %3688 = vmatpush1.bf16.msra.mxu0 %v6229_v1  ;;  %3729 = vmatpush1.bf16.msra.mxu1 %v6232_v31  ;;  %v3542_v1 = vrot.slane %v3525_v3, %v5500_v13  ;;  %v6552_v3 = vld [vmem:[#allocation9 + $0x40] ss:$16 sps:$4 sm:$0xff]  }
 0xcc3   :  { %3689 = vmatprep.subr.bf16.mxu0 %v6235_v6  ;;  %3730 = vmatprep.subr.bf16.mxu1 %v6238_v36 }
 0xcc6   :  { %3690 = vmatpush1.bf16.msra.mxu0 %v6241_v57  ;;  %3731 = vmatpush1.bf16.msra.mxu1 %v6244_v49 }
 0xcc7   :  { %3691 = vmatprep.subr.bf16.mxu0 %v6247_v19  ;;  %3732 = vmatprep.subr.bf16.mxu1 %v6250_v8 }
 0xcca   :  { %3692 = vmatpush1.bf16.msra.mxu0 %v6253_v47  ;;  %3733 = vmatpush1.bf16.msra.mxu1 %v6256_v10 }
 0xccb   :  { %3807 = vmatprep.subr.bf16.mxu0 %v6438_v32  ;;  %3848 = vmatprep.subr.bf16.mxu1 %v6441_v17 }
 0xd6d   :  { %v3581_v59 = vpop.f32.mrf.mxu0  ;;  %v3622_v28 = vpop.f32.mrf.mxu1 }
 0xd6e   :  { %v3582_v29 = vadd.f32 %v3581_v59, %v3530_v44  ;;  %v3623_v40 = vadd.f32 %v3622_v28, %v3538_v58  ;;  %v6555_v44 = vld [vmem:[#allocation9 + $0x48] ss:$16 sps:$4 sm:$0xff]   ;;  %v6558_v59 = vld [vmem:[#allocation9 + $0x24] ss:$16 sps:$4 sm:$0xff]   ;;  %v6561_v28 = vld [vmem:[#allocation9 + $0x2c] ss:$16 sps:$4 sm:$0xff]  }
 0xd6f   :  { %v3583_v30 = vpop.f32.mrf.mxu0  ;;  %v3624_v46 = vpop.f32.mrf.mxu1 }
 0xd70   :  { %v4295_v56 = vmul.f32 -1.442695, %v3582_v29  ;;  %v3584_v63 = vadd.f32 %v3583_v30, %v3534_v39  ;;  %v4297_v7 = vmul.f32 -1.442695, %v3623_v40  ;;  %v3625_v6 = vadd.f32 %v3624_v46, %v3542_v1  ;;  %v6564_v29 = vld [vmem:[#allocation9 + $0x20] ss:$16 sps:$4 sm:$0xff]  }
 0xd71   :  { %v3585_v16 = vpop.f32.mrf.mxu0  ;;  %v3626_v24 = vpop.f32.mrf.mxu1  ;;  %v6567_v39 = vld [vmem:[#allocation9 + $0x28] ss:$16 sps:$4 sm:$0xff]   ;;  %v6570_v30 = vld [vmem:[#allocation9 + $0x4] ss:$16 sps:$4 sm:$0xff]   ;;  %v6573_v46 = vld [vmem:[#allocation9 + $0xc] ss:$16 sps:$4 sm:$0xff]  }
 0xd72   :  { %4786 = vpow2.f32 %v4295_v56  ;;  %v4296_v60 = vmul.f32 -1.442695, %v3584_v63  ;;  %v6576_v56 = vld [vmem:[#allocation9] ss:$16 sps:$4 sm:$0xff]   ;;  %v6579_v63 = vld [vmem:[#allocation9 + $0x8] ss:$16 sps:$4 sm:$0xff]  }
 0xd73   :  { %v3586_v14 = vpop.f32.mrf.mxu0  ;;  %v3627_v5 = vpop.f32.mrf.mxu1  ;;  %v3655_v16 = vld [vmem:[#allocation2 + $0x25] ss:$8 sm:$0xf] }
 0xd74   :  { %4788 = vpow2.f32 %v4296_v60  ;;  %v3660_v24 = vrot.slane %v3655_v16, %v6978_v62  ;;  %v3664_v58 = vrot.slane %v3655_v16, %v5498_v11 }
 0xd75   :  { %4790 = vpow2.f32 %v4297_v7 }
 0xd7f   :  { %v4787_v31 = vpop.eup %4786 }
 0xd80   :  { %v3638_v36 = vadd.f32 1.0, %v4787_v31 }
 0xd81   :  { %v4789_v57 = vpop.eup %4788 }
 0xd82   :  { %4792 = vrcp.f32 %v3638_v36  ;;  %v3639_v49 = vadd.f32 1.0, %v4789_v57  ;;  %v4791_v19 = vpop.eup %4790 }
 0xd83   :  { %4794 = vtanh.f32 %v3625_v6  ;;  %v3640_v33 = vadd.f32 1.0, %v4791_v19 }
 0xd84   :  { %4796 = vrcp.f32 %v3639_v49 }
 0xd85   :  { %4798 = vrcp.f32 %v3640_v33 }
 0xd8f   :  { %v4793_v8 = vpop.eup %4792 }
 0xd90   :  { %v4795_v47 = vpop.eup %4794 }
 0xd91   :  { %v4797_v10 = vpop.eup %4796  ;;  %v3649_v12 = vmul.f32 %v4795_v47, %v4793_v8  ;;  %v3672_v47 = vrot.slane %v3655_v16, %v5500_v13 }
 0xd92   :  { %v3648_v22 = vmul.f32 %v4797_v10, %v6449_v4  ;;  %v4799_v0 = vpop.eup %4798  ;;  %v6537_v4 = vld [vmem:[#allocation9 + $0x6c] ss:$16 sps:$4 sm:$0xff]  }
 0xd94   :  { %v6491_v15 = vadd.f32 %v3649_v12, %v3648_v22 }
 0xd96   :  { %4800 = vtanh.f32 %v6491_v15 }
 0xda3   :  { %v4801_v38 = vpop.eup %4800 }
 0xda4   :  { %v3652_v27 = vmul.f32 %v4801_v38, %v4799_v0 }
 0xda6   :  { %v3653_v51 = vpack.c.bf16 %v3652_v27, %v3652_v27 }
 0xda8   :  { %3710 = vmatmul.mubr.bf16.vlgmr.msra.gmra.mxu0 %v3653_v51  ;;  %3751 = vmatmul.mubr.bf16.vlgmr.msra.gmra.mxu1 %v3653_v51 }
 0xda9   :  { %3808 = vmatpush1.bf16.msra.mxu0 %v6402_v37  ;;  %3849 = vmatpush1.bf16.msra.mxu1 %v6405_v41 }
 0xdaa   :  { %3809 = vmatprep.subr.bf16.mxu0 %v6496_v52  ;;  %3850 = vmatprep.subr.bf16.mxu1 %v6499_v25 }
 0xdab   :  { %3839 = vmatprep.mubr.bf16.mxu0 %v6812_v42  ;;  %3880 = vmatprep.mubr.bf16.mxu1 %v6812_v42 }
 0xdad   :  { %3810 = vmatpush1.bf16.msra.mxu0 %v6504_v48  ;;  %3851 = vmatpush1.bf16.msra.mxu1 %v6507_v21 }
 0xdae   :  { %3811 = vmatprep.subr.bf16.mxu0 %v6510_v34  ;;  %3852 = vmatprep.subr.bf16.mxu1 %v6513_v55 }
 0xdb1   :  { %3812 = vmatpush1.bf16.msra.mxu0 %v6516_v53  ;;  %3853 = vmatpush1.bf16.msra.mxu1 %v6519_v18 }
 0xdb2   :  { %3813 = vmatprep.subr.bf16.mxu0 %v6522_v43  ;;  %3854 = vmatprep.subr.bf16.mxu1 %v6525_v2 }
 0xdb5   :  { %3814 = vmatpush1.bf16.msra.mxu0 %v6528_v20  ;;  %3855 = vmatpush1.bf16.msra.mxu1 %v6531_v26 }
 0xdb6   :  { %3815 = vmatprep.subr.bf16.mxu0 %v6534_v35  ;;  %3856 = vmatprep.subr.bf16.mxu1 %v6537_v4 }
 0xdb9   :  { %3816 = vmatpush1.bf16.msra.mxu0 %v6540_v61  ;;  %3857 = vmatpush1.bf16.msra.mxu1 %v6543_v50 }
 0xdba   :  { %3817 = vmatprep.subr.bf16.mxu0 %v6546_v45  ;;  %3858 = vmatprep.subr.bf16.mxu1 %v6549_v23 }
 0xdbd   :  { %3818 = vmatpush1.bf16.msra.mxu0 %v6552_v3  ;;  %3859 = vmatpush1.bf16.msra.mxu1 %v6555_v44 }
 0xdbe   :  { %3819 = vmatprep.subr.bf16.mxu0 %v6558_v59  ;;  %3860 = vmatprep.subr.bf16.mxu1 %v6561_v28 }
 0xdc1   :  { %3820 = vmatpush1.bf16.msra.mxu0 %v6564_v29  ;;  %3861 = vmatpush1.bf16.msra.mxu1 %v6567_v39 }
 0xdc2   :  { %3821 = vmatprep.subr.bf16.mxu0 %v6570_v30  ;;  %3862 = vmatprep.subr.bf16.mxu1 %v6573_v46 }
 0xdc5   :  { %3822 = vmatpush1.bf16.msra.mxu0 %v6576_v56  ;;  %3863 = vmatpush1.bf16.msra.mxu1 %v6579_v63 }
 0xdc6   :  { %3937 = vmatprep.subr.bf16.mxu0 %v6438_v32  ;;  %3978 = vmatprep.subr.bf16.mxu1 %v6441_v17  ;;  %v3668_v17 = vrot.slane %v3655_v16, %v5493_v9 }
 0xe68   :  { %v3711_v60 = vpop.f32.mrf.mxu0  ;;  %v3752_v14 = vpop.f32.mrf.mxu1 }
 0xe69   :  { %v3712_v5 = vadd.f32 %v3711_v60, %v3660_v24  ;;  %v3753_v19 = vadd.f32 %v3752_v14, %v3668_v17 }
 0xe6a   :  { %v3713_v40 = vpop.f32.mrf.mxu0  ;;  %v3754_v7 = vpop.f32.mrf.mxu1 }
 0xe6b   :  { %v4298_v1 = vmul.f32 -1.442695, %v3712_v5  ;;  %v3714_v31 = vadd.f32 %v3713_v40, %v3664_v58  ;;  %v4300_v8 = vmul.f32 -1.442695, %v3753_v19  ;;  %v3755_v33 = vadd.f32 %v3754_v7, %v3672_v47 }
 0xe6c   :  { %v3715_v6 = vpop.f32.mrf.mxu0  ;;  %v3756_v36 = vpop.f32.mrf.mxu1 }
 0xe6d   :  { %4802 = vpow2.f32 %v4298_v1  ;;  %v4299_v57 = vmul.f32 -1.442695, %v3714_v31 }
 0xe6e   :  { %v3716_v49 = vpop.f32.mrf.mxu0  ;;  %v3757_v32 = vpop.f32.mrf.mxu1 }
 0xe6f   :  { %4804 = vpow2.f32 %v4299_v57  ;;  %v3915_v32 = vld [vmem:[#allocation2 + $0x27] ss:$8 sm:$0xf] }
 0xe70   :  { %4806 = vpow2.f32 %v4300_v8  ;;  %v3920_v17 = vrot.slane %v3915_v32, %v6978_v62 }
 0xe7a   :  { %v4803_v10 = vpop.eup %4802 }
 0xe7b   :  { %v3768_v22 = vadd.f32 1.0, %v4803_v10  ;;  %v3924_v10 = vrot.slane %v3915_v32, %v5498_v11 }
 0xe7c   :  { %v4805_v12 = vpop.eup %4804 }
 0xe7d   :  { %4808 = vrcp.f32 %v3768_v22  ;;  %v3769_v0 = vadd.f32 1.0, %v4805_v12  ;;  %v4807_v38 = vpop.eup %4806 }
 0xe7e   :  { %4810 = vtanh.f32 %v3755_v33  ;;  %v3770_v60 = vadd.f32 1.0, %v4807_v38 }
 0xe7f   :  { %4812 = vrcp.f32 %v3769_v0 }
 0xe80   :  { %4814 = vrcp.f32 %v3770_v60 }
 0xe8a   :  { %v4809_v27 = vpop.eup %4808 }
 0xe8b   :  { %v4811_v51 = vpop.eup %4810 }
 0xe8c   :  { %v4813_v24 = vpop.eup %4812  ;;  %v3779_v14 = vmul.f32 %v4811_v51, %v4809_v27 }
 0xe8d   :  { %v3778_v5 = vmul.f32 %v4813_v24, %v6491_v15  ;;  %v4815_v16 = vpop.eup %4814 }
 0xe8f   :  { %v6589_v58 = vadd.f32 %v3779_v14, %v3778_v5  ;;  %v3928_v5 = vrot.slane %v3915_v32, %v5493_v9 }
 0xe91   :  { %4816 = vtanh.f32 %v6589_v58 }
 0xe9e   :  { %v4817_v40 = vpop.eup %4816 }
 0xe9f   :  { %v3782_v7 = vmul.f32 %v4817_v40, %v4815_v16  ;;  %v3932_v16 = vrot.slane %v3915_v32, %v5500_v13 }
 0xea1   :  { %v3783_v1 = vpack.c.bf16 %v3782_v7, %v3782_v7 }
 0xea3   :  { %3840 = vmatmul.mubr.bf16.vlgmr.msra.gmra.mxu0 %v3783_v1  ;;  %3881 = vmatmul.mubr.bf16.vlgmr.msra.gmra.mxu1 %v3783_v1 }
 0xea4   :  { %3938 = vmatpush1.bf16.msra.mxu0 %v6402_v37  ;;  %3979 = vmatpush1.bf16.msra.mxu1 %v6405_v41  ;;  %v3785_v37 = vld [vmem:[#allocation2 + $0x26] ss:$8 sm:$0xf] }
 0xea5   :  { %3939 = vmatprep.subr.bf16.mxu0 %v6496_v52  ;;  %3980 = vmatprep.subr.bf16.mxu1 %v6499_v25  ;;  %v3790_v41 = vrot.slane %v3785_v37, %v6978_v62 }
 0xea6   :  { %3969 = vmatprep.mubr.bf16.mxu0 %v6812_v42  ;;  %4010 = vmatprep.mubr.bf16.mxu1 %v6812_v42 }
 0xea8   :  { %3940 = vmatpush1.bf16.msra.mxu0 %v6504_v48  ;;  %3981 = vmatpush1.bf16.msra.mxu1 %v6507_v21  ;;  %v3794_v48 = vrot.slane %v3785_v37, %v5498_v11 }
 0xea9   :  { %3941 = vmatprep.subr.bf16.mxu0 %v6510_v34  ;;  %3982 = vmatprep.subr.bf16.mxu1 %v6513_v55 }
 0xeac   :  { %3942 = vmatpush1.bf16.msra.mxu0 %v6516_v53  ;;  %3983 = vmatpush1.bf16.msra.mxu1 %v6519_v18 }
 0xead   :  { %3943 = vmatprep.subr.bf16.mxu0 %v6522_v43  ;;  %3984 = vmatprep.subr.bf16.mxu1 %v6525_v2 }
 0xeb0   :  { %3944 = vmatpush1.bf16.msra.mxu0 %v6528_v20  ;;  %3985 = vmatpush1.bf16.msra.mxu1 %v6531_v26 }
 0xeb1   :  { %3945 = vmatprep.subr.bf16.mxu0 %v6534_v35  ;;  %3986 = vmatprep.subr.bf16.mxu1 %v6537_v4  ;;  %v3798_v35 = vrot.slane %v3785_v37, %v5493_v9 }
 0xeb4   :  { %3946 = vmatpush1.bf16.msra.mxu0 %v6540_v61  ;;  %3987 = vmatpush1.bf16.msra.mxu1 %v6543_v50  ;;  %v3802_v50 = vrot.slane %v3785_v37, %v5500_v13  ;;  %v4307_v13 = vld [vmem:[%s6662_s8 + $0x1] ss:$2 sm:$0x3] }
 0xeb5   :  { %3947 = vmatprep.subr.bf16.mxu0 %v6546_v45  ;;  %3988 = vmatprep.subr.bf16.mxu1 %v6549_v23 }
 0xeb8   :  { %3948 = vmatpush1.bf16.msra.mxu0 %v6552_v3  ;;  %3989 = vmatpush1.bf16.msra.mxu1 %v6555_v44 }
 0xeb9   :  { %3949 = vmatprep.subr.bf16.mxu0 %v6558_v59  ;;  %3990 = vmatprep.subr.bf16.mxu1 %v6561_v28 }
 0xebc   :  { %3950 = vmatpush1.bf16.msra.mxu0 %v6564_v29  ;;  %3991 = vmatpush1.bf16.msra.mxu1 %v6567_v39 }
 0xebd   :  { %3951 = vmatprep.subr.bf16.mxu0 %v6570_v30  ;;  %3992 = vmatprep.subr.bf16.mxu1 %v6573_v46 }
 0xec0   :  { %3952 = vmatpush1.bf16.msra.mxu0 %v6576_v56  ;;  %3993 = vmatpush1.bf16.msra.mxu1 %v6579_v63 }
 0xf63   :  { %v3841_v15 = vpop.f32.mrf.mxu0  ;;  %v3882_v52 = vpop.f32.mrf.mxu1 }
 0xf64   :  { %v3842_v25 = vadd.f32 %v3841_v15, %v3790_v41  ;;  %v3883_v4 = vadd.f32 %v3882_v52, %v3798_v35 }
 0xf65   :  { %v3843_v21 = vpop.f32.mrf.mxu0  ;;  %v3884_v34 = vpop.f32.mrf.mxu1 }
 0xf66   :  { %v4301_v55 = vmul.f32 -1.442695, %v3842_v25  ;;  %v3844_v53 = vadd.f32 %v3843_v21, %v3794_v48  ;;  %v4303_v61 = vmul.f32 -1.442695, %v3883_v4  ;;  %v3885_v23 = vadd.f32 %v3884_v34, %v3802_v50 }
 0xf67   :  { %v3845_v18 = vpop.f32.mrf.mxu0  ;;  %v3886_v43 = vpop.f32.mrf.mxu1  ;;  %v4071_v4 = vrot.slane %v4307_v13, %v6978_v62 }
 0xf68   :  { %4818 = vpow2.f32 %v4301_v55  ;;  %v4302_v2 = vmul.f32 -1.442695, %v3844_v53  ;;  %v4045_v53 = vld [vmem:[%s6662_s8] ss:$2 sm:$0x3]  ;;  %v4044_v43 = vmax.f32 %v6304_v54, 0.0 }
 0xf69   :  { %v3846_v20 = vpop.f32.mrf.mxu0  ;;  %v3887_v26 = vpop.f32.mrf.mxu1 }
 0xf6a   :  { %4820 = vpow2.f32 %v4302_v2  ;;  %v4075_v2 = vrot.slane %v4307_v13, %v5498_v11  ;;  %v4054_v20 = vrot.slane %v4045_v53, %v5498_v11  ;;  %v4087_v11 = vld [vmem:[%s6663_s9] sm:$0x1] }
 0xf6b   :  { %4822 = vpow2.f32 %v4303_v61  ;;  %v4050_v61 = vrot.slane %v4045_v53, %v6978_v62 }
 0xf75   :  { %v4819_v45 = vpop.eup %4818 }
 0xf76   :  { %v3898_v3 = vadd.f32 1.0, %v4819_v45  ;;  %v4079_v45 = vmul.f32 %v4075_v2, %v4044_v43 }
 0xf77   :  { %v4821_v44 = vpop.eup %4820 }
 0xf78   :  { %4824 = vrcp.f32 %v3898_v3  ;;  %v3899_v59 = vadd.f32 1.0, %v4821_v44  ;;  %v4823_v28 = vpop.eup %4822 }
 0xf79   :  { %4826 = vtanh.f32 %v3885_v23  ;;  %v3900_v46 = vadd.f32 1.0, %v4823_v28  ;;  %v4058_v23 = vmul.f32 %v4054_v20, %v4044_v43  ;;  %v4081_v28 = vsel %vm4059_vm4, %v4079_v45, 0.0 }
 0xf7a   :  { %4828 = vrcp.f32 %v3899_v59 }
 0xf7b   :  { %4830 = vrcp.f32 %v3900_v46  ;;  %v4061_v54 = vsel %vm4059_vm4, %v4058_v23, 0.0 }
 0xf85   :  { %v4825_v29 = vpop.eup %4824 }
 0xf86   :  { %v4827_v39 = vpop.eup %4826 }
 0xf87   :  { %v4829_v30 = vpop.eup %4828  ;;  %v3909_v63 = vmul.f32 %v4827_v39, %v4825_v29 }
 0xf88   :  { %v3908_v56 = vmul.f32 %v4829_v30, %v6589_v58  ;;  %v4831_v6 = vpop.eup %4830 }
 0xf8a   :  { %v3910_v31 = vadd.f32 %v3909_v63, %v3908_v56 }
 0xf8c   :  { %4832 = vtanh.f32 %v3910_v31 }
 0xf99   :  { %v4833_v36 = vpop.eup %4832 }
 0xf9a   :  { %v3912_v57 = vmul.f32 %v4833_v36, %v4831_v6 }
 0xf9c   :  { %v3913_v49 = vpack.c.bf16 %v3912_v57, %v3912_v57 }
 0xf9e   :  { %3970 = vmatmul.mubr.bf16.vlgmr.msra.gmra.mxu0 %v3913_v49  ;;  %4011 = vmatmul.mubr.bf16.vlgmr.msra.gmra.mxu1 %v3913_v49 }
0x105e   :  { %v3971_v19 = vpop.f32.mrf.mxu0  ;;  %v4012_v8 = vpop.f32.mrf.mxu1 }
0x105f   :  { %v3972_v47 = vadd.f32 %v3971_v19, %v3920_v17  ;;  %v4013_v14 = vadd.f32 %v4012_v8, %v3928_v5 }
0x1060   :  { %v3973_v33 = vpop.f32.mrf.mxu0  ;;  %v4014_v22 = vpop.f32.mrf.mxu1 }
0x1061   :  { %v4304_v12 = vmul.f32 -1.442695, %v3972_v47  ;;  %v3974_v0 = vadd.f32 %v3973_v33, %v3924_v10  ;;  %v4306_v58 = vmul.f32 -1.442695, %v4013_v14  ;;  %v4015_v7 = vadd.f32 %v4014_v22, %v3932_v16 }
0x1062   :  { %v3975_v38 = vpop.f32.mrf.mxu0  ;;  %v4016_v27 = vpop.f32.mrf.mxu1 }
0x1063   :  { %4834 = vpow2.f32 %v4304_v12  ;;  %v4305_v51 = vmul.f32 -1.442695, %v3974_v0 }
0x1064   :  { %v3976_v24 = vpop.f32.mrf.mxu0  ;;  %v4017_v60 = vpop.f32.mrf.mxu1 }
0x1065   :  { %4836 = vpow2.f32 %v4305_v51 }
0x1066   :  { %4838 = vpow2.f32 %v4306_v58 }
0x1070   :  { %v4835_v40 = vpop.eup %4834 }
0x1071   :  { %v4028_v1 = vadd.f32 1.0, %v4835_v40 }
0x1072   :  { %v4837_v37 = vpop.eup %4836 }
0x1073   :  { %4840 = vrcp.f32 %v4028_v1  ;;  %v4029_v41 = vadd.f32 1.0, %v4837_v37  ;;  %v4839_v15 = vpop.eup %4838 }
0x1074   :  { %4842 = vtanh.f32 %v4015_v7  ;;  %v4030_v21 = vadd.f32 1.0, %v4839_v15 }
0x1075   :  { %4844 = vrcp.f32 %v4029_v41 }
0x1076   :  { %4846 = vrcp.f32 %v4030_v21 }
0x1080   :  { %v4841_v52 = vpop.eup %4840 }
0x1081   :  { %v4843_v25 = vpop.eup %4842 }
0x1082   :  { %v4845_v48 = vpop.eup %4844  ;;  %v4039_v9 = vmul.f32 %v4843_v25, %v4841_v52 }
0x1083   :  { %v4038_v34 = vmul.f32 %v4845_v48, %v3910_v31  ;;  %v4847_v18 = vpop.eup %4846 }
0x1085   :  { %v4040_v55 = vadd.f32 %v4039_v9, %v4038_v34 }
0x1087   :  { %4848 = vtanh.f32 %v4040_v55 }
0x1094   :  { %v4849_v26 = vpop.eup %4848 }
0x1095   :  { %v4042_v35 = vmul.f32 %v4849_v26, %v4847_v18 }
0x1097   :  { %v4043_v50 = vmax.f32 %v4042_v35, 0.0 }
0x1099   :  { %v4078_v3 = vmul.f32 %v4071_v4, %v4043_v50  ;;  %v4057_v44 = vmul.f32 %v4050_v61, %v4043_v50 }
0x109b   :  { %v4080_v59 = vsel %vm4059_vm4, %v4078_v3, 0.0  ;;  %v4060_v29 = vsel %vm4059_vm4, %v4057_v44, 0.0 }
0x109c   :  { %v4082_v39 = vadd.f32 %v4081_v28, %v4080_v59  ;;  %v4062_v30 = vadd.f32 %v4061_v54, %v4060_v29 }
0x109e   :  { %4083 = vadd.xlane.f32.xlu0 %v4082_v39  ;;  %4063 = vadd.xlane.f32.xlu1 %v4062_v30 }
0x1127   :  { %v4084_v62 = vpop.xlane.xlu0 %4083  ;;  %v4064_v46 = vpop.xlane.xlu1 %4063 }
0x1128   :  { %v4086_v56 = vsel %vm4085_vm5, %v4064_v46, %v4084_v62 }
0x1129   :  { %v4088_v63 = vadd.f32 %v4087_v11, %v4086_v56 }
0x112b   :  { %4092 = vrot.lane.b32.xlu0 %v4088_v63, %s5146_s27  ;;  %4090 = vst.msk [vmem:[#allocation12] sm:$0x1] %vm4089_vm6, %v4088_v63 }
0x112c   :  { %5099 = shalt.err (!%p5096_p10)
}
0x112d   :  { %4110 = dma.vmem_to_hbm [thread:$0]  %s4108_s29, 16, %s6664_s10, [#allocation6]   ;;  %vm4099_vm8 = vcmask 0  }
0x112e   :  { %s5148_s3 = smov 127   ;;  %s5149_s14 = smov [#allocation13]  }
0x112f   :  { %s4117_s15 = sshll.u32 %s5149_s14, 4  ;;  %s4118_s15 = int_to_ptr.vmem [resolvable:$true] %s4117_s15 }
0x1130   :  { %s5108_s2 = scalar_lea.vmem %s4118_s15, 16  ;;  %s5112_s16 = scalar_lea.vmem %s4118_s15, 32 }
0x1131   :  { %p5109_p11 = scmp.ne.s32.totalorder %s4118_s15, %s5108_s2  ;;  %p5113_p12 = scmp.lt.s32.totalorder %s4118_s15, %s4118_s15 }
0x1132   :  { %p5114_p13 = scmp.lt.s32.totalorder %s5112_s16, %s5108_s2 }
0x1134   :  { %p5115_p0 = por %p5114_p13, %p5113_p12 }
0x1136   :  { %p5116_p1 = pnand %p5115_p0, %p5109_p11 }
0x119d   :  { %v4093_v31 = vpop.permute.xlu0 %4092 }
0x119e   :  { %vm4095_vm7 = vcmp.gt.f32.partialorder %v4088_v63, %v4093_v31 }
0x119f   :  { %v4096_v6 = vsel %vm4095_vm7, 1, %v6812_v42 }
0x11a0   :  { %4097 = vrot.lane.b32.xlu1 %v4096_v6, %s5148_s3 }
0x1212   :  { %v4098_v36 = vpop.permute.xlu1 %4097 }
0x1213   :  { %4100 = vst.msk [vmem:[#allocation13] sm:$0x1] %vm4099_vm8, %v4098_v36 }
0x1214   :  { %5119 = shalt.err (!%p5116_p1)
}
0x1215   :  { %4120 = dma.vmem_to_hbm [thread:$0]  %s4118_s15, 16, %s6665_s11, [#allocation14]  }
0x1216   :  { %5134 = dma.done.wait [#allocation6], 16  }
0x1217   :  { %5135 = vsyncadd [#allocation6], 4294967280 }
0x1218   :  { %5136 = dma.done.wait [#allocation14], 16  }
0x1219   :  { %5137 = vsyncadd [#allocation14], 4294967280 }
0x121a   :  { %4127 = vsyncpa [#allocation5], 1 }
0x121b   :  { %4128 = vsyncpa [#allocation8], 1 }
0x121c   :  { %4129 = vsyncpa [#allocation11], 1 }
0x121d   :  { %4130 = vsyncpa [#allocation6], 1 }
0x121e   :  { %4131 = vsyncpa [#allocation14], 1 }

</bundles_post_ra>
